<compile_context>
chip_gen: v7x
topology: tpu7x:2x2x1
jax: 0.10.0
libtpu: 0.0.40
codegen_flags: <defaults>
</compile_context>

<pallas_src>
import math

import jax
import jax.numpy as jnp
from jax.experimental import pallas as pl
from jax.experimental.pallas import tpu as pltpu

# ----------------------- small-scale config -----------------------
B = 2            # batch
CMB_LEN = 2      # number of backbone branches (len(cmb))
C_IN = 3         # image channels
IMG = 32         # image spatial size
PATCH = 16       # patch size
EMBED = 128      # embed dim  (ViT-L would be 1024)
DEPTH = 2        # transformer blocks (ViT-L would be 24)
HEADS = 4
HEAD_DIM = EMBED // HEADS
MLP_HID = 4 * EMBED
N_CLASSES = 8
GRID_HW = IMG // PATCH
N_PATCH = GRID_HW * GRID_HW
N_TOK = N_PATCH + 1            # + cls token
N_PAD = 8                      # token rows per image, padded to a sublane multiple
PDIM = C_IN * PATCH * PATCH    # flattened patch dim (conv-as-matmul K)
LN_EPS = 1e-6                  # timm ViT eps
LS_INIT = 1e-5                 # LayerScale init_values
ATTN_SCALE = HEAD_DIM ** -0.5
SQRT2 = math.sqrt(2.0)


# ----------------------- in-kernel math helpers (f32) -----------------------
def _ln(x, g, b):
    mu = jnp.mean(x, axis=-1, keepdims=True)
    var = jnp.mean(jnp.square(x - mu), axis=-1, keepdims=True)
    return (x - mu) * jax.lax.rsqrt(var + LN_EPS) * g + b


def _gelu(x):
    # exact (erf) GELU == torch.nn.GELU()
    return 0.5 * x * (1.0 + jax.lax.erf(x / SQRT2))


# ----------------------- fused ViT backbone kernel -----------------------
# grid = (DEPTH,): one grid step = one transformer block applied to ALL
# B*CMB_LEN images at once (rows batched).  The residual stream persists in a
# VMEM scratch across steps; only one layer's weights are resident per step.
def _vit_kernel(patches_ref, add_ref, bias_ref, patch_w_ref,
                ln1_g_ref, ln1_b_ref,
                q_w_ref, k_w_ref, v_w_ref, q_b_ref, k_b_ref, v_b_ref,
                proj_w_ref, proj_b_ref, ls1_ref,
                ln2_g_ref, ln2_b_ref, fc1_w_ref, fc1_b_ref,
                fc2_w_ref, fc2_b_ref, ls2_ref,
                norm_g_ref, norm_b_ref,
                o_ref, x_scr):
    bf16 = jnp.bfloat16
    f32 = jnp.float32
    d = pl.program_id(0)

    # step 0: patch embed (conv k=p stride=p as one matmul over ALL images'
    # rows) + cls/pos/bias add.  Row layout per image: [cls slot (zeros),
    # N_PATCH patches, padding zeros] -> zero rows stay zero through the matmul.
    @pl.when(d == 0)
    def _():
        tok = jnp.dot(patches_ref[...].astype(bf16), patch_w_ref[...],
                      preferred_element_type=f32)                # (ROWS, EMBED)
        x_scr[...] = tok + add_ref[...]

    x = x_scr[...]                                               # f32 residual stream
    attn_bias = bias_ref[...]                                    # block-diag key mask

    # ---------------- attention branch (pre-norm, LayerScale) ----------------
    xn = _ln(x, ln1_g_ref[...], ln1_b_ref[...])
    xb = xn.astype(bf16)
    acc = jnp.zeros(x.shape, f32)
    for h in range(HEADS):                                       # HEADS=4, static unroll
        # per-head q/k/v via head-split weights: outputs start at lane 0,
        # no 32-lane-offset activation slicing.  Attention scale is pre-folded
        # into q_w / q_b host-side.
        q = jnp.dot(xb, q_w_ref[h], preferred_element_type=f32) + q_b_ref[h]
        k = jnp.dot(xb, k_w_ref[h], preferred_element_type=f32) + k_b_ref[h]
        v = jnp.dot(xb, v_w_ref[h], preferred_element_type=f32) + v_b_ref[h]
        # q @ k^T without materializing the transpose (f32 scores: -1e30 mask safe)
        s = jax.lax.dot_general(q, k, (((1,), (1,)), ((), ())),
                                preferred_element_type=f32)       # (ROWS, ROWS)
        s = s + attn_bias                                         # keep it per-image
        s = s - jnp.max(s, axis=-1, keepdims=True)
        p = jnp.exp(s)
        p = p * pl.reciprocal(jnp.sum(p, axis=-1, keepdims=True), approx=True)
        o_h = jnp.dot(p, v, preferred_element_type=f32)           # (ROWS, HEAD_DIM)
        # head-concat + output projection fused as a sum of per-head matmuls
        acc = acc + jnp.dot(o_h.astype(bf16), proj_w_ref[h],
                            preferred_element_type=f32)
    x = x + ls1_ref[...] * (acc + proj_b_ref[...])                # LayerScale residual

    # ---------------- mlp branch ----------------
    xn = _ln(x, ln2_g_ref[...], ln2_b_ref[...])
    h1 = jnp.dot(xn.astype(bf16), fc1_w_ref[...],
                 preferred_element_type=f32) + fc1_b_ref[...]
    h1 = _gelu(h1)
    h2 = jnp.dot(h1.astype(bf16), fc2_w_ref[...],
                 preferred_element_type=f32) + fc2_b_ref[...]
    x = x + ls2_ref[...] * h2                                     # LayerScale residual

    x_scr[...] = x

    # last step: final LayerNorm, full-slab lane-dense store
    # (cls rows are sliced out in JAX; timm num_classes=0, global_pool='token')
    @pl.when(d == pl.num_programs(0) - 1)
    def _():
        o_ref[...] = _ln(x, norm_g_ref[...], norm_b_ref[...])


# ----------------------- BlockSpec helpers -----------------------
def _const_spec(shape):
    # constant block index across the depth grid -> DMA'd once, never re-fetched
    zeros = (0,) * len(shape)
    return pl.BlockSpec(shape, lambda d: zeros)


def _layer_spec(per_layer_shape):
    # one layer's slice of a depth-stacked weight; leading depth dim squeezed out
    zeros = (0,) * len(per_layer_shape)
    return pl.BlockSpec((None,) + tuple(per_layer_shape), lambda d: (d,) + zeros)


# ----------------------- wrappers -----------------------
def vit_features(x_imgs, p):
    """x_imgs: (B*CMB_LEN, C, H, W) NCHW -> (B*CMB_LEN, EMBED) cls features."""
    bi = x_imgs.shape[0]
    rows = bi * N_PAD

    # per-image rows: [cls slot (zeros), N_PATCH patches, padding zeros]
    patches = (x_imgs.reshape(bi, C_IN, GRID_HW, PATCH, GRID_HW, PATCH)
               .transpose(0, 2, 4, 1, 3, 5)
               .reshape(bi, N_PATCH, PDIM))
    patches = jnp.pad(patches, ((0, 0), (1, N_PAD - N_TOK), (0, 0)))
    patches = patches.reshape(rows, PDIM)

    # additive tensor: cls+pos on row 0, patch_bias+pos on patch rows, 0 on padding
    add_one = jnp.concatenate([
        p["cls_token"] + p["pos_embed"][0:1],
        p["patch_b"][None, :] + p["pos_embed"][1:],
        jnp.zeros((N_PAD - N_TOK, EMBED), jnp.float32),
    ], axis=0)
    add = jnp.tile(add_one, (bi, 1))                               # (rows, EMBED)

    # block-diagonal additive attention mask: a token may only attend to the
    # real (non-padded) tokens of its own image
    img_of = jnp.arange(rows) // N_PAD
    tok_of = jnp.arange(rows) % N_PAD
    allowed = (img_of[:, None] == img_of[None, :]) & (tok_of[None, :] < N_TOK)
    attn_bias = jnp.where(allowed, 0.0, -1e30).astype(jnp.float32)

    bw = lambda a: a.astype(jnp.bfloat16)   # matmul weights travel as bf16

    # head-split q/k/v and proj weights (no lane-offset slicing in the kernel);
    # attention scale folded into q weight/bias host-side (review item 8).
    def split_cols(w):                      # (D,E,E) -> (D,HEADS,E,HEAD_DIM)
        return w.reshape(DEPTH, EMBED, HEADS, HEAD_DIM).transpose(0, 2, 1, 3)

    qkv_w = p["qkv_w"]                      # (DEPTH, EMBED, 3*EMBED): [q | k | v]
    q_w = split_cols(qkv_w[:, :, 0:EMBED]) * ATTN_SCALE
    k_w = split_cols(qkv_w[:, :, EMBED:2 * EMBED])
    v_w = split_cols(qkv_w[:, :, 2 * EMBED:])
    qkv_b = p["qkv_b"][:, 0, :]             # (DEPTH, 3*EMBED)
    q_b = qkv_b[:, 0:EMBED].reshape(DEPTH, HEADS, 1, HEAD_DIM) * ATTN_SCALE
    k_b = qkv_b[:, EMBED:2 * EMBED].reshape(DEPTH, HEADS, 1, HEAD_DIM)
    v_b = qkv_b[:, 2 * EMBED:].reshape(DEPTH, HEADS, 1, HEAD_DIM)
    proj_w = p["proj_w"].reshape(DEPTH, HEADS, HEAD_DIM, EMBED)

    weight_args = [
        bw(p["patch_w"]),
        p["ln1_g"], p["ln1_b"],
        bw(q_w), bw(k_w), bw(v_w), q_b, k_b, v_b,
        bw(proj_w), p["proj_b"], p["ls1"],
        p["ln2_g"], p["ln2_b"], bw(p["fc1_w"]), p["fc1_b"],
        bw(p["fc2_w"]), p["fc2_b"], p["ls2"],
        p["norm_g"], p["norm_b"],
    ]
    in_specs = [
        _const_spec((rows, PDIM)),                       # patches (all images)
        _const_spec((rows, EMBED)),                      # cls/pos/bias adder
        _const_spec((rows, rows)),                       # block-diag attn mask
        _const_spec((PDIM, EMBED)),                      # patch-embed weight
        _layer_spec((1, EMBED)), _layer_spec((1, EMBED)),            # ln1 g/b
        _layer_spec((HEADS, EMBED, HEAD_DIM)),                       # q_w
        _layer_spec((HEADS, EMBED, HEAD_DIM)),                       # k_w
        _layer_spec((HEADS, EMBED, HEAD_DIM)),                       # v_w
        _layer_spec((HEADS, 1, HEAD_DIM)),                           # q_b
        _layer_spec((HEADS, 1, HEAD_DIM)),                           # k_b
        _layer_spec((HEADS, 1, HEAD_DIM)),                           # v_b
        _layer_spec((HEADS, HEAD_DIM, EMBED)),                       # proj_w
        _layer_spec((1, EMBED)), _layer_spec((1, EMBED)),            # proj_b, ls1
        _layer_spec((1, EMBED)), _layer_spec((1, EMBED)),            # ln2 g/b
        _layer_spec((EMBED, MLP_HID)), _layer_spec((1, MLP_HID)),    # fc1 w/b
        _layer_spec((MLP_HID, EMBED)), _layer_spec((1, EMBED)),      # fc2 w/b
        _layer_spec((1, EMBED)),                                     # ls2
        _const_spec((1, EMBED)), _const_spec((1, EMBED)),            # final norm g/b
    ]

    slab = pl.pallas_call(
        _vit_kernel,
        out_shape=jax.ShapeDtypeStruct((rows, EMBED), jnp.float32),
        grid=(DEPTH,),
        in_specs=in_specs,
        out_specs=_const_spec((rows, EMBED)),            # full-slab lane-dense store
        scratch_shapes=[pltpu.VMEM((rows, EMBED), jnp.float32)],   # residual stream
        compiler_params=pltpu.CompilerParams(
            # depth axis carries the residual stream -> sequential ("arbitrary")
            dimension_semantics=("arbitrary",)),
    )(patches, add, attn_bias, *weight_args)

    # cls-token pooling (row 0 of each image's N_PAD-row block)
    return slab.reshape(bi, N_PAD, EMBED)[:, 0, :]


def hiuni_forward(x, params):
    """x: (B, cmb_len, C, H, W) -> (B, n_classes)."""
    b = x.shape[0]
    # all ensemble branches share one weight set (PyTorch deepcopy of a single
    # backbone) -> run every branch's image through the same fused kernel
    x_all = x.reshape(b * CMB_LEN, C_IN, IMG, IMG)
    feats = vit_features(x_all, params)                  # (B*CMB, EMBED)
    f = feats.reshape(b, CMB_LEN * EMBED)                # == torch.stack(dim=1).view(b,-1)

    # ensemble MLP head: two tiny matmuls -> plain jnp (XLA fuses); a separate
    # pallas_call here is pure dispatch overhead (perf review item 7).
    # nn.Dropout(0.25): inference mode -> identity.
    h = jnp.dot(f, params["head_fc1_w"]) + params["head_fc1_b"]
    h = jax.nn.gelu(h, approximate=False)
    return jnp.dot(h, params["head_fc2_w"]) + params["head_fc2_b"]


# ----------------------- parameter init (deterministic) -----------------------
def _xavier(key, fan_in, fan_out):
    std = math.sqrt(2.0 / (fan_in + fan_out))
    return jax.random.normal(key, (fan_in, fan_out), jnp.float32) * std


def _kaiming(key, fan_in, fan_out):
    std = math.sqrt(2.0 / fan_in)
    return jax.random.normal(key, (fan_in, fan_out), jnp.float32) * std


def init_params(key):
    ks = iter(jax.random.split(key, 8 * DEPTH + 16))
    qkv_w, proj_w, fc1_w, fc2_w = [], [], [], []
    for _ in range(DEPTH):
        qkv_w.append(_xavier(next(ks), EMBED, 3 * EMBED))
        proj_w.append(_xavier(next(ks), EMBED, EMBED))
        fc1_w.append(_xavier(next(ks), EMBED, MLP_HID))
        fc2_w.append(_xavier(next(ks), MLP_HID, EMBED))
    params = {
        # backbone (shared by all CMB_LEN branches: PyTorch deepcopy => identical)
        "patch_w": _kaiming(next(ks), PDIM, EMBED),
        "patch_b": jnp.zeros((EMBED,), jnp.float32),
        "cls_token": jax.random.normal(next(ks), (1, EMBED), jnp.float32) * 1e-6,
        "pos_embed": jax.random.normal(next(ks), (N_TOK, EMBED), jnp.float32) * 0.02,
        "ln1_g": jnp.ones((DEPTH, 1, EMBED), jnp.float32),
        "ln1_b": jnp.zeros((DEPTH, 1, EMBED), jnp.float32),
        "qkv_w": jnp.stack(qkv_w),
        "qkv_b": jnp.zeros((DEPTH, 1, 3 * EMBED), jnp.float32),
        "proj_w": jnp.stack(proj_w),
        "proj_b": jnp.zeros((DEPTH, 1, EMBED), jnp.float32),
        "ls1": jnp.full((DEPTH, 1, EMBED), LS_INIT, jnp.float32),
        "ln2_g": jnp.ones((DEPTH, 1, EMBED), jnp.float32),
        "ln2_b": jnp.zeros((DEPTH, 1, EMBED), jnp.float32),
        "fc1_w": jnp.stack(fc1_w),
        "fc1_b": jnp.zeros((DEPTH, 1, MLP_HID), jnp.float32),
        "fc2_w": jnp.stack(fc2_w),
        "fc2_b": jnp.zeros((DEPTH, 1, EMBED), jnp.float32),
        "ls2": jnp.full((DEPTH, 1, EMBED), LS_INIT, jnp.float32),
        "norm_g": jnp.ones((1, EMBED), jnp.float32),
        "norm_b": jnp.zeros((1, EMBED), jnp.float32),
        # ensemble MLP head
        "head_fc1_w": _xavier(next(ks), CMB_LEN * EMBED, EMBED),
        "head_fc1_b": jnp.zeros((EMBED,), jnp.float32),
        "head_fc2_w": _xavier(next(ks), EMBED, N_CLASSES),
        "head_fc2_b": jnp.zeros((N_CLASSES,), jnp.float32),
    }
    return params
    # TODO(synk): checkpoint loading / layer freezing are training-time features
    # with no effect on the forward pass; not reproduced here.


# ----------------------- main -----------------------
if __name__ == "__main__":
    key = jax.random.PRNGKey(0)
    k_x, k_p = jax.random.split(key)
    x = jax.random.normal(k_x, (B, CMB_LEN, C_IN, IMG, IMG), jnp.float32)
    params = init_params(k_p)

    fwd = jax.jit(hiuni_forward)
    out = jax.block_until_ready(fwd(x, params))
    assert out.shape == (B, N_CLASSES)
    assert bool(jnp.all(jnp.isfinite(out)))
    print("KERNEL_OK")
</pallas_src>

<mosaic_0001>
module attributes {stable_mosaic.version = 11 : i64} {
  func.func @_vit_kernel(%arg0: i32, %arg1: memref<32x768xf32, #tpu.memory_space<vmem>>, %arg2: memref<32x128xf32, #tpu.memory_space<vmem>>, %arg3: memref<32x32xf32, #tpu.memory_space<vmem>>, %arg4: memref<768x128xbf16, #tpu.memory_space<vmem>>, %arg5: memref<1x1x128xf32, #tpu.memory_space<vmem>>, %arg6: memref<1x1x128xf32, #tpu.memory_space<vmem>>, %arg7: memref<1x4x128x32xbf16, #tpu.memory_space<vmem>>, %arg8: memref<1x4x128x32xbf16, #tpu.memory_space<vmem>>, %arg9: memref<1x4x128x32xbf16, #tpu.memory_space<vmem>>, %arg10: memref<1x4x1x32xf32, #tpu.memory_space<vmem>>, %arg11: memref<1x4x1x32xf32, #tpu.memory_space<vmem>>, %arg12: memref<1x4x1x32xf32, #tpu.memory_space<vmem>>, %arg13: memref<1x4x32x128xbf16, #tpu.memory_space<vmem>>, %arg14: memref<1x1x128xf32, #tpu.memory_space<vmem>>, %arg15: memref<1x1x128xf32, #tpu.memory_space<vmem>>, %arg16: memref<1x1x128xf32, #tpu.memory_space<vmem>>, %arg17: memref<1x1x128xf32, #tpu.memory_space<vmem>>, %arg18: memref<1x128x512xbf16, #tpu.memory_space<vmem>>, %arg19: memref<1x1x512xf32, #tpu.memory_space<vmem>>, %arg20: memref<1x512x128xbf16, #tpu.memory_space<vmem>>, %arg21: memref<1x1x128xf32, #tpu.memory_space<vmem>>, %arg22: memref<1x1x128xf32, #tpu.memory_space<vmem>>, %arg23: memref<1x128xf32, #tpu.memory_space<vmem>>, %arg24: memref<1x128xf32, #tpu.memory_space<vmem>>, %arg25: memref<32x128xf32, #tpu.memory_space<vmem>>, %arg26: memref<32x128xf32, #tpu.memory_space<vmem>>) attributes {dimension_semantics = [#tpu.dimension_semantics<arbitrary>], iteration_bounds = array<i64: 2>, scalar_prefetch = 0 : i64, scratch_operands = 1 : i64, tpu.core_type = #tpu.core_type<tc>, window_params = [{pipeline_mode = #tpu.pipeline_mode<synchronous>, transform_indices = @transform_0, window_bounds = array<i64: 32, 768>}, {pipeline_mode = #tpu.pipeline_mode<synchronous>, transform_indices = @transform_1, window_bounds = array<i64: 32, 128>}, {pipeline_mode = #tpu.pipeline_mode<synchronous>, transform_indices = @transform_2, window_bounds = array<i64: 32, 32>}, {pipeline_mode = #tpu.pipeline_mode<synchronous>, transform_indices = @transform_3, window_bounds = array<i64: 768, 128>}, {transform_indices = @transform_4, window_bounds = array<i64: 1, 1, 128>}, {transform_indices = @transform_5, window_bounds = array<i64: 1, 1, 128>}, {transform_indices = @transform_6, window_bounds = array<i64: 1, 4, 128, 32>}, {transform_indices = @transform_7, window_bounds = array<i64: 1, 4, 128, 32>}, {transform_indices = @transform_8, window_bounds = array<i64: 1, 4, 128, 32>}, {transform_indices = @transform_9, window_bounds = array<i64: 1, 4, 1, 32>}, {transform_indices = @transform_10, window_bounds = array<i64: 1, 4, 1, 32>}, {transform_indices = @transform_11, window_bounds = array<i64: 1, 4, 1, 32>}, {transform_indices = @transform_12, window_bounds = array<i64: 1, 4, 32, 128>}, {transform_indices = @transform_13, window_bounds = array<i64: 1, 1, 128>}, {transform_indices = @transform_14, window_bounds = array<i64: 1, 1, 128>}, {transform_indices = @transform_15, window_bounds = array<i64: 1, 1, 128>}, {transform_indices = @transform_16, window_bounds = array<i64: 1, 1, 128>}, {transform_indices = @transform_17, window_bounds = array<i64: 1, 128, 512>}, {transform_indices = @transform_18, window_bounds = array<i64: 1, 1, 512>}, {transform_indices = @transform_19, window_bounds = array<i64: 1, 512, 128>}, {transform_indices = @transform_20, window_bounds = array<i64: 1, 1, 128>}, {transform_indices = @transform_21, window_bounds = array<i64: 1, 1, 128>}, {pipeline_mode = #tpu.pipeline_mode<synchronous>, transform_indices = @transform_22, window_bounds = array<i64: 1, 128>}, {pipeline_mode = #tpu.pipeline_mode<synchronous>, transform_indices = @transform_23, window_bounds = array<i64: 1, 128>}, {pipeline_mode = #tpu.pipeline_mode<synchronous>, transform_indices = @transform_24, window_bounds = array<i64: 32, 128>}]} {
    %c0_i32 = arith.constant 0 : i32
    %0 = arith.cmpi eq, %arg0, %c0_i32 : i32
    %1 = arith.extui %0 : i1 to i32
    %c0_i32_0 = arith.constant 0 : i32
    %2 = arith.cmpi ne, %1, %c0_i32_0 : i32
    scf.if %2 {
      %c0_196 = arith.constant 0 : index
      %c0_197 = arith.constant 0 : index
      %257 = vector.load %arg1[%c0_196, %c0_197] : memref<32x768xf32, #tpu.memory_space<vmem>>, vector<32x768xf32>
      %258 = arith.truncf %257 : vector<32x768xf32> to vector<32x768xbf16>
      %c0_198 = arith.constant 0 : index
      %c0_199 = arith.constant 0 : index
      %259 = vector.load %arg4[%c0_198, %c0_199] : memref<768x128xbf16, #tpu.memory_space<vmem>>, vector<768x128xbf16>
      %cst_200 = arith.constant dense<0.000000e+00> : vector<32x128xf32>
      %260 = tpu.matmul %258, %259, %cst_200 {dimension_numbers = #tpu.dot_dimension_numbers<[1], [0], [0], [1], [0, 0, 1, 1], [], []>} : vector<32x768xbf16>, vector<768x128xbf16>, vector<32x128xf32> -> vector<32x128xf32>
      %c0_201 = arith.constant 0 : index
      %c0_202 = arith.constant 0 : index
      %261 = vector.load %arg2[%c0_201, %c0_202] : memref<32x128xf32, #tpu.memory_space<vmem>>, vector<32x128xf32>
      %262 = arith.addf %260, %261 : vector<32x128xf32>
      %c0_203 = arith.constant 0 : index
      %c0_204 = arith.constant 0 : index
      %263 = vector.load %arg26[%c0_203, %c0_204] : memref<32x128xf32, #tpu.memory_space<vmem>>, vector<32x128xf32>
      tpu.vector_store %arg26[%c0_203, %c0_204], %262 {strides = array<i32>} : memref<32x128xf32, #tpu.memory_space<vmem>>, vector<32x128xf32>,
    } else {
    }
    %c0 = arith.constant 0 : index
    %c0_1 = arith.constant 0 : index
    %3 = vector.load %arg26[%c0, %c0_1] : memref<32x128xf32, #tpu.memory_space<vmem>>, vector<32x128xf32>
    %c0_2 = arith.constant 0 : index
    %c0_3 = arith.constant 0 : index
    %4 = vector.load %arg3[%c0_2, %c0_3] : memref<32x32xf32, #tpu.memory_space<vmem>>, vector<32x32xf32>
    %c0_4 = arith.constant 0 : index
    %c0_5 = arith.constant 0 : index
    %c0_6 = arith.constant 0 : index
    %5 = vector.load %arg5[%c0_4, %c0_5, %c0_6] : memref<1x1x128xf32, #tpu.memory_space<vmem>>, vector<1x1x128xf32>
    %6 = vector.shape_cast %5 : vector<1x1x128xf32> to vector<1x128xf32>
    %c0_7 = arith.constant 0 : index
    %c0_8 = arith.constant 0 : index
    %c0_9 = arith.constant 0 : index
    %7 = vector.load %arg6[%c0_7, %c0_8, %c0_9] : memref<1x1x128xf32, #tpu.memory_space<vmem>>, vector<1x1x128xf32>
    %8 = vector.shape_cast %7 : vector<1x1x128xf32> to vector<1x128xf32>
    %cst = arith.constant dense<0.000000e+00> : vector<32xf32>
    %9 = vector.multi_reduction <add>, %3, %cst [1] : vector<32x128xf32> to vector<32xf32>
    %10 = vector.shape_cast %9 : vector<32xf32> to vector<32x1xf32>
    %cst_10 = arith.constant 1.280000e+02 : f32
    %11 = vector.broadcast %cst_10 : f32 to vector<32x1xf32>
    %12 = arith.divf %10, %11 : vector<32x1xf32>
    %13 = vector.broadcast %12 : vector<32x1xf32> to vector<32x128xf32>
    %14 = arith.subf %3, %13 : vector<32x128xf32>
    %15 = arith.mulf %14, %14 : vector<32x128xf32>
    %cst_11 = arith.constant dense<0.000000e+00> : vector<32xf32>
    %16 = vector.multi_reduction <add>, %15, %cst_11 [1] : vector<32x128xf32> to vector<32xf32>
    %17 = vector.shape_cast %16 : vector<32xf32> to vector<32x1xf32>
    %cst_12 = arith.constant 1.280000e+02 : f32
    %18 = vector.broadcast %cst_12 : f32 to vector<32x1xf32>
    %19 = arith.divf %17, %18 : vector<32x1xf32>
    %20 = vector.broadcast %12 : vector<32x1xf32> to vector<32x128xf32>
    %21 = arith.subf %3, %20 : vector<32x128xf32>
    %cst_13 = arith.constant 9.99999997E-7 : f32
    %22 = vector.broadcast %cst_13 : f32 to vector<32x1xf32>
    %23 = arith.addf %19, %22 : vector<32x1xf32>
    %24 = math.rsqrt %23 : vector<32x1xf32>
    %25 = vector.broadcast %24 : vector<32x1xf32> to vector<32x128xf32>
    %26 = arith.mulf %21, %25 : vector<32x128xf32>
    %27 = vector.broadcast %6 : vector<1x128xf32> to vector<32x128xf32>
    %28 = arith.mulf %26, %27 : vector<32x128xf32>
    %29 = vector.broadcast %8 : vector<1x128xf32> to vector<32x128xf32>
    %30 = arith.addf %28, %29 : vector<32x128xf32>
    %31 = arith.truncf %30 : vector<32x128xf32> to vector<32x128xbf16>
    %cst_14 = arith.constant 0.000000e+00 : f32
    %32 = vector.broadcast %cst_14 : f32 to vector<32x128xf32>
    %c0_15 = arith.constant 0 : index
    %c0_16 = arith.constant 0 : index
    %c0_17 = arith.constant 0 : index
    %c0_18 = arith.constant 0 : index
    %33 = vector.load %arg7[%c0_15, %c0_16, %c0_17, %c0_18] : memref<1x4x128x32xbf16, #tpu.memory_space<vmem>>, vector<1x1x128x32xbf16>
    %34 = vector.shape_cast %33 : vector<1x1x128x32xbf16> to vector<128x32xbf16>
    %cst_19 = arith.constant dense<0.000000e+00> : vector<32x32xf32>
    %35 = tpu.matmul %31, %34, %cst_19 {dimension_numbers = #tpu.dot_dimension_numbers<[1], [0], [0], [1], [0, 0, 1, 1], [], []>} : vector<32x128xbf16>, vector<128x32xbf16>, vector<32x32xf32> -> vector<32x32xf32>
    %c0_20 = arith.constant 0 : index
    %c0_21 = arith.constant 0 : index
    %c0_22 = arith.constant 0 : index
    %c0_23 = arith.constant 0 : index
    %36 = vector.load %arg10[%c0_20, %c0_21, %c0_22, %c0_23] : memref<1x4x1x32xf32, #tpu.memory_space<vmem>>, vector<1x1x1x32xf32>
    %37 = vector.shape_cast %36 : vector<1x1x1x32xf32> to vector<1x32xf32>
    %38 = vector.broadcast %37 : vector<1x32xf32> to vector<32x32xf32>
    %39 = arith.addf %35, %38 : vector<32x32xf32>
    %c0_24 = arith.constant 0 : index
    %c0_25 = arith.constant 0 : index
    %c0_26 = arith.constant 0 : index
    %c0_27 = arith.constant 0 : index
    %40 = vector.load %arg8[%c0_24, %c0_25, %c0_26, %c0_27] : memref<1x4x128x32xbf16, #tpu.memory_space<vmem>>, vector<1x1x128x32xbf16>
    %41 = vector.shape_cast %40 : vector<1x1x128x32xbf16> to vector<128x32xbf16>
    %cst_28 = arith.constant dense<0.000000e+00> : vector<32x32xf32>
    %42 = tpu.matmul %31, %41, %cst_28 {dimension_numbers = #tpu.dot_dimension_numbers<[1], [0], [0], [1], [0, 0, 1, 1], [], []>} : vector<32x128xbf16>, vector<128x32xbf16>, vector<32x32xf32> -> vector<32x32xf32>
    %c0_29 = arith.constant 0 : index
    %c0_30 = arith.constant 0 : index
    %c0_31 = arith.constant 0 : index
    %c0_32 = arith.constant 0 : index
    %43 = vector.load %arg11[%c0_29, %c0_30, %c0_31, %c0_32] : memref<1x4x1x32xf32, #tpu.memory_space<vmem>>, vector<1x1x1x32xf32>
    %44 = vector.shape_cast %43 : vector<1x1x1x32xf32> to vector<1x32xf32>
    %45 = vector.broadcast %44 : vector<1x32xf32> to vector<32x32xf32>
    %46 = arith.addf %42, %45 : vector<32x32xf32>
    %c0_33 = arith.constant 0 : index
    %c0_34 = arith.constant 0 : index
    %c0_35 = arith.constant 0 : index
    %c0_36 = arith.constant 0 : index
    %47 = vector.load %arg9[%c0_33, %c0_34, %c0_35, %c0_36] : memref<1x4x128x32xbf16, #tpu.memory_space<vmem>>, vector<1x1x128x32xbf16>
    %48 = vector.shape_cast %47 : vector<1x1x128x32xbf16> to vector<128x32xbf16>
    %cst_37 = arith.constant dense<0.000000e+00> : vector<32x32xf32>
    %49 = tpu.matmul %31, %48, %cst_37 {dimension_numbers = #tpu.dot_dimension_numbers<[1], [0], [0], [1], [0, 0, 1, 1], [], []>} : vector<32x128xbf16>, vector<128x32xbf16>, vector<32x32xf32> -> vector<32x32xf32>
    %c0_38 = arith.constant 0 : index
    %c0_39 = arith.constant 0 : index
    %c0_40 = arith.constant 0 : index
    %c0_41 = arith.constant 0 : index
    %50 = vector.load %arg12[%c0_38, %c0_39, %c0_40, %c0_41] : memref<1x4x1x32xf32, #tpu.memory_space<vmem>>, vector<1x1x1x32xf32>
    %51 = vector.shape_cast %50 : vector<1x1x1x32xf32> to vector<1x32xf32>
    %52 = vector.broadcast %51 : vector<1x32xf32> to vector<32x32xf32>
    %53 = arith.addf %49, %52 : vector<32x32xf32>
    %cst_42 = arith.constant dense<0.000000e+00> : vector<32x32xf32>
    %54 = tpu.matmul %39, %46, %cst_42 {dimension_numbers = #tpu.dot_dimension_numbers<[1], [1], [0], [0], [0, 0, 1, 0], [], []>} : vector<32x32xf32>, vector<32x32xf32>, vector<32x32xf32> -> vector<32x32xf32>
    %55 = arith.addf %54, %4 : vector<32x32xf32>
    %cst_43 = arith.constant dense<0xFF800000> : vector<32xf32>
    %56 = vector.multi_reduction <maximumf>, %55, %cst_43 [1] : vector<32x32xf32> to vector<32xf32>
    %57 = vector.shape_cast %56 : vector<32xf32> to vector<32x1xf32>
    %58 = vector.broadcast %57 : vector<32x1xf32> to vector<32x32xf32>
    %59 = arith.subf %55, %58 : vector<32x32xf32>
    %60 = math.exp %59 : vector<32x32xf32>
    %cst_44 = arith.constant dense<0.000000e+00> : vector<32xf32>
    %61 = vector.multi_reduction <add>, %60, %cst_44 [1] : vector<32x32xf32> to vector<32xf32>
    %62 = vector.shape_cast %61 : vector<32xf32> to vector<32x1xf32>
    %63 = tpu.reciprocal %62 {approx = true} : vector<32x1xf32> -> vector<32x1xf32>
    %64 = vector.broadcast %63 : vector<32x1xf32> to vector<32x32xf32>
    %65 = arith.mulf %60, %64 : vector<32x32xf32>
    %cst_45 = arith.constant dense<0.000000e+00> : vector<32x32xf32>
    %66 = tpu.matmul %65, %53, %cst_45 {dimension_numbers = #tpu.dot_dimension_numbers<[1], [0], [0], [1], [0, 0, 1, 1], [], []>} : vector<32x32xf32>, vector<32x32xf32>, vector<32x32xf32> -> vector<32x32xf32>
    %67 = arith.truncf %66 : vector<32x32xf32> to vector<32x32xbf16>
    %c0_46 = arith.constant 0 : index
    %c0_47 = arith.constant 0 : index
    %c0_48 = arith.constant 0 : index
    %c0_49 = arith.constant 0 : index
    %68 = vector.load %arg13[%c0_46, %c0_47, %c0_48, %c0_49] : memref<1x4x32x128xbf16, #tpu.memory_space<vmem>>, vector<1x1x32x128xbf16>
    %69 = vector.shape_cast %68 : vector<1x1x32x128xbf16> to vector<32x128xbf16>
    %cst_50 = arith.constant dense<0.000000e+00> : vector<32x128xf32>
    %70 = tpu.matmul %67, %69, %cst_50 {dimension_numbers = #tpu.dot_dimension_numbers<[1], [0], [0], [1], [0, 0, 1, 1], [], []>} : vector<32x32xbf16>, vector<32x128xbf16>, vector<32x128xf32> -> vector<32x128xf32>
    %71 = arith.addf %32, %70 : vector<32x128xf32>
    %c0_51 = arith.constant 0 : index
    %c1 = arith.constant 1 : index
    %c0_52 = arith.constant 0 : index
    %c0_53 = arith.constant 0 : index
    %72 = vector.load %arg7[%c0_51, %c1, %c0_52, %c0_53] : memref<1x4x128x32xbf16, #tpu.memory_space<vmem>>, vector<1x1x128x32xbf16>
    %73 = vector.shape_cast %72 : vector<1x1x128x32xbf16> to vector<128x32xbf16>
    %cst_54 = arith.constant dense<0.000000e+00> : vector<32x32xf32>
    %74 = tpu.matmul %31, %73, %cst_54 {dimension_numbers = #tpu.dot_dimension_numbers<[1], [0], [0], [1], [0, 0, 1, 1], [], []>} : vector<32x128xbf16>, vector<128x32xbf16>, vector<32x32xf32> -> vector<32x32xf32>
    %c0_55 = arith.constant 0 : index
    %c1_56 = arith.constant 1 : index
    %c0_57 = arith.constant 0 : index
    %c0_58 = arith.constant 0 : index
    %75 = vector.load %arg10[%c0_55, %c1_56, %c0_57, %c0_58] : memref<1x4x1x32xf32, #tpu.memory_space<vmem>>, vector<1x1x1x32xf32>
    %76 = vector.shape_cast %75 : vector<1x1x1x32xf32> to vector<1x32xf32>
    %77 = vector.broadcast %76 : vector<1x32xf32> to vector<32x32xf32>
    %78 = arith.addf %74, %77 : vector<32x32xf32>
    %c0_59 = arith.constant 0 : index
    %c1_60 = arith.constant 1 : index
    %c0_61 = arith.constant 0 : index
    %c0_62 = arith.constant 0 : index
    %79 = vector.load %arg8[%c0_59, %c1_60, %c0_61, %c0_62] : memref<1x4x128x32xbf16, #tpu.memory_space<vmem>>, vector<1x1x128x32xbf16>
    %80 = vector.shape_cast %79 : vector<1x1x128x32xbf16> to vector<128x32xbf16>
    %cst_63 = arith.constant dense<0.000000e+00> : vector<32x32xf32>
    %81 = tpu.matmul %31, %80, %cst_63 {dimension_numbers = #tpu.dot_dimension_numbers<[1], [0], [0], [1], [0, 0, 1, 1], [], []>} : vector<32x128xbf16>, vector<128x32xbf16>, vector<32x32xf32> -> vector<32x32xf32>
    %c0_64 = arith.constant 0 : index
    %c1_65 = arith.constant 1 : index
    %c0_66 = arith.constant 0 : index
    %c0_67 = arith.constant 0 : index
    %82 = vector.load %arg11[%c0_64, %c1_65, %c0_66, %c0_67] : memref<1x4x1x32xf32, #tpu.memory_space<vmem>>, vector<1x1x1x32xf32>
    %83 = vector.shape_cast %82 : vector<1x1x1x32xf32> to vector<1x32xf32>
    %84 = vector.broadcast %83 : vector<1x32xf32> to vector<32x32xf32>
    %85 = arith.addf %81, %84 : vector<32x32xf32>
    %c0_68 = arith.constant 0 : index
    %c1_69 = arith.constant 1 : index
    %c0_70 = arith.constant 0 : index
    %c0_71 = arith.constant 0 : index
    %86 = vector.load %arg9[%c0_68, %c1_69, %c0_70, %c0_71] : memref<1x4x128x32xbf16, #tpu.memory_space<vmem>>, vector<1x1x128x32xbf16>
    %87 = vector.shape_cast %86 : vector<1x1x128x32xbf16> to vector<128x32xbf16>
    %cst_72 = arith.constant dense<0.000000e+00> : vector<32x32xf32>
    %88 = tpu.matmul %31, %87, %cst_72 {dimension_numbers = #tpu.dot_dimension_numbers<[1], [0], [0], [1], [0, 0, 1, 1], [], []>} : vector<32x128xbf16>, vector<128x32xbf16>, vector<32x32xf32> -> vector<32x32xf32>
    %c0_73 = arith.constant 0 : index
    %c1_74 = arith.constant 1 : index
    %c0_75 = arith.constant 0 : index
    %c0_76 = arith.constant 0 : index
    %89 = vector.load %arg12[%c0_73, %c1_74, %c0_75, %c0_76] : memref<1x4x1x32xf32, #tpu.memory_space<vmem>>, vector<1x1x1x32xf32>
    %90 = vector.shape_cast %89 : vector<1x1x1x32xf32> to vector<1x32xf32>
    %91 = vector.broadcast %90 : vector<1x32xf32> to vector<32x32xf32>
    %92 = arith.addf %88, %91 : vector<32x32xf32>
    %cst_77 = arith.constant dense<0.000000e+00> : vector<32x32xf32>
    %93 = tpu.matmul %78, %85, %cst_77 {dimension_numbers = #tpu.dot_dimension_numbers<[1], [1], [0], [0], [0, 0, 1, 0], [], []>} : vector<32x32xf32>, vector<32x32xf32>, vector<32x32xf32> -> vector<32x32xf32>
    %94 = arith.addf %93, %4 : vector<32x32xf32>
    %cst_78 = arith.constant dense<0xFF800000> : vector<32xf32>
    %95 = vector.multi_reduction <maximumf>, %94, %cst_78 [1] : vector<32x32xf32> to vector<32xf32>
    %96 = vector.shape_cast %95 : vector<32xf32> to vector<32x1xf32>
    %97 = vector.broadcast %96 : vector<32x1xf32> to vector<32x32xf32>
    %98 = arith.subf %94, %97 : vector<32x32xf32>
    %99 = math.exp %98 : vector<32x32xf32>
    %cst_79 = arith.constant dense<0.000000e+00> : vector<32xf32>
    %100 = vector.multi_reduction <add>, %99, %cst_79 [1] : vector<32x32xf32> to vector<32xf32>
    %101 = vector.shape_cast %100 : vector<32xf32> to vector<32x1xf32>
    %102 = tpu.reciprocal %101 {approx = true} : vector<32x1xf32> -> vector<32x1xf32>
    %103 = vector.broadcast %102 : vector<32x1xf32> to vector<32x32xf32>
    %104 = arith.mulf %99, %103 : vector<32x32xf32>
    %cst_80 = arith.constant dense<0.000000e+00> : vector<32x32xf32>
    %105 = tpu.matmul %104, %92, %cst_80 {dimension_numbers = #tpu.dot_dimension_numbers<[1], [0], [0], [1], [0, 0, 1, 1], [], []>} : vector<32x32xf32>, vector<32x32xf32>, vector<32x32xf32> -> vector<32x32xf32>
    %106 = arith.truncf %105 : vector<32x32xf32> to vector<32x32xbf16>
    %c0_81 = arith.constant 0 : index
    %c1_82 = arith.constant 1 : index
    %c0_83 = arith.constant 0 : index
    %c0_84 = arith.constant 0 : index
    %107 = vector.load %arg13[%c0_81, %c1_82, %c0_83, %c0_84] : memref<1x4x32x128xbf16, #tpu.memory_space<vmem>>, vector<1x1x32x128xbf16>
    %108 = vector.shape_cast %107 : vector<1x1x32x128xbf16> to vector<32x128xbf16>
    %cst_85 = arith.constant dense<0.000000e+00> : vector<32x128xf32>
    %109 = tpu.matmul %106, %108, %cst_85 {dimension_numbers = #tpu.dot_dimension_numbers<[1], [0], [0], [1], [0, 0, 1, 1], [], []>} : vector<32x32xbf16>, vector<32x128xbf16>, vector<32x128xf32> -> vector<32x128xf32>
    %110 = arith.addf %71, %109 : vector<32x128xf32>
    %c0_86 = arith.constant 0 : index
    %c2 = arith.constant 2 : index
    %c0_87 = arith.constant 0 : index
    %c0_88 = arith.constant 0 : index
    %111 = vector.load %arg7[%c0_86, %c2, %c0_87, %c0_88] : memref<1x4x128x32xbf16, #tpu.memory_space<vmem>>, vector<1x1x128x32xbf16>
    %112 = vector.shape_cast %111 : vector<1x1x128x32xbf16> to vector<128x32xbf16>
    %cst_89 = arith.constant dense<0.000000e+00> : vector<32x32xf32>
    %113 = tpu.matmul %31, %112, %cst_89 {dimension_numbers = #tpu.dot_dimension_numbers<[1], [0], [0], [1], [0, 0, 1, 1], [], []>} : vector<32x128xbf16>, vector<128x32xbf16>, vector<32x32xf32> -> vector<32x32xf32>
    %c0_90 = arith.constant 0 : index
    %c2_91 = arith.constant 2 : index
    %c0_92 = arith.constant 0 : index
    %c0_93 = arith.constant 0 : index
    %114 = vector.load %arg10[%c0_90, %c2_91, %c0_92, %c0_93] : memref<1x4x1x32xf32, #tpu.memory_space<vmem>>, vector<1x1x1x32xf32>
    %115 = vector.shape_cast %114 : vector<1x1x1x32xf32> to vector<1x32xf32>
    %116 = vector.broadcast %115 : vector<1x32xf32> to vector<32x32xf32>
    %117 = arith.addf %113, %116 : vector<32x32xf32>
    %c0_94 = arith.constant 0 : index
    %c2_95 = arith.constant 2 : index
    %c0_96 = arith.constant 0 : index
    %c0_97 = arith.constant 0 : index
    %118 = vector.load %arg8[%c0_94, %c2_95, %c0_96, %c0_97] : memref<1x4x128x32xbf16, #tpu.memory_space<vmem>>, vector<1x1x128x32xbf16>
    %119 = vector.shape_cast %118 : vector<1x1x128x32xbf16> to vector<128x32xbf16>
    %cst_98 = arith.constant dense<0.000000e+00> : vector<32x32xf32>
    %120 = tpu.matmul %31, %119, %cst_98 {dimension_numbers = #tpu.dot_dimension_numbers<[1], [0], [0], [1], [0, 0, 1, 1], [], []>} : vector<32x128xbf16>, vector<128x32xbf16>, vector<32x32xf32> -> vector<32x32xf32>
    %c0_99 = arith.constant 0 : index
    %c2_100 = arith.constant 2 : index
    %c0_101 = arith.constant 0 : index
    %c0_102 = arith.constant 0 : index
    %121 = vector.load %arg11[%c0_99, %c2_100, %c0_101, %c0_102] : memref<1x4x1x32xf32, #tpu.memory_space<vmem>>, vector<1x1x1x32xf32>
    %122 = vector.shape_cast %121 : vector<1x1x1x32xf32> to vector<1x32xf32>
    %123 = vector.broadcast %122 : vector<1x32xf32> to vector<32x32xf32>
    %124 = arith.addf %120, %123 : vector<32x32xf32>
    %c0_103 = arith.constant 0 : index
    %c2_104 = arith.constant 2 : index
    %c0_105 = arith.constant 0 : index
    %c0_106 = arith.constant 0 : index
    %125 = vector.load %arg9[%c0_103, %c2_104, %c0_105, %c0_106] : memref<1x4x128x32xbf16, #tpu.memory_space<vmem>>, vector<1x1x128x32xbf16>
    %126 = vector.shape_cast %125 : vector<1x1x128x32xbf16> to vector<128x32xbf16>
    %cst_107 = arith.constant dense<0.000000e+00> : vector<32x32xf32>
    %127 = tpu.matmul %31, %126, %cst_107 {dimension_numbers = #tpu.dot_dimension_numbers<[1], [0], [0], [1], [0, 0, 1, 1], [], []>} : vector<32x128xbf16>, vector<128x32xbf16>, vector<32x32xf32> -> vector<32x32xf32>
    %c0_108 = arith.constant 0 : index
    %c2_109 = arith.constant 2 : index
    %c0_110 = arith.constant 0 : index
    %c0_111 = arith.constant 0 : index
    %128 = vector.load %arg12[%c0_108, %c2_109, %c0_110, %c0_111] : memref<1x4x1x32xf32, #tpu.memory_space<vmem>>, vector<1x1x1x32xf32>
    %129 = vector.shape_cast %128 : vector<1x1x1x32xf32> to vector<1x32xf32>
    %130 = vector.broadcast %129 : vector<1x32xf32> to vector<32x32xf32>
    %131 = arith.addf %127, %130 : vector<32x32xf32>
    %cst_112 = arith.constant dense<0.000000e+00> : vector<32x32xf32>
    %132 = tpu.matmul %117, %124, %cst_112 {dimension_numbers = #tpu.dot_dimension_numbers<[1], [1], [0], [0], [0, 0, 1, 0], [], []>} : vector<32x32xf32>, vector<32x32xf32>, vector<32x32xf32> -> vector<32x32xf32>
    %133 = arith.addf %132, %4 : vector<32x32xf32>
    %cst_113 = arith.constant dense<0xFF800000> : vector<32xf32>
    %134 = vector.multi_reduction <maximumf>, %133, %cst_113 [1] : vector<32x32xf32> to vector<32xf32>
    %135 = vector.shape_cast %134 : vector<32xf32> to vector<32x1xf32>
    %136 = vector.broadcast %135 : vector<32x1xf32> to vector<32x32xf32>
    %137 = arith.subf %133, %136 : vector<32x32xf32>
    %138 = math.exp %137 : vector<32x32xf32>
    %cst_114 = arith.constant dense<0.000000e+00> : vector<32xf32>
    %139 = vector.multi_reduction <add>, %138, %cst_114 [1] : vector<32x32xf32> to vector<32xf32>
    %140 = vector.shape_cast %139 : vector<32xf32> to vector<32x1xf32>
    %141 = tpu.reciprocal %140 {approx = true} : vector<32x1xf32> -> vector<32x1xf32>
    %142 = vector.broadcast %141 : vector<32x1xf32> to vector<32x32xf32>
    %143 = arith.mulf %138, %142 : vector<32x32xf32>
    %cst_115 = arith.constant dense<0.000000e+00> : vector<32x32xf32>
    %144 = tpu.matmul %143, %131, %cst_115 {dimension_numbers = #tpu.dot_dimension_numbers<[1], [0], [0], [1], [0, 0, 1, 1], [], []>} : vector<32x32xf32>, vector<32x32xf32>, vector<32x32xf32> -> vector<32x32xf32>
    %145 = arith.truncf %144 : vector<32x32xf32> to vector<32x32xbf16>
    %c0_116 = arith.constant 0 : index
    %c2_117 = arith.constant 2 : index
    %c0_118 = arith.constant 0 : index
    %c0_119 = arith.constant 0 : index
    %146 = vector.load %arg13[%c0_116, %c2_117, %c0_118, %c0_119] : memref<1x4x32x128xbf16, #tpu.memory_space<vmem>>, vector<1x1x32x128xbf16>
    %147 = vector.shape_cast %146 : vector<1x1x32x128xbf16> to vector<32x128xbf16>
    %cst_120 = arith.constant dense<0.000000e+00> : vector<32x128xf32>
    %148 = tpu.matmul %145, %147, %cst_120 {dimension_numbers = #tpu.dot_dimension_numbers<[1], [0], [0], [1], [0, 0, 1, 1], [], []>} : vector<32x32xbf16>, vector<32x128xbf16>, vector<32x128xf32> -> vector<32x128xf32>
    %149 = arith.addf %110, %148 : vector<32x128xf32>
    %c0_121 = arith.constant 0 : index
    %c3 = arith.constant 3 : index
    %c0_122 = arith.constant 0 : index
    %c0_123 = arith.constant 0 : index
    %150 = vector.load %arg7[%c0_121, %c3, %c0_122, %c0_123] : memref<1x4x128x32xbf16, #tpu.memory_space<vmem>>, vector<1x1x128x32xbf16>
    %151 = vector.shape_cast %150 : vector<1x1x128x32xbf16> to vector<128x32xbf16>
    %cst_124 = arith.constant dense<0.000000e+00> : vector<32x32xf32>
    %152 = tpu.matmul %31, %151, %cst_124 {dimension_numbers = #tpu.dot_dimension_numbers<[1], [0], [0], [1], [0, 0, 1, 1], [], []>} : vector<32x128xbf16>, vector<128x32xbf16>, vector<32x32xf32> -> vector<32x32xf32>
    %c0_125 = arith.constant 0 : index
    %c3_126 = arith.constant 3 : index
    %c0_127 = arith.constant 0 : index
    %c0_128 = arith.constant 0 : index
    %153 = vector.load %arg10[%c0_125, %c3_126, %c0_127, %c0_128] : memref<1x4x1x32xf32, #tpu.memory_space<vmem>>, vector<1x1x1x32xf32>
    %154 = vector.shape_cast %153 : vector<1x1x1x32xf32> to vector<1x32xf32>
    %155 = vector.broadcast %154 : vector<1x32xf32> to vector<32x32xf32>
    %156 = arith.addf %152, %155 : vector<32x32xf32>
    %c0_129 = arith.constant 0 : index
    %c3_130 = arith.constant 3 : index
    %c0_131 = arith.constant 0 : index
    %c0_132 = arith.constant 0 : index
    %157 = vector.load %arg8[%c0_129, %c3_130, %c0_131, %c0_132] : memref<1x4x128x32xbf16, #tpu.memory_space<vmem>>, vector<1x1x128x32xbf16>
    %158 = vector.shape_cast %157 : vector<1x1x128x32xbf16> to vector<128x32xbf16>
    %cst_133 = arith.constant dense<0.000000e+00> : vector<32x32xf32>
    %159 = tpu.matmul %31, %158, %cst_133 {dimension_numbers = #tpu.dot_dimension_numbers<[1], [0], [0], [1], [0, 0, 1, 1], [], []>} : vector<32x128xbf16>, vector<128x32xbf16>, vector<32x32xf32> -> vector<32x32xf32>
    %c0_134 = arith.constant 0 : index
    %c3_135 = arith.constant 3 : index
    %c0_136 = arith.constant 0 : index
    %c0_137 = arith.constant 0 : index
    %160 = vector.load %arg11[%c0_134, %c3_135, %c0_136, %c0_137] : memref<1x4x1x32xf32, #tpu.memory_space<vmem>>, vector<1x1x1x32xf32>
    %161 = vector.shape_cast %160 : vector<1x1x1x32xf32> to vector<1x32xf32>
    %162 = vector.broadcast %161 : vector<1x32xf32> to vector<32x32xf32>
    %163 = arith.addf %159, %162 : vector<32x32xf32>
    %c0_138 = arith.constant 0 : index
    %c3_139 = arith.constant 3 : index
    %c0_140 = arith.constant 0 : index
    %c0_141 = arith.constant 0 : index
    %164 = vector.load %arg9[%c0_138, %c3_139, %c0_140, %c0_141] : memref<1x4x128x32xbf16, #tpu.memory_space<vmem>>, vector<1x1x128x32xbf16>
    %165 = vector.shape_cast %164 : vector<1x1x128x32xbf16> to vector<128x32xbf16>
    %cst_142 = arith.constant dense<0.000000e+00> : vector<32x32xf32>
    %166 = tpu.matmul %31, %165, %cst_142 {dimension_numbers = #tpu.dot_dimension_numbers<[1], [0], [0], [1], [0, 0, 1, 1], [], []>} : vector<32x128xbf16>, vector<128x32xbf16>, vector<32x32xf32> -> vector<32x32xf32>
    %c0_143 = arith.constant 0 : index
    %c3_144 = arith.constant 3 : index
    %c0_145 = arith.constant 0 : index
    %c0_146 = arith.constant 0 : index
    %167 = vector.load %arg12[%c0_143, %c3_144, %c0_145, %c0_146] : memref<1x4x1x32xf32, #tpu.memory_space<vmem>>, vector<1x1x1x32xf32>
    %168 = vector.shape_cast %167 : vector<1x1x1x32xf32> to vector<1x32xf32>
    %169 = vector.broadcast %168 : vector<1x32xf32> to vector<32x32xf32>
    %170 = arith.addf %166, %169 : vector<32x32xf32>
    %cst_147 = arith.constant dense<0.000000e+00> : vector<32x32xf32>
    %171 = tpu.matmul %156, %163, %cst_147 {dimension_numbers = #tpu.dot_dimension_numbers<[1], [1], [0], [0], [0, 0, 1, 0], [], []>} : vector<32x32xf32>, vector<32x32xf32>, vector<32x32xf32> -> vector<32x32xf32>
    %172 = arith.addf %171, %4 : vector<32x32xf32>
    %cst_148 = arith.constant dense<0xFF800000> : vector<32xf32>
    %173 = vector.multi_reduction <maximumf>, %172, %cst_148 [1] : vector<32x32xf32> to vector<32xf32>
    %174 = vector.shape_cast %173 : vector<32xf32> to vector<32x1xf32>
    %175 = vector.broadcast %174 : vector<32x1xf32> to vector<32x32xf32>
    %176 = arith.subf %172, %175 : vector<32x32xf32>
    %177 = math.exp %176 : vector<32x32xf32>
    %cst_149 = arith.constant dense<0.000000e+00> : vector<32xf32>
    %178 = vector.multi_reduction <add>, %177, %cst_149 [1] : vector<32x32xf32> to vector<32xf32>
    %179 = vector.shape_cast %178 : vector<32xf32> to vector<32x1xf32>
    %180 = tpu.reciprocal %179 {approx = true} : vector<32x1xf32> -> vector<32x1xf32>
    %181 = vector.broadcast %180 : vector<32x1xf32> to vector<32x32xf32>
    %182 = arith.mulf %177, %181 : vector<32x32xf32>
    %cst_150 = arith.constant dense<0.000000e+00> : vector<32x32xf32>
    %183 = tpu.matmul %182, %170, %cst_150 {dimension_numbers = #tpu.dot_dimension_numbers<[1], [0], [0], [1], [0, 0, 1, 1], [], []>} : vector<32x32xf32>, vector<32x32xf32>, vector<32x32xf32> -> vector<32x32xf32>
    %184 = arith.truncf %183 : vector<32x32xf32> to vector<32x32xbf16>
    %c0_151 = arith.constant 0 : index
    %c3_152 = arith.constant 3 : index
    %c0_153 = arith.constant 0 : index
    %c0_154 = arith.constant 0 : index
    %185 = vector.load %arg13[%c0_151, %c3_152, %c0_153, %c0_154] : memref<1x4x32x128xbf16, #tpu.memory_space<vmem>>, vector<1x1x32x128xbf16>
    %186 = vector.shape_cast %185 : vector<1x1x32x128xbf16> to vector<32x128xbf16>
    %cst_155 = arith.constant dense<0.000000e+00> : vector<32x128xf32>
    %187 = tpu.matmul %184, %186, %cst_155 {dimension_numbers = #tpu.dot_dimension_numbers<[1], [0], [0], [1], [0, 0, 1, 1], [], []>} : vector<32x32xbf16>, vector<32x128xbf16>, vector<32x128xf32> -> vector<32x128xf32>
    %188 = arith.addf %149, %187 : vector<32x128xf32>
    %c0_156 = arith.constant 0 : index
    %c0_157 = arith.constant 0 : index
    %c0_158 = arith.constant 0 : index
    %189 = vector.load %arg15[%c0_156, %c0_157, %c0_158] : memref<1x1x128xf32, #tpu.memory_space<vmem>>, vector<1x1x128xf32>
    %190 = vector.shape_cast %189 : vector<1x1x128xf32> to vector<1x128xf32>
    %c0_159 = arith.constant 0 : index
    %c0_160 = arith.constant 0 : index
    %c0_161 = arith.constant 0 : index
    %191 = vector.load %arg14[%c0_159, %c0_160, %c0_161] : memref<1x1x128xf32, #tpu.memory_space<vmem>>, vector<1x1x128xf32>
    %192 = vector.shape_cast %191 : vector<1x1x128xf32> to vector<1x128xf32>
    %193 = vector.broadcast %192 : vector<1x128xf32> to vector<32x128xf32>
    %194 = arith.addf %188, %193 : vector<32x128xf32>
    %195 = vector.broadcast %190 : vector<1x128xf32> to vector<32x128xf32>
    %196 = arith.mulf %195, %194 : vector<32x128xf32>
    %197 = arith.addf %3, %196 : vector<32x128xf32>
    %c0_162 = arith.constant 0 : index
    %c0_163 = arith.constant 0 : index
    %c0_164 = arith.constant 0 : index
    %198 = vector.load %arg16[%c0_162, %c0_163, %c0_164] : memref<1x1x128xf32, #tpu.memory_space<vmem>>, vector<1x1x128xf32>
    %199 = vector.shape_cast %198 : vector<1x1x128xf32> to vector<1x128xf32>
    %c0_165 = arith.constant 0 : index
    %c0_166 = arith.constant 0 : index
    %c0_167 = arith.constant 0 : index
    %200 = vector.load %arg17[%c0_165, %c0_166, %c0_167] : memref<1x1x128xf32, #tpu.memory_space<vmem>>, vector<1x1x128xf32>
    %201 = vector.shape_cast %200 : vector<1x1x128xf32> to vector<1x128xf32>
    %cst_168 = arith.constant dense<0.000000e+00> : vector<32xf32>
    %202 = vector.multi_reduction <add>, %197, %cst_168 [1] : vector<32x128xf32> to vector<32xf32>
    %203 = vector.shape_cast %202 : vector<32xf32> to vector<32x1xf32>
    %cst_169 = arith.constant 1.280000e+02 : f32
    %204 = vector.broadcast %cst_169 : f32 to vector<32x1xf32>
    %205 = arith.divf %203, %204 : vector<32x1xf32>
    %206 = vector.broadcast %205 : vector<32x1xf32> to vector<32x128xf32>
    %207 = arith.subf %197, %206 : vector<32x128xf32>
    %208 = arith.mulf %207, %207 : vector<32x128xf32>
    %cst_170 = arith.constant dense<0.000000e+00> : vector<32xf32>
    %209 = vector.multi_reduction <add>, %208, %cst_170 [1] : vector<32x128xf32> to vector<32xf32>
    %210 = vector.shape_cast %209 : vector<32xf32> to vector<32x1xf32>
    %cst_171 = arith.constant 1.280000e+02 : f32
    %211 = vector.broadcast %cst_171 : f32 to vector<32x1xf32>
    %212 = arith.divf %210, %211 : vector<32x1xf32>
    %213 = vector.broadcast %205 : vector<32x1xf32> to vector<32x128xf32>
    %214 = arith.subf %197, %213 : vector<32x128xf32>
    %cst_172 = arith.constant 9.99999997E-7 : f32
    %215 = vector.broadcast %cst_172 : f32 to vector<32x1xf32>
    %216 = arith.addf %212, %215 : vector<32x1xf32>
    %217 = math.rsqrt %216 : vector<32x1xf32>
    %218 = vector.broadcast %217 : vector<32x1xf32> to vector<32x128xf32>
    %219 = arith.mulf %214, %218 : vector<32x128xf32>
    %220 = vector.broadcast %199 : vector<1x128xf32> to vector<32x128xf32>
    %221 = arith.mulf %219, %220 : vector<32x128xf32>
    %222 = vector.broadcast %201 : vector<1x128xf32> to vector<32x128xf32>
    %223 = arith.addf %221, %222 : vector<32x128xf32>
    %224 = arith.truncf %223 : vector<32x128xf32> to vector<32x128xbf16>
    %c0_173 = arith.constant 0 : index
    %c0_174 = arith.constant 0 : index
    %c0_175 = arith.constant 0 : index
    %225 = vector.load %arg18[%c0_173, %c0_174, %c0_175] : memref<1x128x512xbf16, #tpu.memory_space<vmem>>, vector<1x128x512xbf16>
    %226 = vector.shape_cast %225 : vector<1x128x512xbf16> to vector<128x512xbf16>
    %cst_176 = arith.constant dense<0.000000e+00> : vector<32x512xf32>
    %227 = tpu.matmul %224, %226, %cst_176 {dimension_numbers = #tpu.dot_dimension_numbers<[1], [0], [0], [1], [0, 0, 1, 1], [], []>} : vector<32x128xbf16>, vector<128x512xbf16>, vector<32x512xf32> -> vector<32x512xf32>
    %c0_177 = arith.constant 0 : index
    %c0_178 = arith.constant 0 : index
    %c0_179 = arith.constant 0 : index
    %228 = vector.load %arg19[%c0_177, %c0_178, %c0_179] : memref<1x1x512xf32, #tpu.memory_space<vmem>>, vector<1x1x512xf32>
    %229 = vector.shape_cast %228 : vector<1x1x512xf32> to vector<1x512xf32>
    %230 = vector.broadcast %229 : vector<1x512xf32> to vector<32x512xf32>
    %231 = arith.addf %227, %230 : vector<32x512xf32>
    %cst_180 = arith.constant 5.000000e-01 : f32
    %232 = vector.broadcast %cst_180 : f32 to vector<32x512xf32>
    %233 = arith.mulf %232, %231 : vector<32x512xf32>
    %cst_181 = arith.constant 1.41421354 : f32
    %234 = vector.broadcast %cst_181 : f32 to vector<32x512xf32>
    %235 = arith.divf %231, %234 : vector<32x512xf32>
    %236 = math.erf %235 : vector<32x512xf32>
    %cst_182 = arith.constant 1.000000e+00 : f32
    %237 = vector.broadcast %cst_182 : f32 to vector<32x512xf32>
    %238 = arith.addf %237, %236 : vector<32x512xf32>
    %239 = arith.mulf %233, %238 : vector<32x512xf32>
    %240 = arith.truncf %239 : vector<32x512xf32> to vector<32x512xbf16>
    %c0_183 = arith.constant 0 : index
    %c0_184 = arith.constant 0 : index
    %c0_185 = arith.constant 0 : index
    %241 = vector.load %arg20[%c0_183, %c0_184, %c0_185] : memref<1x512x128xbf16, #tpu.memory_space<vmem>>, vector<1x512x128xbf16>
    %242 = vector.shape_cast %241 : vector<1x512x128xbf16> to vector<512x128xbf16>
    %cst_186 = arith.constant dense<0.000000e+00> : vector<32x128xf32>
    %243 = tpu.matmul %240, %242, %cst_186 {dimension_numbers = #tpu.dot_dimension_numbers<[1], [0], [0], [1], [0, 0, 1, 1], [], []>} : vector<32x512xbf16>, vector<512x128xbf16>, vector<32x128xf32> -> vector<32x128xf32>
    %c0_187 = arith.constant 0 : index
    %c0_188 = arith.constant 0 : index
    %c0_189 = arith.constant 0 : index
    %244 = vector.load %arg21[%c0_187, %c0_188, %c0_189] : memref<1x1x128xf32, #tpu.memory_space<vmem>>, vector<1x1x128xf32>
    %245 = vector.shape_cast %244 : vector<1x1x128xf32> to vector<1x128xf32>
    %246 = vector.broadcast %245 : vector<1x128xf32> to vector<32x128xf32>
    %247 = arith.addf %243, %246 : vector<32x128xf32>
    %c0_190 = arith.constant 0 : index
    %c0_191 = arith.constant 0 : index
    %c0_192 = arith.constant 0 : index
    %248 = vector.load %arg22[%c0_190, %c0_191, %c0_192] : memref<1x1x128xf32, #tpu.memory_space<vmem>>, vector<1x1x128xf32>
    %249 = vector.shape_cast %248 : vector<1x1x128xf32> to vector<1x128xf32>
    %250 = vector.broadcast %249 : vector<1x128xf32> to vector<32x128xf32>
    %251 = arith.mulf %250, %247 : vector<32x128xf32>
    %252 = arith.addf %197, %251 : vector<32x128xf32>
    %c0_193 = arith.constant 0 : index
    %c0_194 = arith.constant 0 : index
    %253 = vector.load %arg26[%c0_193, %c0_194] : memref<32x128xf32, #tpu.memory_space<vmem>>, vector<32x128xf32>
    tpu.vector_store %arg26[%c0_193, %c0_194], %252 {strides = array<i32>} : memref<32x128xf32, #tpu.memory_space<vmem>>, vector<32x128xf32>,
    %c1_i32 = arith.constant 1 : i32
    %254 = arith.cmpi eq, %arg0, %c1_i32 : i32
    %255 = arith.extui %254 : i1 to i32
    %c0_i32_195 = arith.constant 0 : i32
    %256 = arith.cmpi ne, %255, %c0_i32_195 : i32
    scf.if %256 {
      %c0_196 = arith.constant 0 : index
      %c0_197 = arith.constant 0 : index
      %257 = vector.load %arg23[%c0_196, %c0_197] : memref<1x128xf32, #tpu.memory_space<vmem>>, vector<1x128xf32>
      %c0_198 = arith.constant 0 : index
      %c0_199 = arith.constant 0 : index
      %258 = vector.load %arg24[%c0_198, %c0_199] : memref<1x128xf32, #tpu.memory_space<vmem>>, vector<1x128xf32>
      %cst_200 = arith.constant dense<0.000000e+00> : vector<32xf32>
      %259 = vector.multi_reduction <add>, %252, %cst_200 [1] : vector<32x128xf32> to vector<32xf32>
      %260 = vector.shape_cast %259 : vector<32xf32> to vector<32x1xf32>
      %cst_201 = arith.constant 1.280000e+02 : f32
      %261 = vector.broadcast %cst_201 : f32 to vector<32x1xf32>
      %262 = arith.divf %260, %261 : vector<32x1xf32>
      %263 = vector.broadcast %262 : vector<32x1xf32> to vector<32x128xf32>
      %264 = arith.subf %252, %263 : vector<32x128xf32>
      %265 = arith.mulf %264, %264 : vector<32x128xf32>
      %cst_202 = arith.constant dense<0.000000e+00> : vector<32xf32>
      %266 = vector.multi_reduction <add>, %265, %cst_202 [1] : vector<32x128xf32> to vector<32xf32>
      %267 = vector.shape_cast %266 : vector<32xf32> to vector<32x1xf32>
      %cst_203 = arith.constant 1.280000e+02 : f32
      %268 = vector.broadcast %cst_203 : f32 to vector<32x1xf32>
      %269 = arith.divf %267, %268 : vector<32x1xf32>
      %270 = vector.broadcast %262 : vector<32x1xf32> to vector<32x128xf32>
      %271 = arith.subf %252, %270 : vector<32x128xf32>
      %cst_204 = arith.constant 9.99999997E-7 : f32
      %272 = vector.broadcast %cst_204 : f32 to vector<32x1xf32>
      %273 = arith.addf %269, %272 : vector<32x1xf32>
      %274 = math.rsqrt %273 : vector<32x1xf32>
      %275 = vector.broadcast %274 : vector<32x1xf32> to vector<32x128xf32>
      %276 = arith.mulf %271, %275 : vector<32x128xf32>
      %277 = vector.broadcast %257 : vector<1x128xf32> to vector<32x128xf32>
      %278 = arith.mulf %276, %277 : vector<32x128xf32>
      %279 = vector.broadcast %258 : vector<1x128xf32> to vector<32x128xf32>
      %280 = arith.addf %278, %279 : vector<32x128xf32>
      %c0_205 = arith.constant 0 : index
      %c0_206 = arith.constant 0 : index
      %281 = vector.load %arg25[%c0_205, %c0_206] : memref<32x128xf32, #tpu.memory_space<vmem>>, vector<32x128xf32>
      tpu.vector_store %arg25[%c0_205, %c0_206], %280 {strides = array<i32>} : memref<32x128xf32, #tpu.memory_space<vmem>>, vector<32x128xf32>,
    } else {
    }
    return
  }
  func.func @transform_0(%arg0: i32) -> (i32, i32) {
    %c0_i32 = arith.constant 0 : i32
    %c0_i32_0 = arith.constant 0 : i32
    %c0_i32_1 = arith.constant 0 : i32
    return %c0_i32, %c0_i32_0 : i32, i32
  }
  func.func @transform_1(%arg0: i32) -> (i32, i32) {
    %c0_i32 = arith.constant 0 : i32
    %c0_i32_0 = arith.constant 0 : i32
    %c0_i32_1 = arith.constant 0 : i32
    return %c0_i32, %c0_i32_0 : i32, i32
  }
  func.func @transform_2(%arg0: i32) -> (i32, i32) {
    %c0_i32 = arith.constant 0 : i32
    %c0_i32_0 = arith.constant 0 : i32
    %c0_i32_1 = arith.constant 0 : i32
    return %c0_i32, %c0_i32_0 : i32, i32
  }
  func.func @transform_3(%arg0: i32) -> (i32, i32) {
    %c0_i32 = arith.constant 0 : i32
    %c0_i32_0 = arith.constant 0 : i32
    %c0_i32_1 = arith.constant 0 : i32
    return %c0_i32, %c0_i32_0 : i32, i32
  }
  func.func @transform_4(%arg0: i32) -> (i32, i32, i32) {
    %c0_i32 = arith.constant 0 : i32
    %c0_i32_0 = arith.constant 0 : i32
    %c0_i32_1 = arith.constant 0 : i32
    return %arg0, %c0_i32, %c0_i32_0 : i32, i32, i32
  }
  func.func @transform_5(%arg0: i32) -> (i32, i32, i32) {
    %c0_i32 = arith.constant 0 : i32
    %c0_i32_0 = arith.constant 0 : i32
    %c0_i32_1 = arith.constant 0 : i32
    return %arg0, %c0_i32, %c0_i32_0 : i32, i32, i32
  }
  func.func @transform_6(%arg0: i32) -> (i32, i32, i32, i32) {
    %c0_i32 = arith.constant 0 : i32
    %c0_i32_0 = arith.constant 0 : i32
    %c0_i32_1 = arith.constant 0 : i32
    %c0_i32_2 = arith.constant 0 : i32
    return %arg0, %c0_i32, %c0_i32_0, %c0_i32_1 : i32, i32, i32, i32
  }
  func.func @transform_7(%arg0: i32) -> (i32, i32, i32, i32) {
    %c0_i32 = arith.constant 0 : i32
    %c0_i32_0 = arith.constant 0 : i32
    %c0_i32_1 = arith.constant 0 : i32
    %c0_i32_2 = arith.constant 0 : i32
    return %arg0, %c0_i32, %c0_i32_0, %c0_i32_1 : i32, i32, i32, i32
  }
  func.func @transform_8(%arg0: i32) -> (i32, i32, i32, i32) {
    %c0_i32 = arith.constant 0 : i32
    %c0_i32_0 = arith.constant 0 : i32
    %c0_i32_1 = arith.constant 0 : i32
    %c0_i32_2 = arith.constant 0 : i32
    return %arg0, %c0_i32, %c0_i32_0, %c0_i32_1 : i32, i32, i32, i32
  }
  func.func @transform_9(%arg0: i32) -> (i32, i32, i32, i32) {
    %c0_i32 = arith.constant 0 : i32
    %c0_i32_0 = arith.constant 0 : i32
    %c0_i32_1 = arith.constant 0 : i32
    %c0_i32_2 = arith.constant 0 : i32
    return %arg0, %c0_i32, %c0_i32_0, %c0_i32_1 : i32, i32, i32, i32
  }
  func.func @transform_10(%arg0: i32) -> (i32, i32, i32, i32) {
    %c0_i32 = arith.constant 0 : i32
    %c0_i32_0 = arith.constant 0 : i32
    %c0_i32_1 = arith.constant 0 : i32
    %c0_i32_2 = arith.constant 0 : i32
    return %arg0, %c0_i32, %c0_i32_0, %c0_i32_1 : i32, i32, i32, i32
  }
  func.func @transform_11(%arg0: i32) -> (i32, i32, i32, i32) {
    %c0_i32 = arith.constant 0 : i32
    %c0_i32_0 = arith.constant 0 : i32
    %c0_i32_1 = arith.constant 0 : i32
    %c0_i32_2 = arith.constant 0 : i32
    return %arg0, %c0_i32, %c0_i32_0, %c0_i32_1 : i32, i32, i32, i32
  }
  func.func @transform_12(%arg0: i32) -> (i32, i32, i32, i32) {
    %c0_i32 = arith.constant 0 : i32
    %c0_i32_0 = arith.constant 0 : i32
    %c0_i32_1 = arith.constant 0 : i32
    %c0_i32_2 = arith.constant 0 : i32
    return %arg0, %c0_i32, %c0_i32_0, %c0_i32_1 : i32, i32, i32, i32
  }
  func.func @transform_13(%arg0: i32) -> (i32, i32, i32) {
    %c0_i32 = arith.constant 0 : i32
    %c0_i32_0 = arith.constant 0 : i32
    %c0_i32_1 = arith.constant 0 : i32
    return %arg0, %c0_i32, %c0_i32_0 : i32, i32, i32
  }
  func.func @transform_14(%arg0: i32) -> (i32, i32, i32) {
    %c0_i32 = arith.constant 0 : i32
    %c0_i32_0 = arith.constant 0 : i32
    %c0_i32_1 = arith.constant 0 : i32
    return %arg0, %c0_i32, %c0_i32_0 : i32, i32, i32
  }
  func.func @transform_15(%arg0: i32) -> (i32, i32, i32) {
    %c0_i32 = arith.constant 0 : i32
    %c0_i32_0 = arith.constant 0 : i32
    %c0_i32_1 = arith.constant 0 : i32
    return %arg0, %c0_i32, %c0_i32_0 : i32, i32, i32
  }
  func.func @transform_16(%arg0: i32) -> (i32, i32, i32) {
    %c0_i32 = arith.constant 0 : i32
    %c0_i32_0 = arith.constant 0 : i32
    %c0_i32_1 = arith.constant 0 : i32
    return %arg0, %c0_i32, %c0_i32_0 : i32, i32, i32
  }
  func.func @transform_17(%arg0: i32) -> (i32, i32, i32) {
    %c0_i32 = arith.constant 0 : i32
    %c0_i32_0 = arith.constant 0 : i32
    %c0_i32_1 = arith.constant 0 : i32
    return %arg0, %c0_i32, %c0_i32_0 : i32, i32, i32
  }
  func.func @transform_18(%arg0: i32) -> (i32, i32, i32) {
    %c0_i32 = arith.constant 0 : i32
    %c0_i32_0 = arith.constant 0 : i32
    %c0_i32_1 = arith.constant 0 : i32
    return %arg0, %c0_i32, %c0_i32_0 : i32, i32, i32
  }
  func.func @transform_19(%arg0: i32) -> (i32, i32, i32) {
    %c0_i32 = arith.constant 0 : i32
    %c0_i32_0 = arith.constant 0 : i32
    %c0_i32_1 = arith.constant 0 : i32
    return %arg0, %c0_i32, %c0_i32_0 : i32, i32, i32
  }
  func.func @transform_20(%arg0: i32) -> (i32, i32, i32) {
    %c0_i32 = arith.constant 0 : i32
    %c0_i32_0 = arith.constant 0 : i32
    %c0_i32_1 = arith.constant 0 : i32
    return %arg0, %c0_i32, %c0_i32_0 : i32, i32, i32
  }
  func.func @transform_21(%arg0: i32) -> (i32, i32, i32) {
    %c0_i32 = arith.constant 0 : i32
    %c0_i32_0 = arith.constant 0 : i32
    %c0_i32_1 = arith.constant 0 : i32
    return %arg0, %c0_i32, %c0_i32_0 : i32, i32, i32
  }
  func.func @transform_22(%arg0: i32) -> (i32, i32) {
    %c0_i32 = arith.constant 0 : i32
    %c0_i32_0 = arith.constant 0 : i32
    %c0_i32_1 = arith.constant 0 : i32
    return %c0_i32, %c0_i32_0 : i32, i32
  }
  func.func @transform_23(%arg0: i32) -> (i32, i32) {
    %c0_i32 = arith.constant 0 : i32
    %c0_i32_0 = arith.constant 0 : i32
    %c0_i32_1 = arith.constant 0 : i32
    return %c0_i32, %c0_i32_0 : i32, i32
  }
  func.func @transform_24(%arg0: i32) -> (i32, i32) {
    %c0_i32 = arith.constant 0 : i32
    %c0_i32_0 = arith.constant 0 : i32
    %c0_i32_1 = arith.constant 0 : i32
    return %c0_i32, %c0_i32_0 : i32, i32
  }
}

</mosaic_0001>

<bundles_post_ra>
// kernel: squeeze.3
= control target key start
LH: loop header
LB: loop body
LE: loop exit
PB: predicated region body
PF: predicated region fallthrough
CT: control target
= control target key end

     0   :  { %v38_v5 = vmov 0.0   ;;  %s58_s0 = inlined_call_operand.vmem [shape: bf16[4,128], index: 0, kind: input, shape index: {}]   ;;  %s59_s1 = inlined_call_operand.vmem [shape: bf16[2,256], index: 1, kind: output, shape index: {}]  }
   0x1   :  { %v14_v0 = vld [vmem:[%s58_s0] sm:$0x3] }
   0x2   :  { %v15_v1 = vunpack.c.l.bf16 %v14_v0 }
   0x4   :  { %17 = vst [vmem:[#allocation1] sm:$0xf] %v15_v1 }
   0xb   :  { %v18_v2 = vld [vmem:[#allocation1] sm:$0xf]  }
   0xc   :  { %19 = vst [vmem:[#allocation0] ss:$8 sm:$0x3] %v18_v2   ;;  %21 = vst [vmem:[#allocation0 - $0xf] ss:$8 sm:$0xc] %v18_v2  }
  0x13   :  { %v26_v3 = vld [vmem:[#allocation0] sm:$0x3]  ;;  %v31_v4 = vld [vmem:[#allocation0 + $0x8] sm:$0x3] }
  0x14   :  { %v27_v6 = vpack.c.bf16 %v38_v5, %v26_v3  ;;  %v32_v7 = vpack.c.bf16 %v38_v5, %v31_v4 }
  0x16   :  { %29 = vst [vmem:[%s59_s1] sm:$0x1] %v27_v6  ;;  %36 = vst [vmem:[%s59_s1 + $0x1] sm:$0x1] %v32_v7 }

// kernel: hiuni_forward.1
= control target key start
LH: loop header
LB: loop body
LE: loop exit
PB: predicated region body
PF: predicated region fallthrough
CT: control target
= control target key end

     0   :  { %s8318_s0 = inlined_call_operand.vmem [shape: f32[32,768], index: 0, kind: input, shape index: {}]   ;;  %s8319_s1 = inlined_call_operand.vmem [shape: f32[32,128], index: 1, kind: input, shape index: {}]   ;;  %s8320_s2 = inlined_call_operand.vmem [shape: f32[32,32], index: 2, kind: input, shape index: {}]   ;;  %s8321_s3 = inlined_call_operand.vmem [shape: bf16[768,128], index: 3, kind: input, shape index: {}]   ;;  %s8322_s4 = inlined_call_operand.vmem [shape: f32[2,1,128], index: 4, kind: input, shape index: {}]   ;;  %s8323_s5 = inlined_call_operand.vmem [shape: f32[2,1,128], index: 5, kind: input, shape index: {}]   ;;  %s8324_s6 = inlined_call_operand.vmem [shape: bf16[2,4,128,32], index: 6, kind: input, shape index: {}]   ;;  %s8325_s7 = inlined_call_operand.vmem [shape: bf16[2,4,128,32], index: 7, kind: input, shape index: {}]   ;;  %s8326_s8 = inlined_call_operand.vmem [shape: bf16[2,4,128,32], index: 8, kind: input, shape index: {}]   ;;  %s8327_s9 = inlined_call_operand.vmem [shape: f32[2,4,1,32], index: 9, kind: input, shape index: {}]   ;;  %s8328_s10 = inlined_call_operand.vmem [shape: f32[2,4,1,32], index: 10, kind: input, shape index: {}]   ;;  %s8329_s11 = inlined_call_operand.vmem [shape: f32[2,4,1,32], index: 11, kind: input, shape index: {}]   ;;  %s8330_s12 = inlined_call_operand.vmem [shape: bf16[2,4,32,128], index: 12, kind: input, shape index: {}]   ;;  %s8331_s13 = inlined_call_operand.vmem [shape: f32[2,1,128], index: 13, kind: input, shape index: {}]   ;;  %s8332_s14 = inlined_call_operand.vmem [shape: f32[2,1,128], index: 14, kind: input, shape index: {}]   ;;  %s8333_s15 = inlined_call_operand.vmem [shape: f32[2,1,128], index: 15, kind: input, shape index: {}]   ;;  %s8334_s16 = inlined_call_operand.vmem [shape: f32[2,1,128], index: 16, kind: input, shape index: {}]   ;;  %s8335_s17 = inlined_call_operand.vmem [shape: bf16[2,128,512], index: 17, kind: input, shape index: {}]   ;;  %s8336_s18 = inlined_call_operand.vmem [shape: f32[2,1,512], index: 18, kind: input, shape index: {}]   ;;  %s8337_s19 = inlined_call_operand.vmem [shape: bf16[2,512,128], index: 19, kind: input, shape index: {}]   ;;  %s8338_s20 = inlined_call_operand.vmem [shape: f32[2,1,128], index: 20, kind: input, shape index: {}]   ;;  %s8339_s21 = inlined_call_operand.vmem [shape: f32[2,1,128], index: 21, kind: input, shape index: {}]   ;;  %s8340_s22 = inlined_call_operand.vmem [shape: f32[1,128], index: 22, kind: input, shape index: {}]   ;;  %s8341_s23 = inlined_call_operand.vmem [shape: f32[1,128], index: 23, kind: input, shape index: {}]   ;;  %s8342_s24 = inlined_call_operand.vmem [shape: f32[32,128], index: 24, kind: output, shape index: {}]  }
   0x1   :  { %8356 = sst [smem:[#allocation10_spill]] %s8318_s0 }
   0x2   :  { %8357 = sst [smem:[#allocation11_spill]] %s8319_s1 }
   0x3   :  { %8358 = sst [smem:[#allocation12_spill]] %s8320_s2 }
   0x4   :  { %8359 = sst [smem:[#allocation13_spill]] %s8321_s3 }
   0x5   :  { %8360 = sst [smem:[#allocation14_spill]] %s8322_s4 }
   0x6   :  { %8361 = sst [smem:[#allocation15_spill]] %s8323_s5  ;;  %s7411_s5 = smov 0  }
   0x7   :  { %8362 = sst [smem:[#allocation16_spill]] %s8324_s6 }
   0x8   :  { %8363 = sst [smem:[#allocation17_spill]] %s8325_s7 }
   0x9   :  { %8364 = sst [smem:[#allocation18_spill]] %s8326_s8 }
   0xa   :  { %8365 = sst [smem:[#allocation19_spill]] %s8327_s9 }
   0xb   :  { %8366 = sst [smem:[#allocation20_spill]] %s8328_s10 }
   0xc   :  { %8367 = sst [smem:[#allocation21_spill]] %s8329_s11 }
   0xd   :  { %8368 = sst [smem:[#allocation22_spill]] %s8340_s22 }
   0xe   :  { %8369 = sst [smem:[#allocation23_spill]] %s8341_s23 }
   0xf   :  { %8370 = sst [smem:[#allocation24_spill]] %s8342_s24 }
  0x10 LB: > { %8371 = sst [smem:[#allocation3_spill]] %s7283_s5  ;;  %s7417_s26 = sadd.s32 4294967295, %s7283_s5   ;;  %s7283_s5 = sphi %s7411_s5, %s34_s5  }
  0x11   : > { %8372 = sst [smem:[#allocation4_spill]] %s7417_s26  ;;  %p5590_p0 = scmp.ge.s32.totalorder %s7283_s5, 1 }
  0x12   : > { %p807_p1 = scmp.lt.s32.totalorder %s7283_s5, 3 }
  0x14   : > { %p808_p2 = pnand %p5590_p0, %p807_p1 }
  0x16   : > { %811 = sbr.rel (%p808_p2) target bundleno = 5795 (0x16a3), region = 116 }
  0x1d   : > { %p933_p3 = scmp.lt.s32.totalorder %s7417_s26, 1  ;;  %s8375_s5 = sld [smem:[#allocation16_spill]] }
  0x1e   : > { %s8377_s2 = sld [smem:[#allocation17_spill]]  ;;  %s8379_s30 = sld [smem:[#allocation18_spill]] }
  0x1f   : > { %s7423_s27 = scalar_select %p933_p3, %s7417_s26, 1 }
  0x20   : > { %s8381_s9 = sld [smem:[#allocation19_spill]]  ;;  %s8382_s10 = sld [smem:[#allocation20_spill]] }
  0x21   : > { %s6070_s25 = sshll.u32 %s7423_s27, 8  ;;  %s7435_s8 = sshll.u32 %s7423_s27, 2 }
  0x22   : > { %s8384_s11 = sld [smem:[#allocation21_spill]]  ;;  %s7495_s0 = scalar_lea.vmem %s8335_s17, %s6070_s25 }
  0x23   : > { %s7440_s28 = scalar_lea.vmem %s8375_s5, %s6070_s25  ;;  %s7504_s4 = scalar_lea.vmem %s8337_s19, %s6070_s25 }
  0x24   : > { %8376 = sst [smem:[#allocation5_spill]] %s7440_s28  ;;  %s7445_s29 = scalar_lea.vmem %s8377_s2, %s6070_s25 }
  0x25   : > { %8378 = sst [smem:[#allocation6_spill]] %s7445_s29  ;;  %s7450_s3 = scalar_lea.vmem %s8379_s30, %s6070_s25 }
  0x26   : > { %8380 = sst [smem:[#allocation7_spill]] %s7450_s3  ;;  %s7456_s1 = scalar_lea.vmem %s8381_s9, %s7435_s8 }
  0x27   : > { %s7462_s5 = scalar_lea.vmem %s8382_s10, %s7435_s8  ;;  %s6073_s2 = sshll.u32 %s7423_s27, 6 }
  0x28   : > { %8383 = sst [smem:[#allocation8_spill]] %s7462_s5  ;;  %s7468_s6 = scalar_lea.vmem %s8384_s11, %s7435_s8 }
  0x29   : > { %8385 = sst [smem:[#allocation9_spill]] %s7468_s6  ;;  %s7478_s23 = scalar_lea.vmem %s8330_s12, %s6073_s2 }
  0x2a   : > { %s8386_s5 = sld [smem:[#allocation4_spill]] }
  0x30   : > { %p5607_p4 = scmp.ne.s32.totalorder %s8386_s5, 0 }
  0x31   : > { %s8387_s3 = sld [smem:[#allocation13_spill]] (!%p5607_p4)  ;;  %s8388_s9 = sld [smem:[#allocation10_spill]] (!%p5607_p4) }
  0x32   : > { %1007 = sbr.rel (%p5607_p4) target bundleno = 342 (0x156), region = 120  ;;  %s8389_s22 = sld [smem:[#allocation11_spill]] (!%p5607_p4) }
  0x37   : > { %v6917_v0 = vld [vmem:[%s8387_s3 + $0x40] sm:$0xff] (!%p5607_p4)   ;;  %v6921_v4 = vld [vmem:[%s8387_s3 + $0x48] sm:$0xff] (!%p5607_p4)   ;;  %v6925_v8 = vld [vmem:[%s8387_s3 + $0x50] sm:$0xff] (!%p5607_p4)  }
  0x38   : > { %v6918_v1 = vld [vmem:[%s8387_s3 + $0xc0] sm:$0xff] (!%p5607_p4)   ;;  %6076 = vmatprep.subr.bf16.mxu0 (!%p5607_p4), %v6917_v0  ;;  %v6922_v5 = vld [vmem:[%s8387_s3 + $0xc8] sm:$0xff] (!%p5607_p4)   ;;  %v6926_v9 = vld [vmem:[%s8387_s3 + $0xd0] sm:$0xff] (!%p5607_p4)  }
  0x39   : > { %v6919_v2 = vld [vmem:[%s8387_s3] sm:$0xff]   ;;  %6104 = vmatprep.subr.bf16.mxu1 %v6918_v1  ;;  %v6923_v6 = vld [vmem:[%s8387_s3 + $0x8] sm:$0xff]   ;;  %v6927_v10 = vld [vmem:[%s8387_s3 + $0x10] sm:$0xff]  }
  0x3a   : > { %v6920_v3 = vld [vmem:[%s8387_s3 + $0x80] sm:$0xff]   ;;  %6077 = vmatpush3.bf16.msra.mxu0 %v6919_v2  ;;  %v6924_v7 = vld [vmem:[%s8387_s3 + $0x88] sm:$0xff]   ;;  %v6928_v11 = vld [vmem:[%s8387_s3 + $0x90] sm:$0xff]  }
  0x3b   : > { %6105 = vmatpush3.bf16.msra.mxu1 %v6920_v3  ;;  %6078 = vmatprep.subr.bf16.mxu0 %v6921_v4  ;;  %v6929_v12 = vld [vmem:[%s8387_s3 + $0x58] sm:$0xff]   ;;  %v6933_v16 = vld [vmem:[%s8387_s3 + $0x60] sm:$0xff]   ;;  %v6937_v20 = vld [vmem:[%s8387_s3 + $0x68] sm:$0xff]  }
  0x3c   : > { %6106 = vmatprep.subr.bf16.mxu1 %v6922_v5  ;;  %v6930_v13 = vld [vmem:[%s8387_s3 + $0xd8] sm:$0xff]   ;;  %v6934_v17 = vld [vmem:[%s8387_s3 + $0xe0] sm:$0xff]   ;;  %v6938_v21 = vld [vmem:[%s8387_s3 + $0xe8] sm:$0xff]  }
  0x3d   : > { %v6931_v14 = vld [vmem:[%s8387_s3 + $0x18] sm:$0xff]   ;;  %v6935_v18 = vld [vmem:[%s8387_s3 + $0x20] sm:$0xff]   ;;  %v6939_v22 = vld [vmem:[%s8387_s3 + $0x28] sm:$0xff]  }
  0x3e   : > { %6079 = vmatpush3.bf16.msra.mxu0 %v6923_v6  ;;  %v6932_v15 = vld [vmem:[%s8387_s3 + $0x98] sm:$0xff]   ;;  %v6936_v19 = vld [vmem:[%s8387_s3 + $0xa0] sm:$0xff]   ;;  %v6940_v23 = vld [vmem:[%s8387_s3 + $0xa8] sm:$0xff]  }
  0x3f   : > { %6107 = vmatpush3.bf16.msra.mxu1 %v6924_v7  ;;  %6080 = vmatprep.subr.bf16.mxu0 %v6925_v8  ;;  %v6941_v24 = vld [vmem:[%s8387_s3 + $0x70] sm:$0xff]   ;;  %v6945_v28 = vld [vmem:[%s8387_s3 + $0x78] sm:$0xff]   ;;  %v1009_v32 = vld [vmem:[%s8388_s9 + $0x8] sm:$0xff] }
  0x40   : > { %6108 = vmatprep.subr.bf16.mxu1 %v6926_v9  ;;  %v6942_v25 = vld [vmem:[%s8387_s3 + $0xf0] sm:$0xff]   ;;  %v6946_v29 = vld [vmem:[%s8387_s3 + $0xf8] sm:$0xff]   ;;  %v1017_v36 = vld [vmem:[%s8388_s9 + $0x48] sm:$0xff] }
  0x41   : > { %v6943_v26 = vld [vmem:[%s8387_s3 + $0x30] sm:$0xff]   ;;  %v6947_v30 = vld [vmem:[%s8387_s3 + $0x38] sm:$0xff]   ;;  %v1008_v37 = vld [vmem:[%s8388_s9] sm:$0xff] }
  0x42   : > { %6081 = vmatpush3.bf16.msra.mxu0 %v6927_v10  ;;  %v6944_v27 = vld [vmem:[%s8387_s3 + $0xb0] sm:$0xff]   ;;  %v6948_v31 = vld [vmem:[%s8387_s3 + $0xb8] sm:$0xff]   ;;  %v1016_v42 = vld [vmem:[%s8388_s9 + $0x40] sm:$0xff] }
  0x43   : > { %6109 = vmatpush3.bf16.msra.mxu1 %v6928_v11  ;;  %6082 = vmatprep.subr.bf16.mxu0 %v6929_v12  ;;  %v1015_v33 = vld [vmem:[%s8388_s9 + $0x38] sm:$0xff]  ;;  %v1014_v38 = vld [vmem:[%s8388_s9 + $0x30] sm:$0xff]  ;;  %v6949_v44 = vld [vmem:[%s8387_s3 + $0x140] sm:$0xff]  }
  0x44   : > { %6110 = vmatprep.subr.bf16.mxu1 %v6930_v13  ;;  %v1011_v34 = vld [vmem:[%s8388_s9 + $0x18] sm:$0xff]  ;;  %v1033_v35 = vpack.c.bf16 %v1015_v33, %v1009_v32  ;;  %v1032_v40 = vpack.c.bf16 %v1014_v38, %v1008_v37  ;;  %v1010_v41 = vld [vmem:[%s8388_s9 + $0x10] sm:$0xff]  ;;  %v6950_v45 = vld [vmem:[%s8387_s3 + $0x100] sm:$0xff]  }
  0x45   : > { %v1035_v39 = vpack.c.bf16 %v1017_v36, %v1011_v34  ;;  %v1034_v43 = vpack.c.bf16 %v1016_v42, %v1010_v41  ;;  %v6951_v46 = vld [vmem:[%s8387_s3 + $0x148] sm:$0xff]   ;;  %v6953_v48 = vld [vmem:[%s8387_s3 + $0x150] sm:$0xff]   ;;  %v6955_v50 = vld [vmem:[%s8387_s3 + $0x158] sm:$0xff]  }
  0x46   : > { %6083 = vmatpush3.bf16.msra.mxu0 %v6931_v14  ;;  %1464 = vmatprep.mubr.bf16.mxu0 %v1033_v35  ;;  %v6952_v47 = vld [vmem:[%s8387_s3 + $0x108] sm:$0xff]   ;;  %v6954_v49 = vld [vmem:[%s8387_s3 + $0x110] sm:$0xff]   ;;  %v6956_v51 = vld [vmem:[%s8387_s3 + $0x118] sm:$0xff]  }
  0x47   : > { %6111 = vmatpush3.bf16.msra.mxu1 %v6932_v15  ;;  %6084 = vmatprep.subr.bf16.mxu0 %v6933_v16  ;;  %v1021_v52 = vld [vmem:[%s8388_s9 + $0x68] sm:$0xff]  ;;  %v1027_v53 = vld [vmem:[%s8388_s9 + $0x98] sm:$0xff]  ;;  %v1020_v54 = vld [vmem:[%s8388_s9 + $0x60] sm:$0xff] }
  0x48   : > { %6112 = vmatprep.subr.bf16.mxu1 %v6934_v17  ;;  %1513 = vmatprep.mubr.bf16.mxu1 %v1035_v39  ;;  %v1026_v55 = vld [vmem:[%s8388_s9 + $0x90] sm:$0xff]  ;;  %v1039_v56 = vpack.c.bf16 %v1027_v53, %v1021_v52  ;;  %v1023_v58 = vld [vmem:[%s8388_s9 + $0x78] sm:$0xff]  ;;  %v1029_v59 = vld [vmem:[%s8388_s9 + $0xa8] sm:$0xff] }
  0x49   : > { %v1038_v57 = vpack.c.bf16 %v1026_v55, %v1020_v54  ;;  %v6957_v60 = vld [vmem:[%s8387_s3 + $0x160] sm:$0xff]   ;;  %v1041_v61 = vpack.c.bf16 %v1029_v59, %v1023_v58  ;;  %v1022_v62 = vld [vmem:[%s8388_s9 + $0x70] sm:$0xff]  ;;  %v6959_v2 = vld [vmem:[%s8387_s3 + $0x168] sm:$0xff]  }
  0x4a   : > { %6085 = vmatpush3.bf16.msra.mxu0 %v6935_v18  ;;  %v1028_v63 = vld [vmem:[%s8388_s9 + $0xa0] sm:$0xff]  ;;  %v1013_v3 = vld [vmem:[%s8388_s9 + $0x28] sm:$0xff]  ;;  %v1019_v4 = vld [vmem:[%s8388_s9 + $0x58] sm:$0xff] }
  0x4b   : > { %6113 = vmatpush3.bf16.msra.mxu1 %v6936_v19  ;;  %6086 = vmatprep.subr.bf16.mxu0 %v6937_v20  ;;  %v1040_v0 = vpack.c.bf16 %v1028_v63, %v1022_v62  ;;  %v6958_v1 = vld [vmem:[%s8387_s3 + $0x120] sm:$0xff]   ;;  %v6960_v5 = vld [vmem:[%s8387_s3 + $0x128] sm:$0xff]   ;;  %v1037_v6 = vpack.c.bf16 %v1019_v4, %v1013_v3  ;;  %v1031_v8 = vld [vmem:[%s8388_s9 + $0xb8] sm:$0xff] }
  0x4c   : > { %6114 = vmatprep.subr.bf16.mxu1 %v6938_v21  ;;  %v1025_v7 = vld [vmem:[%s8388_s9 + $0x88] sm:$0xff]  ;;  %v6961_v9 = vld [vmem:[%s8387_s3 + $0x170] sm:$0xff]   ;;  %v6963_v12 = vld [vmem:[%s8387_s3 + $0x178] sm:$0xff]  }
  0x4d   : > { %v1043_v10 = vpack.c.bf16 %v1031_v8, %v1025_v7  ;;  %v6962_v11 = vld [vmem:[%s8387_s3 + $0x130] sm:$0xff]   ;;  %v6964_v13 = vld [vmem:[%s8387_s3 + $0x138] sm:$0xff]   ;;  %v1012_v14 = vld [vmem:[%s8388_s9 + $0x20] sm:$0xff] }
  0x4e   : > { %6087 = vmatpush3.bf16.msra.mxu0 %v6939_v22  ;;  %v1018_v15 = vld [vmem:[%s8388_s9 + $0x50] sm:$0xff]  ;;  %v1024_v16 = vld [vmem:[%s8388_s9 + $0x80] sm:$0xff] }
  0x4f   : > { %6115 = vmatpush3.bf16.msra.mxu1 %v6940_v23  ;;  %6088 = vmatprep.subr.bf16.mxu0 %v6941_v24  ;;  %v1030_v17 = vld [vmem:[%s8388_s9 + $0xb0] sm:$0xff]  ;;  %v1036_v18 = vpack.c.bf16 %v1018_v15, %v1012_v14  ;;  %v1140_v22 = vld [vmem:[%s8389_s22] sm:$0xff] }
  0x50   : > { %6116 = vmatprep.subr.bf16.mxu1 %v6942_v25  ;;  %v1042_v19 = vpack.c.bf16 %v1030_v17, %v1024_v16  ;;  %v1142_v39 = vld [vmem:[%s8389_s22 + $0x10] sm:$0xff] }
  0x52   : > { %6089 = vmatpush3.bf16.msra.mxu0 %v6943_v26 }
  0x53   : > { %6117 = vmatpush3.bf16.msra.mxu1 %v6944_v27  ;;  %6090 = vmatprep.subr.bf16.mxu0 %v6945_v28 }
  0x54   : > { %6118 = vmatprep.subr.bf16.mxu1 %v6946_v29  ;;  %v1141_v29 = vld [vmem:[%s8389_s22 + $0x8] sm:$0xff] }
  0x56   : > { %6091 = vmatpush3.bf16.msra.mxu0 %v6947_v30 }
  0x57   : > { %6119 = vmatpush3.bf16.msra.mxu1 %v6948_v31  ;;  %6132 = vmatprep.subr.bf16.mxu0 %v6949_v44 }
  0x58   : > { %6880 = vmatprep.subr.bf16.mxu1 %v6949_v44  ;;  %v1143_v44 = vld [vmem:[%s8389_s22 + $0x18] sm:$0xff] }
  0x59   : > { %1465 = vmatmul.mubr.bf16.vlgmr.msra.gmra.mrb[0].mxu0 %v1032_v40 }
  0x5a   : > { %1514 = vmatmul.mubr.bf16.vlgmr.msra.gmra.mrb[0].mxu1 %v1034_v43  ;;  %6133 = vmatpush3.bf16.msra.mxu0 %v6950_v45 }
  0x5b   : > { %6888 = vmatpush3.bf16.msra.mxu1 %v6950_v45  ;;  %6134 = vmatprep.subr.bf16.mxu0 %v6951_v46 }
  0x5c   : > { %6881 = vmatprep.subr.bf16.mxu1 %v6951_v46  ;;  %1472 = vmatprep.mubr.bf16.mxu0 %v1039_v56 }
  0x5d   : > { %1521 = vmatprep.mubr.bf16.mxu1 %v1041_v61 }
  0x5e   : > { %6135 = vmatpush3.bf16.msra.mxu0 %v6952_v47 }
  0x5f   : > { %6889 = vmatpush3.bf16.msra.mxu1 %v6952_v47  ;;  %6136 = vmatprep.subr.bf16.mxu0 %v6953_v48 }
  0x60   : > { %6882 = vmatprep.subr.bf16.mxu1 %v6953_v48 }
  0x61   : > { %1473 = vmatmul.mubr.bf16.gmra.mrb[4].mxu0 %v1038_v57 }
  0x62   : > { %6137 = vmatpush3.bf16.msra.mxu0 %v6954_v49  ;;  %1522 = vmatmul.mubr.bf16.gmra.mrb[4].mxu1 %v1040_v0 }
  0x63   : > { %6890 = vmatpush3.bf16.msra.mxu1 %v6954_v49  ;;  %6138 = vmatprep.subr.bf16.mxu0 %v6955_v50 }
  0x64   : > { %6883 = vmatprep.subr.bf16.mxu1 %v6955_v50  ;;  %1562 = vmatprep.mubr.bf16.mxu0 %v1037_v6 }
  0x65   : > { %1570 = vmatprep.mubr.bf16.mxu1 %v1043_v10 }
  0x66   : > { %6139 = vmatpush3.bf16.msra.mxu0 %v6956_v51 }
  0x67   : > { %6891 = vmatpush3.bf16.msra.mxu1 %v6956_v51  ;;  %6140 = vmatprep.subr.bf16.mxu0 %v6957_v60 }
  0x68   : > { %6884 = vmatprep.subr.bf16.mxu1 %v6957_v60 }
  0x6a   : > { %6141 = vmatpush3.bf16.msra.mxu0 %v6958_v1 }
  0x6b   : > { %6892 = vmatpush3.bf16.msra.mxu1 %v6958_v1  ;;  %6142 = vmatprep.subr.bf16.mxu0 %v6959_v2 }
  0x6c   : > { %6885 = vmatprep.subr.bf16.mxu1 %v6959_v2 }
  0x6e   : > { %6143 = vmatpush3.bf16.msra.mxu0 %v6960_v5 }
  0x6f   : > { %6893 = vmatpush3.bf16.msra.mxu1 %v6960_v5  ;;  %6144 = vmatprep.subr.bf16.mxu0 %v6961_v9 }
  0x70   : > { %6886 = vmatprep.subr.bf16.mxu1 %v6961_v9 }
  0x72   : > { %6145 = vmatpush3.bf16.msra.mxu0 %v6962_v11 }
  0x73   : > { %6894 = vmatpush3.bf16.msra.mxu1 %v6962_v11  ;;  %6146 = vmatprep.subr.bf16.mxu0 %v6963_v12 }
  0x74   : > { %6887 = vmatprep.subr.bf16.mxu1 %v6963_v12 }
  0x76   : > { %6147 = vmatpush3.bf16.msra.mxu0 %v6964_v13 }
  0x77   : > { %6895 = vmatpush3.bf16.msra.mxu1 %v6964_v13 }
  0x79   : > { %1563 = vmatmul.mubr.bf16.vlgmr.msra.gmra.mrb[8].mxu0 %v1036_v18 }
  0x7a   : > { %1571 = vmatmul.mubr.bf16.vlgmr.msra.gmra.mrb[8].mxu1 %v1042_v19 }
 0x12c   : > { %v6092_v20 = vpop.f32.mrb[0].mxu0 }
 0x12d   : > { %v6120_v21 = vpop.f32.mrb[0].mxu1  ;;  %v6093_v23 = vpop.f32.mrb[1].mxu0 }
 0x12e   : > { %v6094_v24 = vadd.f32 %v6093_v23, %v6092_v20  ;;  %v6121_v25 = vpop.f32.mrb[1].mxu1  ;;  %v6095_v26 = vpop.f32.mrb[2].mxu0 }
 0x12f   : > { %v6122_v27 = vadd.f32 %v6121_v25, %v6120_v21  ;;  %v6123_v28 = vpop.f32.mrb[2].mxu1  ;;  %v6096_v30 = vpop.f32.mrb[3].mxu0 }
 0x130   : > { %v1467_v31 = vadd.f32 %v6094_v24, %v1140_v22  ;;  %v6097_v32 = vadd.f32 %v6096_v30, %v6095_v26  ;;  %v6124_v33 = vpop.f32.mrb[3].mxu1 }
 0x131   : > { %v6125_v34 = vadd.f32 %v6124_v33, %v6123_v28 }
 0x132   : > { %v1516_v35 = vadd.f32 %v6122_v27, %v1467_v31  ;;  %v1470_v36 = vadd.f32 %v6097_v32, %v1141_v29 }
 0x134   : > { %v1519_v37 = vadd.f32 %v6125_v34, %v1470_v36  ;;  %v6098_v38 = vpop.f32.mrb[4].mxu0 }
 0x135   : > { %v6099_v40 = vpop.f32.mrb[5].mxu0  ;;  %v6126_v43 = vpop.f32.mrb[4].mxu1 }
 0x136   : > { %v6100_v41 = vadd.f32 %v6099_v40, %v6098_v38  ;;  %v6101_v42 = vpop.f32.mrb[6].mxu0  ;;  %v6127_v48 = vpop.f32.mrb[5].mxu1 }
 0x137   : > { %v6102_v45 = vpop.f32.mrb[7].mxu0  ;;  %v6128_v49 = vadd.f32 %v6127_v48, %v6126_v43  ;;  %v6129_v50 = vpop.f32.mrb[6].mxu1 }
 0x138   : > { %v1475_v46 = vadd.f32 %v6100_v41, %v1142_v39  ;;  %v6103_v47 = vadd.f32 %v6102_v45, %v6101_v42  ;;  %v6130_v52 = vpop.f32.mrb[7].mxu1 }
 0x139   : > { %v6131_v54 = vadd.f32 %v6130_v52, %v6129_v50 }
 0x13a   : > { %v1478_v51 = vadd.f32 %v6103_v47, %v1143_v44  ;;  %v1524_v53 = vadd.f32 %v6128_v49, %v1475_v46 }
 0x13c   : > { %v1527_v55 = vadd.f32 %v6131_v54, %v1478_v51 }
 0x14c   : > { %v6148_v56 = vpop.f32.mrb[8].mxu0 }
 0x14d   : > { %v6154_v57 = vpop.f32.mrb[8].mxu1  ;;  %v6149_v58 = vpop.f32.mrb[9].mxu0 }
 0x14e   : > { %v6150_v59 = vadd.f32 %v6149_v58, %v6148_v56  ;;  %v6155_v60 = vpop.f32.mrb[9].mxu1  ;;  %v6151_v61 = vpop.f32.mrb[10].mxu0 }
 0x14f   : > { %v6156_v62 = vadd.f32 %v6155_v60, %v6154_v57  ;;  %v6157_v63 = vpop.f32.mrb[10].mxu1  ;;  %v6152_v0 = vpop.f32.mrb[11].mxu0 }
 0x150   : > { %v1565_v1 = vadd.f32 %v6150_v59, %v1516_v35  ;;  %v6153_v2 = vadd.f32 %v6152_v0, %v6151_v61  ;;  %v6158_v3 = vpop.f32.mrb[11].mxu1 }
 0x151   : > { %v1573_v4 = vadd.f32 %v6156_v62, %v1524_v53  ;;  %v6159_v5 = vadd.f32 %v6158_v3, %v6157_v63 }
 0x152   : > { %1579 = vst [vmem:[#allocation2] sm:$0xff] %v1565_v1  ;;  %v1568_v6 = vadd.f32 %v6153_v2, %v1519_v37 }
 0x153   : > { %1581 = vst [vmem:[#allocation2 + $0x10] sm:$0xff] %v1573_v4  ;;  %v1576_v7 = vadd.f32 %v6159_v5, %v1527_v55 }
 0x154   : > { %1580 = vst [vmem:[#allocation2 + $0x8] sm:$0xff] %v1568_v6 }
 0x155   : > { %1582 = vst [vmem:[#allocation2 + $0x18] sm:$0xff] %v1576_v7 }
 0x156 PF: > { %s8390_s7 = sld [smem:[#allocation5_spill]]  ;;  %s8391_s10 = sld [smem:[#allocation6_spill]]  ;;  %vm2020_vm0 = vcmask 261120  }
 0x157   : > { %s8392_s26 = sld [smem:[#allocation7_spill]]  ;;  %s8393_s30 = sld [smem:[#allocation14_spill]]  ;;  %vm7822_vm1 = vmpackc.low %vm2020_vm0, %vm2020_vm0 }
 0x158   : > { %s8395_s25 = sld [smem:[#allocation15_spill]]  ;;  %s8398_s11 = sld [smem:[#allocation9_spill]] }
 0x159   : > { %v1583_v8 = vld [vmem:[#allocation2] sm:$0xff]  ;;  %s8405_s28 = scalar_lea.vmem %s8333_s15, %s7423_s27  ;;  %s8409_s24 = scalar_lea.vmem %s8339_s21, %s7423_s27 }
 0x15a   : > { %v1585_v9 = vld [vmem:[#allocation2 + $0x10] sm:$0xff]  ;;  %1593 = vadd.xlane.f32.xlu0 %v1583_v8 }
 0x15b   : > { %v1584_v10 = vld [vmem:[#allocation2 + $0x8] sm:$0xff]  ;;  %1597 = vadd.xlane.f32.xlu1 %v1585_v9 }
 0x15c   : > { %v1586_v11 = vld [vmem:[#allocation2 + $0x18] sm:$0xff]  ;;  %v6965_v12 = vld [vmem:[%s8390_s7] sm:$0xff]   ;;  %v6967_v30 = vld [vmem:[%s8390_s7 + $0x8] sm:$0xff]  }
 0x15d   : > { %v6966_v13 = vld [vmem:[%s8391_s10] sm:$0xff]   ;;  %6416 = vmatprep.subr.bf16.mxu0 %v6965_v12  ;;  %v6968_v31 = vld [vmem:[%s8391_s10 + $0x8] sm:$0xff]   ;;  %v6969_v32 = vld [vmem:[%s8390_s7 + $0x10] sm:$0xff]   ;;  %s8394_s5 = scalar_lea.vmem %s8393_s30, %s7423_s27  ;;  %s8404_s30 = scalar_lea.vmem %s8332_s14, %s7423_s27 }
 0x15e   : > { %1595 = vadd.xlane.f32.xlu0 %v1584_v10  ;;  %6436 = vmatprep.subr.bf16.mxu1 %v6966_v13  ;;  %v6970_v33 = vld [vmem:[%s8391_s10 + $0x10] sm:$0xff]   ;;  %v6971_v34 = vld [vmem:[%s8390_s7 + $0x18] sm:$0xff]   ;;  %v6973_v36 = vld [vmem:[%s8390_s7 + $0x20] sm:$0xff]   ;;  %s8396_s6 = scalar_lea.vmem %s8395_s25, %s7423_s27  ;;  %s8403_s25 = scalar_lea.vmem %s8331_s13, %s7423_s27 }
 0x15f   : > { %1599 = vadd.xlane.f32.xlu1 %v1586_v11  ;;  %6417 = vmatpush3.bf16.msra.mxu0 %v6965_v12  ;;  %v6972_v35 = vld [vmem:[%s8391_s10 + $0x18] sm:$0xff]   ;;  %v6974_v37 = vld [vmem:[%s8391_s10 + $0x20] sm:$0xff]   ;;  %v6975_v38 = vld [vmem:[%s8390_s7 + $0x28] sm:$0xff]  }
 0x160   : > { %6437 = vmatpush3.bf16.msra.mxu1 %v6966_v13  ;;  %6418 = vmatprep.subr.bf16.mxu0 %v6967_v30  ;;  %v6976_v39 = vld [vmem:[%s8391_s10 + $0x28] sm:$0xff]   ;;  %v6977_v40 = vld [vmem:[%s8390_s7 + $0x30] sm:$0xff]   ;;  %v6979_v42 = vld [vmem:[%s8390_s7 + $0x38] sm:$0xff]  }
 0x161   : > { %6438 = vmatprep.subr.bf16.mxu1 %v6968_v31  ;;  %v6978_v41 = vld [vmem:[%s8391_s10 + $0x30] sm:$0xff]   ;;  %v6980_v43 = vld [vmem:[%s8391_s10 + $0x38] sm:$0xff]   ;;  %v6981_v44 = vld [vmem:[%s8392_s26] sm:$0xff]  }
 0x162   : > { %v5656_v59 = vld [vmem:[%s8394_s5] ss:$0 sm:$0xff]  ;;  %v6982_v13 = vld [vmem:[%s8392_s26 + $0x8] sm:$0xff]   ;;  %s8401_s5 = sld [smem:[#allocation12_spill]] }
 0x163   : > { %6419 = vmatpush3.bf16.msra.mxu0 %v6967_v30  ;;  %v5657_v0 = vld [vmem:[%s8396_s6] ss:$0 sm:$0xff]  ;;  %s8397_s6 = sld [smem:[#allocation8_spill]] }
 0x164   : > { %6439 = vmatpush3.bf16.msra.mxu1 %v6968_v31  ;;  %6420 = vmatprep.subr.bf16.mxu0 %v6969_v32 }
 0x165   : > { %6440 = vmatprep.subr.bf16.mxu1 %v6970_v33 }
 0x167   : > { %6421 = vmatpush3.bf16.msra.mxu0 %v6969_v32 }
 0x168   : > { %6441 = vmatpush3.bf16.msra.mxu1 %v6970_v33  ;;  %6422 = vmatprep.subr.bf16.mxu0 %v6971_v34  ;;  %s8402_s29 = smov %s8401_s5 }
 0x169   : > { %6442 = vmatprep.subr.bf16.mxu1 %v6972_v35  ;;  %v5667_v31 = vld [vmem:[%s8397_s6] ss:$0 sm:$0xff] }
 0x16b   : > { %6423 = vmatpush3.bf16.msra.mxu0 %v6971_v34 }
 0x16c   : > { %6443 = vmatpush3.bf16.msra.mxu1 %v6972_v35  ;;  %6424 = vmatprep.subr.bf16.mxu0 %v6973_v36 }
 0x16d   : > { %6444 = vmatprep.subr.bf16.mxu1 %v6974_v37 }
 0x16f   : > { %6425 = vmatpush3.bf16.msra.mxu0 %v6973_v36 }
 0x170   : > { %6445 = vmatpush3.bf16.msra.mxu1 %v6974_v37  ;;  %6426 = vmatprep.subr.bf16.mxu0 %v6975_v38 }
 0x171   : > { %6446 = vmatprep.subr.bf16.mxu1 %v6976_v39 }
 0x173   : > { %6427 = vmatpush3.bf16.msra.mxu0 %v6975_v38 }
 0x174   : > { %6447 = vmatpush3.bf16.msra.mxu1 %v6976_v39  ;;  %6428 = vmatprep.subr.bf16.mxu0 %v6977_v40 }
 0x175   : > { %6448 = vmatprep.subr.bf16.mxu1 %v6978_v41 }
 0x177   : > { %6429 = vmatpush3.bf16.msra.mxu0 %v6977_v40 }
 0x178   : > { %6449 = vmatpush3.bf16.msra.mxu1 %v6978_v41  ;;  %6430 = vmatprep.subr.bf16.mxu0 %v6979_v42 }
 0x179   : > { %6450 = vmatprep.subr.bf16.mxu1 %v6980_v43 }
 0x17b   : > { %6431 = vmatpush3.bf16.msra.mxu0 %v6979_v42 }
 0x17c   : > { %6451 = vmatpush3.bf16.msra.mxu1 %v6980_v43  ;;  %6456 = vmatprep.subr.bf16.mxu0 %v6981_v44 }
 0x1e7   : > { %v1594_v14 = vpop.xlane.xlu0 %1593 }
 0x1e8   : > { %v1598_v15 = vpop.xlane.xlu1 %1597  ;;  %v1602_v16 = vmul.f32 0.0078125, %v1594_v14  ;;  %v6983_v14 = vld [vmem:[%s8392_s26 + $0x10] sm:$0xff]  }
 0x1e9   : > { %v1604_v17 = vmul.f32 0.0078125, %v1598_v15  ;;  %v6984_v15 = vld [vmem:[%s8392_s26 + $0x18] sm:$0xff]  }
 0x1ea   : > { %v7745_v18 = vsub.f32 %v1583_v8, %v1602_v16  ;;  %v6985_v16 = vld [vmem:[%s8392_s26 + $0x20] sm:$0xff]  }
 0x1eb   : > { %v7747_v19 = vsub.f32 %v1585_v9, %v1604_v17  ;;  %v1596_v20 = vpop.xlane.xlu0 %1595  ;;  %v6986_v17 = vld [vmem:[%s8392_s26 + $0x28] sm:$0xff]  }
 0x1ec   : > { %v1600_v21 = vpop.xlane.xlu1 %1599  ;;  %v1603_v22 = vmul.f32 0.0078125, %v1596_v20  ;;  %v1610_v23 = vmul.f32 %v7745_v18, %v7745_v18  ;;  %v6989_v20 = vld [vmem:[%s8391_s10 + $0x40] sm:$0xff]  }
 0x1ed   : > { %v1605_v24 = vmul.f32 0.0078125, %v1600_v21  ;;  %v1612_v27 = vmul.f32 %v7747_v19, %v7747_v19  ;;  %v6990_v21 = vld [vmem:[%s8391_s10 + $0x48] sm:$0xff]  }
 0x1ee   : > { %v7751_v25 = vsub.f32 %v1584_v10, %v1603_v22  ;;  %1614 = vadd.xlane.f32.xlu0 %v1610_v23  ;;  %v6991_v22 = vld [vmem:[%s8391_s10 + $0x50] sm:$0xff]   ;;  %v6992_v23 = vld [vmem:[%s8391_s10 + $0x58] sm:$0xff]  }
 0x1ef   : > { %v7753_v26 = vsub.f32 %v1586_v11, %v1605_v24  ;;  %v6993_v24 = vld [vmem:[%s8391_s10 + $0x60] sm:$0xff]  }
 0x1f0   : > { %v1611_v28 = vmul.f32 %v7751_v25, %v7751_v25 }
 0x1f1   : > { %v1613_v29 = vmul.f32 %v7753_v26, %v7753_v26 }
 0x1f2   : > { %1618 = vadd.xlane.f32.xlu0 %v1612_v27  ;;  %1616 = vadd.xlane.f32.xlu1 %v1611_v28  ;;  %v6996_v27 = vld [vmem:[%s8391_s10 + $0x78] sm:$0xff]   ;;  %v5658_v28 = vld [vmem:[%s7456_s1] ss:$0 sm:$0xff] }
 0x1f6   : > { %1620 = vadd.xlane.f32.xlu1 %v1613_v29 }
 0x27b   : > { %v1615_v45 = vpop.xlane.xlu0 %1614 }
 0x27c   : > { %v1622_v46 = vmul.f32 0.0078125, %v1615_v45 }
 0x27e   : > { %v1626_v47 = vadd.f32 1e-06, %v1622_v46 }
 0x27f   : > { %v1617_v48 = vpop.xlane.xlu1 %1616  ;;  %v1619_v49 = vpop.xlane.xlu0 %1618 }
 0x280   : > { %7149 = vrsqrt.f32 %v1626_v47  ;;  %v1623_v50 = vmul.f32 0.0078125, %v1617_v48  ;;  %v1624_v51 = vmul.f32 0.0078125, %v1619_v49 }
 0x282   : > { %v1627_v52 = vadd.f32 1e-06, %v1623_v50  ;;  %v1628_v53 = vadd.f32 1e-06, %v1624_v51  ;;  %v5676_v50 = vld [vmem:[%s8398_s11] ss:$0 sm:$0xff] }
 0x283   : > { %v1621_v54 = vpop.xlane.xlu1 %1620 }
 0x284   : > { %7151 = vrsqrt.f32 %v1627_v52  ;;  %v1625_v55 = vmul.f32 0.0078125, %v1621_v54 }
 0x285   : > { %7153 = vrsqrt.f32 %v1628_v53 }
 0x286   : > { %v1629_v56 = vadd.f32 1e-06, %v1625_v55 }
 0x288   : > { %7155 = vrsqrt.f32 %v1629_v56 }
 0x28a   : > { %v7150_v57 = vpop.eup %7149 }
 0x28b   : > { %v1634_v58 = vmul.f32 %v7150_v57, %v7745_v18  ;;  %v6987_v18 = vld [vmem:[%s8392_s26 + $0x30] sm:$0xff]  }
 0x28d   : > { %v1644_v62 = vmul.f32 %v5656_v59, %v1634_v58 }
 0x28e   : > { %v7152_v60 = vpop.eup %7151 }
 0x28f   : > { %v7154_v61 = vpop.eup %7153  ;;  %v1635_v63 = vmul.f32 %v7152_v60, %v7751_v25  ;;  %v1654_v4 = vadd.f32 %v5657_v0, %v1644_v62  ;;  %v6994_v25 = vld [vmem:[%s8391_s10 + $0x68] sm:$0xff]  }
 0x290   : > { %v1636_v1 = vmul.f32 %v7154_v61, %v7747_v19  ;;  %v6988_v19 = vld [vmem:[%s8392_s26 + $0x38] sm:$0xff]   ;;  %v5740_v61 = vld [vmem:[%s8397_s6 + $0x1] ss:$0 sm:$0xff] }
 0x291   : > { %v1645_v2 = vmul.f32 %v5656_v59, %v1635_v63 }
 0x292   : > { %v7156_v3 = vpop.eup %7155  ;;  %v1646_v6 = vmul.f32 %v5656_v59, %v1636_v1 }
 0x293   : > { %v1655_v5 = vadd.f32 %v5657_v0, %v1645_v2  ;;  %v1637_v7 = vmul.f32 %v7156_v3, %v7753_v26  ;;  %v6995_v26 = vld [vmem:[%s8391_s10 + $0x70] sm:$0xff]  }
 0x294   : > { %v1656_v10 = vadd.f32 %v5657_v0, %v1646_v6 }
 0x295   : > { %v7790_v8 = vpack.c.bf16 %v1655_v5, %v1654_v4  ;;  %v1647_v9 = vmul.f32 %v5656_v59, %v1637_v7  ;;  %v7850_v7 = vld [vmem:[%s8401_s5 + $0x8] sm:$0xff]  ;;  %s8408_s5 = scalar_lea.vmem %s8338_s20, %s7423_s27 }
 0x297   : > { %v1657_v11 = vadd.f32 %v5657_v0, %v1647_v9  ;;  %6432 = vmatprep.mubr.bf16.mxu0 %v7790_v8  ;;  %6452 = vmatprep.mubr.bf16.mxu1 %v7790_v8  ;;  %v7855_v9 = vld [vmem:[%s8402_s29] sm:$0xff] }
 0x299   : > { %v7794_v12 = vpack.c.bf16 %v1657_v11, %v1656_v10 }
 0x29b   : > { %6433 = vmatmul.mubr.bf16.vlgmr.msra.gmra.mrb[0].mxu0 %v7794_v12  ;;  %6453 = vmatmul.mubr.bf16.vlgmr.msra.gmra.mrb[0].mxu1 %v7794_v12 }
 0x29c   : > { %6457 = vmatpush3.bf16.msra.mxu0 %v6981_v44  ;;  %6472 = vmatprep.mubr.bf16.mxu0 %v7790_v8  ;;  %v7261_v44 = vld [vmem:[%s8402_s29 + $0x8] sm:$0xff] }
 0x29d   : > { %6458 = vmatprep.subr.bf16.mxu0 %v6982_v13 }
 0x2a0   : > { %6459 = vmatpush3.bf16.msra.mxu0 %v6982_v13 }
 0x2a1   : > { %6460 = vmatprep.subr.bf16.mxu0 %v6983_v14 }
 0x2a4   : > { %6461 = vmatpush3.bf16.msra.mxu0 %v6983_v14 }
 0x2a5   : > { %6462 = vmatprep.subr.bf16.mxu0 %v6984_v15 }
 0x2a8   : > { %6463 = vmatpush3.bf16.msra.mxu0 %v6984_v15  ;;  %v7862_v15 = vld [vmem:[%s8402_s29 + $0x18] sm:$0xff] }
 0x2a9   : > { %6464 = vmatprep.subr.bf16.mxu0 %v6985_v16 }
 0x2ac   : > { %6465 = vmatpush3.bf16.msra.mxu0 %v6985_v16 }
 0x2ad   : > { %6466 = vmatprep.subr.bf16.mxu0 %v6986_v17 }
 0x2b0   : > { %6467 = vmatpush3.bf16.msra.mxu0 %v6986_v17  ;;  %v7868_v17 = vld [vmem:[%s8402_s29 + $0x10] sm:$0xff] }
 0x2b1   : > { %6468 = vmatprep.subr.bf16.mxu0 %v6987_v18 }
 0x2b4   : > { %6469 = vmatpush3.bf16.msra.mxu0 %v6987_v18 }
 0x2b5   : > { %6470 = vmatprep.subr.bf16.mxu0 %v6988_v19 }
 0x2b8   : > { %6471 = vmatpush3.bf16.msra.mxu0 %v6988_v19 }
 0x2b9   : > { %6524 = vmatprep.subr.bf16.mxu0 %v6989_v20 }
 0x2bb   : > { %6473 = vmatmul.mubr.bf16.vlgmr.msra.gmra.mrb[4].mxu0 %v7794_v12 }
 0x2bc   : > { %6525 = vmatpush3.bf16.msra.mxu0 %v6989_v20  ;;  %6540 = vmatprep.mubr.bf16.mxu0 %v7790_v8 }
 0x2bd   : > { %6526 = vmatprep.subr.bf16.mxu0 %v6990_v21 }
 0x2c0   : > { %6527 = vmatpush3.bf16.msra.mxu0 %v6990_v21 }
 0x2c1   : > { %6528 = vmatprep.subr.bf16.mxu0 %v6991_v22 }
 0x2c4   : > { %6529 = vmatpush3.bf16.msra.mxu0 %v6991_v22 }
 0x2c5   : > { %6530 = vmatprep.subr.bf16.mxu0 %v6992_v23 }
 0x2c8   : > { %6531 = vmatpush3.bf16.msra.mxu0 %v6992_v23 }
 0x2c9   : > { %6532 = vmatprep.subr.bf16.mxu0 %v6993_v24 }
 0x2cc   : > { %6533 = vmatpush3.bf16.msra.mxu0 %v6993_v24 }
 0x2cd   : > { %6534 = vmatprep.subr.bf16.mxu0 %v6994_v25 }
 0x2d0   : > { %6535 = vmatpush3.bf16.msra.mxu0 %v6994_v25 }
 0x2d1   : > { %6536 = vmatprep.subr.bf16.mxu0 %v6995_v26 }
 0x2d4   : > { %6537 = vmatpush3.bf16.msra.mxu0 %v6995_v26 }
 0x2d5   : > { %6538 = vmatprep.subr.bf16.mxu0 %v6996_v27 }
 0x2d8   : > { %6539 = vmatpush3.bf16.msra.mxu0 %v6996_v27 }
 0x2db   : > { %6541 = vmatmul.mubr.bf16.vlgmr.msra.gmra.mrb[8].mxu0 %v7794_v12 }
 0x36e   : > { %v6434_v29 = vpop.f32.mrb[0].mxu0  ;;  %v6454_v30 = vpop.f32.mrb[0].mxu1 }
 0x36f   : > { %v1765_v32 = vpop.f32.mrb[1].mxu0  ;;  %v1885_v33 = vpop.f32.mrb[1].mxu1  ;;  %v1894_v37 = vadd.f32 %v6454_v30, %v5667_v31  ;;  %v1774_v47 = vadd.f32 %v6434_v29, %v5658_v28 }
 0x370   : > { %v1766_v34 = vadd.f32 %v5658_v28, %v1765_v32  ;;  %v6435_v35 = vpop.f32.mrb[2].mxu0  ;;  %v6455_v36 = vpop.f32.mrb[2].mxu1  ;;  %v1886_v41 = vadd.f32 %v5667_v31, %v1885_v33 }
 0x371   : > { %v1897_v38 = vadd.f32 %v6455_v36, %v5667_v31  ;;  %v1768_v39 = vpop.f32.mrb[3].mxu0  ;;  %v1888_v40 = vpop.f32.mrb[3].mxu1  ;;  %v1777_v48 = vadd.f32 %v6435_v35, %v5658_v28 }
 0x372   : > { %v1889_v42 = vadd.f32 %v5667_v31, %v1888_v40  ;;  %6484 = vmatprep.mubr.msk.f32.mxu1 %vm2020_vm0, %v1766_v34  ;;  %v1769_v46 = vadd.f32 %v5658_v28, %v1768_v39 }
 0x373   : > { %v6806_v43 = vpack.c.bf16 %v1897_v38, %v1894_v37 }
 0x374   : > { %v6800_v45 = vpack.c.bf16 %v1889_v42, %v1886_v41 }
 0x376   : > { %6802 = vmatprep.subr.msk.bf16.mxu1 %vm7822_vm1, %v6800_v45 }
 0x377   : > { %6805 = vmatpush3.bf16.xpose.msk.msra.mxu1 %vm7822_vm1, %v6800_v45 }
 0x378   : > { %6808 = vmatprep.subr.msk.bf16.mxu1 %vm7822_vm1, %v6806_v43 }
 0x37f   : > { %6811 = vmatpush3.bf16.xpose.msk.msra.mxu1 %vm7822_vm1, %v6806_v43 }
 0x386   : > { %6485 = vmatmul.mubr.msk.f32.vlgmr.msra.gmra.mrb[4].mxu1 %vm2020_vm0, %v1769_v46  ;;  %v6997_v46 = vld [vmem:[%s8390_s7 + $0x40] sm:$0xff]  }
 0x387   : > { %6487 = vmatprep.mubr.msk.f32.mxu1 %vm2020_vm0, %v1774_v47 }
 0x38a   : > { %6488 = vmatmul.mubr.msk.f32.gmra.mrb[6].mxu1 %vm2020_vm0, %v1777_v48 }
 0x38e   : > { %v6474_v49 = vpop.f32.mrb[4].mxu0 }
 0x38f   : > { %v2005_v51 = vpop.f32.mrb[5].mxu0  ;;  %v2014_v53 = vadd.f32 %v6474_v49, %v5676_v50 }
 0x390   : > { %v6475_v52 = vpop.f32.mrb[6].mxu0  ;;  %v2006_v56 = vadd.f32 %v5676_v50, %v2005_v51 }
 0x391   : > { %v2017_v54 = vadd.f32 %v6475_v52, %v5676_v50  ;;  %v2008_v55 = vpop.f32.mrb[7].mxu0 }
 0x392   : > { %v2009_v57 = vadd.f32 %v5676_v50, %v2008_v55  ;;  %v6998_v55 = vld [vmem:[%s8390_s7 + $0x48] sm:$0xff]  }
 0x393   : > { %v6816_v58 = vpack.c.bf16 %v2017_v54, %v2014_v53 }
 0x394   : > { %v6812_v59 = vpack.c.bf16 %v2009_v57, %v2006_v56 }
 0x396   : > { %6813 = vmatprep.subr.bf16.mxu1 %v6812_v59 }
 0x397   : > { %6815 = vmatpush3.bf16.msra.mxu1 %v6812_v59 }
 0x398   : > { %6817 = vmatprep.subr.bf16.mxu1 %v6816_v58 }
 0x39b   : > { %6819 = vmatpush3.bf16.msra.mxu1 %v6816_v58 }
 0x39c   : > { %6504 = vmatprep.subr.bf16.mxu1 %v6997_v46 }
 0x3ae   : > { %v6542_v60 = vpop.f32.mrb[8].mxu0 }
 0x3af   : > { %v2506_v62 = vpop.f32.mrb[9].mxu0  ;;  %v2515_v0 = vadd.f32 %v6542_v60, %v5740_v61  ;;  %v6999_v60 = vld [vmem:[%s8390_s7 + $0x50] sm:$0xff]  }
 0x3b0   : > { %v6543_v63 = vpop.f32.mrb[10].mxu0  ;;  %v2507_v3 = vadd.f32 %v5740_v61, %v2506_v62  ;;  %v7001_v62 = vld [vmem:[%s8390_s7 + $0x60] sm:$0xff]  }
 0x3b1   : > { %v2518_v1 = vadd.f32 %v6543_v63, %v5740_v61  ;;  %v2509_v2 = vpop.f32.mrb[11].mxu0  ;;  %v7002_v63 = vld [vmem:[%s8390_s7 + $0x68] sm:$0xff]  }
 0x3b2   : > { %v2510_v4 = vadd.f32 %v5740_v61, %v2509_v2  ;;  %v7000_v61 = vld [vmem:[%s8390_s7 + $0x58] sm:$0xff]   ;;  %v7005_v2 = vld [vmem:[%s8392_s26 + $0x40] sm:$0xff]  }
 0x3b3   : > { %v6826_v5 = vpack.c.bf16 %v2518_v1, %v2515_v0  ;;  %v7003_v0 = vld [vmem:[%s8390_s7 + $0x70] sm:$0xff]   ;;  %v7004_v1 = vld [vmem:[%s8390_s7 + $0x78] sm:$0xff]  }
 0x3b4   : > { %v6820_v6 = vpack.c.bf16 %v2510_v4, %v2507_v3  ;;  %v7006_v3 = vld [vmem:[%s8392_s26 + $0x48] sm:$0xff]   ;;  %v7007_v4 = vld [vmem:[%s8392_s26 + $0x50] sm:$0xff]  }
 0x3b6   : > { %6822 = vmatprep.subr.msk.bf16.mxu0 %vm7822_vm1, %v6820_v6 }
 0x3b7   : > { %6825 = vmatpush3.bf16.xpose.msk.msra.mxu0 %vm7822_vm1, %v6820_v6  ;;  %v7009_v6 = vld [vmem:[%s8392_s26 + $0x60] sm:$0xff]  }
 0x3b8   : > { %6828 = vmatprep.subr.msk.bf16.mxu0 %vm7822_vm1, %v6826_v5 }
 0x3bf   : > { %6831 = vmatpush3.bf16.xpose.msk.msra.mxu0 %vm7822_vm1, %v6826_v5  ;;  %v7008_v5 = vld [vmem:[%s8392_s26 + $0x58] sm:$0xff]  }
 0x459   : > { %v6486_v10 = vpop.f32.mrb[4].mxu1 }
 0x45a   : > { %v2117_v11 = vadd.f32 %v6486_v10, %v7850_v7  ;;  %v2111_v13 = vpop.f32.mrb[5].mxu1  ;;  %v7010_v10 = vld [vmem:[%s8392_s26 + $0x68] sm:$0xff]  }
 0x45b   : > { %v2112_v14 = vadd.f32 %v2111_v13, %v7855_v9  ;;  %v7012_v13 = vld [vmem:[%s8392_s26 + $0x78] sm:$0xff]  }
 0x45c   : > { %v2133_v16 = vsel %vm2020_vm0, %v2117_v11, -inf }
 0x45d   : > { %2134 = vmax.xlane.f32.xlu1 %v2133_v16  ;;  %v6489_v18 = vpop.f32.mrb[6].mxu1  ;;  %v2130_v19 = vsel %vm2020_vm0, %v2112_v14, -inf }
 0x45e   : > { %v2127_v20 = vadd.f32 %v6489_v18, %v7862_v15  ;;  %v2121_v21 = vpop.f32.mrb[7].mxu1  ;;  %2131 = vmax.xlane.f32.xlu0 %v2130_v19 }
 0x45f   : > { %v2122_v22 = vadd.f32 %v2121_v21, %v7868_v17 }
 0x460   : > { %v2139_v23 = vsel %vm2020_vm0, %v2127_v20, -inf }
 0x461   : > { %2140 = vmax.xlane.f32.xlu1 %v2139_v23  ;;  %v2136_v24 = vsel %vm2020_vm0, %v2122_v22, -inf }
 0x462   : > { %2137 = vmax.xlane.f32.xlu0 %v2136_v24 }
 0x4ea   : > { %v2135_v25 = vpop.xlane.xlu1 %2134 }
 0x4eb   : > { %v2143_v26 = vsub.f32 %v2117_v11, %v2135_v25  ;;  %v2132_v27 = vpop.xlane.xlu0 %2131  ;;  %v7011_v11 = vld [vmem:[%s8392_s26 + $0x70] sm:$0xff]  }
 0x4ec   : > { %v2142_v28 = vsub.f32 %v2112_v14, %v2132_v27 }
 0x4ed   : > { %v2148_v29 = vmul.f32 1.442695, %v2143_v26 }
 0x4ee   : > { %v2146_v30 = vmul.f32 1.442695, %v2142_v28  ;;  %v2141_v31 = vpop.xlane.xlu1 %2140 }
 0x4ef   : > { %7157 = vpow2.f32 %v2148_v29  ;;  %v2145_v32 = vsub.f32 %v2127_v20, %v2141_v31  ;;  %v2138_v33 = vpop.xlane.xlu0 %2137 }
 0x4f0   : > { %7159 = vpow2.f32 %v2146_v30  ;;  %v2144_v34 = vsub.f32 %v2122_v22, %v2138_v33  ;;  %v5714_v22 = vld [vmem:[%s7456_s1 + $0x1] ss:$0 sm:$0xff] }
 0x4f1   : > { %v2152_v35 = vmul.f32 1.442695, %v2145_v32  ;;  %v5766_v32 = vld [vmem:[%s8398_s11 + $0x1] ss:$0 sm:$0xff] }
 0x4f2   : > { %v2150_v36 = vmul.f32 1.442695, %v2144_v34 }
 0x4f3   : > { %7161 = vpow2.f32 %v2152_v35 }
 0x4f4   : > { %7163 = vpow2.f32 %v2150_v36 }
 0x4f9   : > { %v7158_v37 = vpop.eup %7157 }
 0x4fa   : > { %v7160_v38 = vpop.eup %7159  ;;  %v2157_v39 = vsel %vm2020_vm0, %v7158_v37, 0.0 }
 0x4fb   : > { %2158 = vadd.xlane.f32.xlu1 %v2157_v39  ;;  %v2154_v40 = vsel %vm2020_vm0, %v7160_v38, 0.0 }
 0x4fc   : > { %2155 = vadd.xlane.f32.xlu0 %v2154_v40 }
 0x4fd   : > { %v7162_v41 = vpop.eup %7161 }
 0x4fe   : > { %v7164_v42 = vpop.eup %7163  ;;  %v2163_v43 = vsel %vm2020_vm0, %v7162_v41, 0.0 }
 0x4ff   : > { %2164 = vadd.xlane.f32.xlu1 %v2163_v43  ;;  %v2160_v45 = vsel %vm2020_vm0, %v7164_v42, 0.0 }
 0x500   : > { %2161 = vadd.xlane.f32.xlu0 %v2160_v45 }
 0x588   : > { %v2159_v47 = vpop.xlane.xlu1 %2158 }
 0x589   : > { %7165 = vrcp.f32 %v2159_v47  ;;  %v2156_v48 = vpop.xlane.xlu0 %2155 }
 0x58a   : > { %7167 = vrcp.f32 %v2156_v48 }
 0x58c   : > { %v2165_v49 = vpop.xlane.xlu1 %2164 }
 0x58d   : > { %7169 = vrcp.f32 %v2165_v49  ;;  %v2162_v50 = vpop.xlane.xlu0 %2161 }
 0x58e   : > { %7171 = vrcp.f32 %v2162_v50 }
 0x593   : > { %v7166_v51 = vpop.eup %7165 }
 0x594   : > { %v7168_v52 = vpop.eup %7167  ;;  %v2171_v54 = vmul.f32 %v7166_v51, %v7158_v37 }
 0x595   : > { %v2170_v53 = vmul.f32 %v7168_v52, %v7160_v38 }
 0x597   : > { %v7170_v56 = vpop.eup %7169  ;;  %6498 = vmatprep.mubr.msk.f32.mxu1 %vm2020_vm0, %v2170_v53 }
 0x598   : > { %v7172_v57 = vpop.eup %7171  ;;  %6499 = vmatmul.mubr.msk.f32.vlgmr.msra.gmra.mrb[8].mxu1 %vm2020_vm0, %v2171_v54  ;;  %v2173_v59 = vmul.f32 %v7170_v56, %v7162_v41 }
 0x599   : > { %6505 = vmatpush3.bf16.msra.mxu1 %v6997_v46  ;;  %v2172_v58 = vmul.f32 %v7172_v57, %v7164_v42 }
 0x59a   : > { %6506 = vmatprep.subr.bf16.mxu1 %v6998_v55 }
 0x59b   : > { %6501 = vmatprep.mubr.msk.f32.mxu1 %vm2020_vm0, %v2172_v58 }
 0x59c   : > { %6502 = vmatmul.mubr.msk.f32.gmra.mrb[10].mxu1 %vm2020_vm0, %v2173_v59 }
 0x59d   : > { %6507 = vmatpush3.bf16.msra.mxu1 %v6998_v55  ;;  %6520 = vmatprep.mubr.bf16.mxu1 %v7790_v8 }
 0x59e   : > { %6508 = vmatprep.subr.bf16.mxu1 %v6999_v60 }
 0x5a1   : > { %6509 = vmatpush3.bf16.msra.mxu1 %v6999_v60 }
 0x5a2   : > { %6510 = vmatprep.subr.bf16.mxu1 %v7000_v61 }
 0x5a5   : > { %6511 = vmatpush3.bf16.msra.mxu1 %v7000_v61 }
 0x5a6   : > { %6512 = vmatprep.subr.bf16.mxu1 %v7001_v62 }
 0x5a9   : > { %6513 = vmatpush3.bf16.msra.mxu1 %v7001_v62 }
 0x5aa   : > { %6514 = vmatprep.subr.bf16.mxu1 %v7002_v63 }
 0x5ad   : > { %6515 = vmatpush3.bf16.msra.mxu1 %v7002_v63 }
 0x5ae   : > { %6516 = vmatprep.subr.bf16.mxu1 %v7003_v0 }
 0x5b1   : > { %6517 = vmatpush3.bf16.msra.mxu1 %v7003_v0 }
 0x5b2   : > { %6518 = vmatprep.subr.bf16.mxu1 %v7004_v1 }
 0x5b5   : > { %6519 = vmatpush3.bf16.msra.mxu1 %v7004_v1 }
 0x5b6   : > { %6544 = vmatprep.subr.bf16.mxu1 %v7005_v2 }
 0x5b8   : > { %6521 = vmatmul.mubr.bf16.vlgmr.msra.gmra.mrb[12].mxu1 %v7794_v12 }
 0x5b9   : > { %6545 = vmatpush3.bf16.msra.mxu1 %v7005_v2  ;;  %6560 = vmatprep.mubr.bf16.mxu1 %v7790_v8 }
 0x5ba   : > { %6546 = vmatprep.subr.bf16.mxu1 %v7006_v3 }
 0x5bd   : > { %6547 = vmatpush3.bf16.msra.mxu1 %v7006_v3 }
 0x5be   : > { %6548 = vmatprep.subr.bf16.mxu1 %v7007_v4 }
 0x5c1   : > { %6549 = vmatpush3.bf16.msra.mxu1 %v7007_v4 }
 0x5c2   : > { %6550 = vmatprep.subr.bf16.mxu1 %v7008_v5 }
 0x5c5   : > { %6551 = vmatpush3.bf16.msra.mxu1 %v7008_v5 }
 0x5c6   : > { %6552 = vmatprep.subr.bf16.mxu1 %v7009_v6 }
 0x5c9   : > { %6553 = vmatpush3.bf16.msra.mxu1 %v7009_v6 }
 0x5ca   : > { %6554 = vmatprep.subr.bf16.mxu1 %v7010_v10 }
 0x5cd   : > { %6555 = vmatpush3.bf16.msra.mxu1 %v7010_v10 }
 0x5ce   : > { %6556 = vmatprep.subr.bf16.mxu1 %v7011_v11 }
 0x5d1   : > { %6557 = vmatpush3.bf16.msra.mxu1 %v7011_v11 }
 0x5d2   : > { %6558 = vmatprep.subr.bf16.mxu1 %v7012_v13 }
 0x5d5   : > { %6559 = vmatpush3.bf16.msra.mxu1 %v7012_v13 }
 0x5d8   : > { %6561 = vmatmul.mubr.bf16.vlgmr.msra.gmra.mrb[16].mxu1 %v7794_v12 }
 0x66b   : > { %v7903_v14 = vpop.f32.mrb[8].mxu1 }
 0x66c   : > { %v7905_v16 = vpop.f32.mrb[9].mxu1 }
 0x66d   : > { %v2271_v18 = vpack.c.bf16 %v7903_v14, %v7905_v16  ;;  %v7051_v14 = vld [vmem:[%s8391_s10 + $0x90] sm:$0xff]   ;;  %v7052_v16 = vld [vmem:[%s8391_s10 + $0x98] sm:$0xff]  }
 0x66f   : > { %v7909_v19 = vpop.f32.mrb[10].mxu1 }
 0x670   : > { %v7911_v20 = vpop.f32.mrb[11].mxu1 }
 0x671   : > { %v2272_v21 = vpack.c.bf16 %v7909_v19, %v7911_v20 }
 0x68b   : > { %v6522_v23 = vpop.f32.mrb[12].mxu1 }
 0x68c   : > { %v2384_v24 = vpop.f32.mrb[13].mxu1  ;;  %v2393_v29 = vadd.f32 %v6522_v23, %v5714_v22  ;;  %v7013_v23 = vld [vmem:[%s8390_s7 + $0x80] sm:$0xff]  }
 0x68d   : > { %v2385_v25 = vadd.f32 %v5714_v22, %v2384_v24  ;;  %v6523_v26 = vpop.f32.mrb[14].mxu1 }
 0x68e   : > { %v2387_v27 = vpop.f32.mrb[15].mxu1  ;;  %v2396_v30 = vadd.f32 %v6523_v26, %v5714_v22 }
 0x68f   : > { %v2388_v28 = vadd.f32 %v5714_v22, %v2387_v27  ;;  %6572 = vmatprep.mubr.msk.f32.mxu0 %vm2020_vm0, %v2385_v25 }
 0x691   : > { %6573 = vmatmul.mubr.msk.f32.vlgmr.msra.gmra.mrb[12].mxu0 %vm2020_vm0, %v2388_v28 }
 0x692   : > { %6575 = vmatprep.mubr.msk.f32.mxu0 %vm2020_vm0, %v2393_v29 }
 0x695   : > { %6576 = vmatmul.mubr.msk.f32.gmra.mrb[14].mxu0 %vm2020_vm0, %v2396_v30 }
 0x6ab   : > { %v6562_v31 = vpop.f32.mrb[16].mxu1 }
 0x6ac   : > { %v2628_v33 = vpop.f32.mrb[17].mxu1  ;;  %v2637_v35 = vadd.f32 %v6562_v31, %v5766_v32 }
 0x6ad   : > { %v6563_v34 = vpop.f32.mrb[18].mxu1  ;;  %v2629_v38 = vadd.f32 %v5766_v32, %v2628_v33 }
 0x6ae   : > { %v2640_v36 = vadd.f32 %v6563_v34, %v5766_v32  ;;  %v2631_v37 = vpop.f32.mrb[19].mxu1 }
 0x6af   : > { %v2632_v39 = vadd.f32 %v5766_v32, %v2631_v37  ;;  %v7014_v32 = vld [vmem:[%s8390_s7 + $0x88] sm:$0xff]  }
 0x6b0   : > { %v6836_v40 = vpack.c.bf16 %v2640_v36, %v2637_v35  ;;  %v7045_v35 = vld [vmem:[%s7478_s23 + $0x10] sm:$0xff]  }
 0x6b1   : > { %v6832_v41 = vpack.c.bf16 %v2632_v39, %v2629_v38  ;;  %v7015_v38 = vld [vmem:[%s8390_s7 + $0x90] sm:$0xff]   ;;  %6592 = vmatprep.subr.bf16.mxu0 %v7045_v35  ;;  %v7016_v39 = vld [vmem:[%s8390_s7 + $0x98] sm:$0xff]  }
 0x6b2   : > { %6593 = vmatpush3.bf16.msra.mxu0 %v7045_v35  ;;  %v7056_v35 = vld [vmem:[%s8391_s10 + $0xb8] sm:$0xff]  }
 0x6b3   : > { %6833 = vmatprep.subr.bf16.mxu1 %v6832_v41 }
 0x6b4   : > { %6835 = vmatpush3.bf16.msra.mxu1 %v6832_v41  ;;  %v7018_v41 = vld [vmem:[%s8390_s7 + $0xa8] sm:$0xff]  }
 0x6b5   : > { %6837 = vmatprep.subr.bf16.mxu1 %v6836_v40 }
 0x6b8   : > { %6839 = vmatpush3.bf16.msra.mxu1 %v6836_v40  ;;  %v7017_v40 = vld [vmem:[%s8390_s7 + $0xa0] sm:$0xff]  }
 0x6b9   : > { %6608 = vmatprep.subr.bf16.mxu1 %v7013_v23 }
 0x764   : > { %v6574_v42 = vpop.f32.mrb[12].mxu0 }
 0x765   : > { %v2739_v43 = vadd.f32 %v6574_v42, %v7850_v7  ;;  %v2733_v45 = vpop.f32.mrb[13].mxu0  ;;  %v7019_v42 = vld [vmem:[%s8390_s7 + $0xb0] sm:$0xff]  }
 0x766   : > { %v2734_v46 = vadd.f32 %v2733_v45, %v7855_v9  ;;  %v7021_v45 = vld [vmem:[%s8392_s26 + $0x80] sm:$0xff]  }
 0x767   : > { %v2755_v47 = vsel %vm2020_vm0, %v2739_v43, -inf }
 0x768   : > { %2756 = vmax.xlane.f32.xlu1 %v2755_v47  ;;  %v6577_v48 = vpop.f32.mrb[14].mxu0  ;;  %v2752_v49 = vsel %vm2020_vm0, %v2734_v46, -inf  ;;  %v7023_v47 = vld [vmem:[%s8392_s26 + $0x90] sm:$0xff]  }
 0x769   : > { %v2749_v50 = vadd.f32 %v6577_v48, %v7862_v15  ;;  %v2743_v51 = vpop.f32.mrb[15].mxu0  ;;  %2753 = vmax.xlane.f32.xlu0 %v2752_v49  ;;  %v7024_v48 = vld [vmem:[%s8392_s26 + $0x98] sm:$0xff]   ;;  %v7025_v49 = vld [vmem:[%s8392_s26 + $0xa0] sm:$0xff]  }
 0x76a   : > { %v2744_v52 = vadd.f32 %v2743_v51, %v7868_v17  ;;  %v7027_v51 = vld [vmem:[%s8392_s26 + $0xb0] sm:$0xff]  }
 0x76b   : > { %v2761_v53 = vsel %vm2020_vm0, %v2749_v50, -inf }
 0x76c   : > { %2762 = vmax.xlane.f32.xlu1 %v2761_v53  ;;  %v2758_v54 = vsel %vm2020_vm0, %v2744_v52, -inf  ;;  %v7029_v53 = vld [vmem:[%s8390_s7 + $0xc0] sm:$0xff]  }
 0x76d   : > { %2759 = vmax.xlane.f32.xlu0 %v2758_v54  ;;  %v7030_v54 = vld [vmem:[%s8390_s7 + $0xc8] sm:$0xff]  }
 0x7f5   : > { %v2757_v55 = vpop.xlane.xlu1 %2756 }
 0x7f6   : > { %v2765_v56 = vsub.f32 %v2739_v43, %v2757_v55  ;;  %v2754_v57 = vpop.xlane.xlu0 %2753  ;;  %v7020_v43 = vld [vmem:[%s8390_s7 + $0xb8] sm:$0xff]   ;;  %v7031_v55 = vld [vmem:[%s8390_s7 + $0xd0] sm:$0xff]  }
 0x7f7   : > { %v2764_v58 = vsub.f32 %v2734_v46, %v2754_v57  ;;  %v7022_v46 = vld [vmem:[%s8392_s26 + $0x88] sm:$0xff]   ;;  %v7033_v57 = vld [vmem:[%s8390_s7 + $0xe0] sm:$0xff]  }
 0x7f8   : > { %v2770_v59 = vmul.f32 1.442695, %v2765_v56  ;;  %v7032_v56 = vld [vmem:[%s8390_s7 + $0xd8] sm:$0xff]  }
 0x7f9   : > { %v2768_v60 = vmul.f32 1.442695, %v2764_v58  ;;  %v2763_v61 = vpop.xlane.xlu1 %2762  ;;  %v7034_v58 = vld [vmem:[%s8390_s7 + $0xe8] sm:$0xff]  }
 0x7fa   : > { %7173 = vpow2.f32 %v2770_v59  ;;  %v2767_v62 = vsub.f32 %v2749_v50, %v2763_v61  ;;  %v2760_v63 = vpop.xlane.xlu0 %2759  ;;  %v7026_v50 = vld [vmem:[%s8392_s26 + $0xa8] sm:$0xff]   ;;  %v7035_v59 = vld [vmem:[%s8390_s7 + $0xf0] sm:$0xff]   ;;  %v7036_v61 = vld [vmem:[%s8390_s7 + $0xf8] sm:$0xff]  }
 0x7fb   : > { %7175 = vpow2.f32 %v2768_v60  ;;  %v2766_v0 = vsub.f32 %v2744_v52, %v2760_v63  ;;  %v7028_v52 = vld [vmem:[%s8392_s26 + $0xb8] sm:$0xff]   ;;  %v7037_v63 = vld [vmem:[%s8392_s26 + $0xc0] sm:$0xff]  }
 0x7fc   : > { %v2774_v1 = vmul.f32 1.442695, %v2767_v62  ;;  %v7046_v60 = vld [vmem:[%s7478_s23 + $0x18] sm:$0xff]   ;;  %v7047_v62 = vld [vmem:[%s7478_s23] sm:$0xff]  }
 0x7fd   : > { %v2772_v2 = vmul.f32 1.442695, %v2766_v0  ;;  %6594 = vmatprep.subr.bf16.mxu0 %v7046_v60  ;;  %v7038_v0 = vld [vmem:[%s8392_s26 + $0xc8] sm:$0xff]  }
 0x7fe   : > { %7177 = vpow2.f32 %v2774_v1  ;;  %6595 = vmatpush3.bf16.msra.mxu0 %v7046_v60  ;;  %v7039_v1 = vld [vmem:[%s8392_s26 + $0xd0] sm:$0xff]  }
 0x7ff   : > { %7179 = vpow2.f32 %v2772_v2  ;;  %6600 = vmatprep.subr.bf16.mxu0 %v7047_v62  ;;  %v7040_v2 = vld [vmem:[%s8392_s26 + $0xd8] sm:$0xff]  }
 0x804   : > { %v7174_v3 = vpop.eup %7173 }
 0x805   : > { %v7176_v4 = vpop.eup %7175  ;;  %v2779_v5 = vsel %vm2020_vm0, %v7174_v3, 0.0 }
 0x806   : > { %2780 = vadd.xlane.f32.xlu1 %v2779_v5  ;;  %v2776_v6 = vsel %vm2020_vm0, %v7176_v4, 0.0  ;;  %v7043_v5 = vld [vmem:[%s8392_s26 + $0xf0] sm:$0xff]  }
 0x807   : > { %2777 = vadd.xlane.f32.xlu0 %v2776_v6  ;;  %v7044_v6 = vld [vmem:[%s8392_s26 + $0xf8] sm:$0xff]  }
 0x808   : > { %v7178_v10 = vpop.eup %7177 }
 0x809   : > { %v7180_v11 = vpop.eup %7179  ;;  %v2785_v13 = vsel %vm2020_vm0, %v7178_v10, 0.0 }
 0x80a   : > { %2786 = vadd.xlane.f32.xlu1 %v2785_v13  ;;  %v2782_v22 = vsel %vm2020_vm0, %v7180_v11, 0.0 }
 0x80b   : > { %2783 = vadd.xlane.f32.xlu0 %v2782_v22 }
 0x893   : > { %v2781_v24 = vpop.xlane.xlu1 %2780 }
 0x894   : > { %7181 = vrcp.f32 %v2781_v24  ;;  %v2778_v25 = vpop.xlane.xlu0 %2777 }
 0x895   : > { %7183 = vrcp.f32 %v2778_v25  ;;  %v7048_v25 = vld [vmem:[%s7478_s23 + $0x8] sm:$0xff]  }
 0x897   : > { %v2787_v26 = vpop.xlane.xlu1 %2786 }
 0x898   : > { %7185 = vrcp.f32 %v2787_v26  ;;  %v2784_v27 = vpop.xlane.xlu0 %2783  ;;  %v7049_v26 = vld [vmem:[%s8391_s10 + $0x80] sm:$0xff]  }
 0x899   : > { %7187 = vrcp.f32 %v2784_v27  ;;  %v7050_v27 = vld [vmem:[%s8391_s10 + $0x88] sm:$0xff]  }
 0x89e   : > { %v7182_v28 = vpop.eup %7181 }
 0x89f   : > { %v7184_v29 = vpop.eup %7183  ;;  %v2793_v31 = vmul.f32 %v7182_v28, %v7174_v3  ;;  %v7041_v3 = vld [vmem:[%s8392_s26 + $0xe0] sm:$0xff]  }
 0x8a0   : > { %v2792_v30 = vmul.f32 %v7184_v29, %v7176_v4  ;;  %v7042_v4 = vld [vmem:[%s8392_s26 + $0xe8] sm:$0xff]   ;;  %v7053_v28 = vld [vmem:[%s8391_s10 + $0xa0] sm:$0xff]  }
 0x8a2   : > { %v7186_v33 = vpop.eup %7185  ;;  %6586 = vmatprep.mubr.msk.f32.mxu1 %vm2020_vm0, %v2792_v30 }
 0x8a3   : > { %v7188_v34 = vpop.eup %7187  ;;  %6587 = vmatmul.mubr.msk.f32.vlgmr.msra.gmra.mrb[20].mxu1 %vm2020_vm0, %v2793_v31  ;;  %v2795_v37 = vmul.f32 %v7186_v33, %v7178_v10 }
 0x8a4   : > { %6609 = vmatpush3.bf16.msra.mxu1 %v7013_v23  ;;  %v2794_v36 = vmul.f32 %v7188_v34, %v7180_v11  ;;  %v7055_v34 = vld [vmem:[%s8391_s10 + $0xb0] sm:$0xff]  }
 0x8a5   : > { %6610 = vmatprep.subr.bf16.mxu1 %v7014_v32 }
 0x8a6   : > { %6589 = vmatprep.mubr.msk.f32.mxu1 %vm2020_vm0, %v2794_v36 }
 0x8a7   : > { %6590 = vmatmul.mubr.msk.f32.gmra.mrb[22].mxu1 %vm2020_vm0, %v2795_v37 }
 0x8a8   : > { %6611 = vmatpush3.bf16.msra.mxu1 %v7014_v32  ;;  %6624 = vmatprep.mubr.bf16.mxu1 %v7790_v8 }
 0x8a9   : > { %6612 = vmatprep.subr.bf16.mxu1 %v7015_v38 }
 0x8ac   : > { %6613 = vmatpush3.bf16.msra.mxu1 %v7015_v38  ;;  %v5868_v38 = vld [vmem:[%s8398_s11 + $0x2] ss:$0 sm:$0xff] }
 0x8ad   : > { %6614 = vmatprep.subr.bf16.mxu1 %v7016_v39 }
 0x8b0   : > { %6615 = vmatpush3.bf16.msra.mxu1 %v7016_v39 }
 0x8b1   : > { %6616 = vmatprep.subr.bf16.mxu1 %v7017_v40 }
 0x8b4   : > { %6617 = vmatpush3.bf16.msra.mxu1 %v7017_v40 }
 0x8b5   : > { %6618 = vmatprep.subr.bf16.mxu1 %v7018_v41 }
 0x8b8   : > { %6619 = vmatpush3.bf16.msra.mxu1 %v7018_v41 }
 0x8b9   : > { %6620 = vmatprep.subr.bf16.mxu1 %v7019_v42 }
 0x8bc   : > { %6621 = vmatpush3.bf16.msra.mxu1 %v7019_v42 }
 0x8bd   : > { %6622 = vmatprep.subr.bf16.mxu1 %v7020_v43 }
 0x8c0   : > { %6623 = vmatpush3.bf16.msra.mxu1 %v7020_v43 }
 0x8c1   : > { %6648 = vmatprep.subr.bf16.mxu1 %v7021_v45 }
 0x8c3   : > { %6625 = vmatmul.mubr.bf16.vlgmr.msra.gmra.mrb[24].mxu1 %v7794_v12 }
 0x8c4   : > { %6649 = vmatpush3.bf16.msra.mxu1 %v7021_v45  ;;  %6664 = vmatprep.mubr.bf16.mxu1 %v7790_v8 }
 0x8c5   : > { %6650 = vmatprep.subr.bf16.mxu1 %v7022_v46 }
 0x8c8   : > { %6651 = vmatpush3.bf16.msra.mxu1 %v7022_v46 }
 0x8c9   : > { %6652 = vmatprep.subr.bf16.mxu1 %v7023_v47 }
 0x8cc   : > { %6653 = vmatpush3.bf16.msra.mxu1 %v7023_v47 }
 0x8cd   : > { %6654 = vmatprep.subr.bf16.mxu1 %v7024_v48 }
 0x8d0   : > { %6655 = vmatpush3.bf16.msra.mxu1 %v7024_v48 }
 0x8d1   : > { %6656 = vmatprep.subr.bf16.mxu1 %v7025_v49 }
 0x8d4   : > { %6657 = vmatpush3.bf16.msra.mxu1 %v7025_v49  ;;  %v8009_v49 = vld [vmem:[%s7456_s1 + $0x3] ss:$0 sm:$0xff] }
 0x8d5   : > { %6658 = vmatprep.subr.bf16.mxu1 %v7026_v50 }
 0x8d8   : > { %6659 = vmatpush3.bf16.msra.mxu1 %v7026_v50 }
 0x8d9   : > { %6660 = vmatprep.subr.bf16.mxu1 %v7027_v51 }
 0x8dc   : > { %6661 = vmatpush3.bf16.msra.mxu1 %v7027_v51 }
 0x8dd   : > { %6662 = vmatprep.subr.bf16.mxu1 %v7028_v52 }
 0x8e0   : > { %6663 = vmatpush3.bf16.msra.mxu1 %v7028_v52 }
 0x8e1   : > { %6704 = vmatprep.subr.bf16.mxu1 %v7029_v53 }
 0x8e3   : > { %6665 = vmatmul.mubr.bf16.vlgmr.msra.gmra.mrb[28].mxu1 %v7794_v12 }
 0x8e4   : > { %6705 = vmatpush3.bf16.msra.mxu1 %v7029_v53  ;;  %6720 = vmatprep.mubr.bf16.mxu1 %v7790_v8 }
 0x8e5   : > { %6706 = vmatprep.subr.bf16.mxu1 %v7030_v54 }
 0x8e8   : > { %6707 = vmatpush3.bf16.msra.mxu1 %v7030_v54 }
 0x8e9   : > { %6708 = vmatprep.subr.bf16.mxu1 %v7031_v55 }
 0x8ec   : > { %6709 = vmatpush3.bf16.msra.mxu1 %v7031_v55 }
 0x8ed   : > { %6710 = vmatprep.subr.bf16.mxu1 %v7032_v56 }
 0x8f0   : > { %6711 = vmatpush3.bf16.msra.mxu1 %v7032_v56 }
 0x8f1   : > { %6712 = vmatprep.subr.bf16.mxu1 %v7033_v57 }
 0x8f4   : > { %6713 = vmatpush3.bf16.msra.mxu1 %v7033_v57 }
 0x8f5   : > { %6714 = vmatprep.subr.bf16.mxu1 %v7034_v58 }
 0x8f8   : > { %6715 = vmatpush3.bf16.msra.mxu1 %v7034_v58  ;;  %v5966_v58 = vld [vmem:[%s8398_s11 + $0x3] ss:$0 sm:$0xff]  ;;  %s8407_s11 = scalar_lea.vmem %s8336_s18, %s7435_s8 }
 0x8f9   : > { %6716 = vmatprep.subr.bf16.mxu1 %v7035_v59 }
 0x8fc   : > { %6717 = vmatpush3.bf16.msra.mxu1 %v7035_v59 }
 0x8fd   : > { %6718 = vmatprep.subr.bf16.mxu1 %v7036_v61 }
 0x900   : > { %6719 = vmatpush3.bf16.msra.mxu1 %v7036_v61 }
 0x901   : > { %6744 = vmatprep.subr.bf16.mxu1 %v7037_v63 }
 0x903   : > { %6721 = vmatmul.mubr.bf16.vlgmr.msra.gmra.mrb[32].mxu1 %v7794_v12 }
 0x904   : > { %6745 = vmatpush3.bf16.msra.mxu1 %v7037_v63  ;;  %6760 = vmatprep.mubr.bf16.mxu1 %v7790_v8 }
 0x905   : > { %6746 = vmatprep.subr.bf16.mxu1 %v7038_v0 }
 0x908   : > { %6747 = vmatpush3.bf16.msra.mxu1 %v7038_v0 }
 0x909   : > { %6748 = vmatprep.subr.bf16.mxu1 %v7039_v1 }
 0x90c   : > { %6749 = vmatpush3.bf16.msra.mxu1 %v7039_v1 }
 0x90d   : > { %6750 = vmatprep.subr.bf16.mxu1 %v7040_v2 }
 0x910   : > { %6751 = vmatpush3.bf16.msra.mxu1 %v7040_v2 }
 0x911   : > { %6752 = vmatprep.subr.bf16.mxu1 %v7041_v3 }
 0x914   : > { %6753 = vmatpush3.bf16.msra.mxu1 %v7041_v3 }
 0x915   : > { %6754 = vmatprep.subr.bf16.mxu1 %v7042_v4 }
 0x918   : > { %6755 = vmatpush3.bf16.msra.mxu1 %v7042_v4 }
 0x919   : > { %6756 = vmatprep.subr.bf16.mxu1 %v7043_v5 }
 0x91c   : > { %6757 = vmatpush3.bf16.msra.mxu1 %v7043_v5  ;;  %v5842_v5 = vld [vmem:[%s8397_s6 + $0x2] ss:$0 sm:$0xff] }
 0x91d   : > { %6758 = vmatprep.subr.bf16.mxu1 %v7044_v6 }
 0x920   : > { %6759 = vmatpush3.bf16.msra.mxu1 %v7044_v6 }
 0x923   : > { %6761 = vmatmul.mubr.bf16.vlgmr.msra.gmra.mrb[36].mxu1 %v7794_v12 }
 0x976   : > { %v6588_v10 = vpop.f32.mrb[20].mxu1 }
 0x977   : > { %v2874_v11 = vpop.f32.mrb[21].mxu1 }
 0x978   : > { %v2893_v13 = vpack.c.bf16 %v6588_v10, %v2874_v11 }
 0x97a   : > { %v6591_v22 = vpop.f32.mrb[22].mxu1  ;;  %6596 = vmatprep.mubr.msk.bf16.mxu0 %vm2020_vm0, %v2893_v13 }
 0x97b   : > { %v2884_v23 = vpop.f32.mrb[23].mxu1 }
 0x97c   : > { %v2894_v24 = vpack.c.bf16 %v6591_v22, %v2884_v23 }
 0x97e   : > { %6597 = vmatmul.mubr.msk.bf16.vlgmr.msra.gmra.mrb[16].mxu0 %vm2020_vm0, %v2894_v24 }
 0x97f   : > { %6601 = vmatpush3.bf16.msra.mxu0 %v7047_v62  ;;  %6604 = vmatprep.mubr.msk.bf16.mxu0 %vm2020_vm0, %v2271_v18  ;;  %v5816_v18 = vld [vmem:[%s7456_s1 + $0x2] ss:$0 sm:$0xff] }
 0x980   : > { %6602 = vmatprep.subr.bf16.mxu0 %v7048_v25 }
 0x983   : > { %6603 = vmatpush3.bf16.msra.mxu0 %v7048_v25 }
 0x984   : > { %6628 = vmatprep.subr.bf16.mxu0 %v7049_v26 }
 0x98a   : > { %6605 = vmatmul.mubr.msk.bf16.vlgmr.msra.gmra.mrb[16].mxu0 %vm2020_vm0, %v2272_v21  ;;  %v7054_v21 = vld [vmem:[%s8391_s10 + $0xa8] sm:$0xff]  }
 0x98b   : > { %6629 = vmatpush3.bf16.msra.mxu0 %v7049_v26  ;;  %6644 = vmatprep.mubr.bf16.mxu0 %v7790_v8 }
 0x98c   : > { %6630 = vmatprep.subr.bf16.mxu0 %v7050_v27 }
 0x98f   : > { %6631 = vmatpush3.bf16.msra.mxu0 %v7050_v27 }
 0x990   : > { %6632 = vmatprep.subr.bf16.mxu0 %v7051_v14 }
 0x993   : > { %6633 = vmatpush3.bf16.msra.mxu0 %v7051_v14 }
 0x994   : > { %6634 = vmatprep.subr.bf16.mxu0 %v7052_v16 }
 0x996   : > { %v6626_v29 = vpop.f32.mrb[24].mxu1 }
 0x997   : > { %v7998_v30 = vadd.f32 %v6626_v29, %v5816_v18  ;;  %v3141_v19 = vpop.f32.mrb[25].mxu1  ;;  %6635 = vmatpush3.bf16.msra.mxu0 %v7052_v16 }
 0x998   : > { %v6627_v20 = vpop.f32.mrb[26].mxu1  ;;  %6636 = vmatprep.subr.bf16.mxu0 %v7053_v28  ;;  %v3142_v36 = vadd.f32 %v5816_v18, %v3141_v19 }
 0x999   : > { %v8001_v31 = vadd.f32 %v6627_v20, %v5816_v18  ;;  %v3144_v32 = vpop.f32.mrb[27].mxu1 }
 0x99a   : > { %v3145_v33 = vadd.f32 %v5816_v18, %v3144_v32 }
 0x99b   : > { %6637 = vmatpush3.bf16.msra.mxu0 %v7053_v28 }
 0x99c   : > { %6638 = vmatprep.subr.bf16.mxu0 %v7054_v21 }
 0x99f   : > { %6639 = vmatpush3.bf16.msra.mxu0 %v7054_v21 }
 0x9a0   : > { %6640 = vmatprep.subr.bf16.mxu0 %v7055_v34 }
 0x9a3   : > { %6641 = vmatpush3.bf16.msra.mxu0 %v7055_v34 }
 0x9a4   : > { %6642 = vmatprep.subr.bf16.mxu0 %v7056_v35 }
 0x9a7   : > { %6643 = vmatpush3.bf16.msra.mxu0 %v7056_v35 }
 0x9aa   : > { %6645 = vmatmul.mubr.bf16.vlgmr.msra.gmra.mrb[20].mxu0 %v7794_v12 }
 0x9ab   : > { %6676 = vmatprep.mubr.msk.f32.mxu0 %vm2020_vm0, %v3142_v36 }
 0x9b6   : > { %v6666_v37 = vpop.f32.mrb[28].mxu1 }
 0x9b7   : > { %v3385_v39 = vpop.f32.mrb[29].mxu1  ;;  %v3394_v41 = vadd.f32 %v6666_v37, %v5868_v38 }
 0x9b8   : > { %v6667_v40 = vpop.f32.mrb[30].mxu1  ;;  %v3386_v45 = vadd.f32 %v5868_v38, %v3385_v39 }
 0x9b9   : > { %v3397_v42 = vadd.f32 %v6667_v40, %v5868_v38  ;;  %v3388_v43 = vpop.f32.mrb[31].mxu1 }
 0x9ba   : > { %v3389_v46 = vadd.f32 %v5868_v38, %v3388_v43 }
 0x9bb   : > { %v6856_v47 = vpack.c.bf16 %v3397_v42, %v3394_v41 }
 0x9bc   : > { %v6852_v48 = vpack.c.bf16 %v3389_v46, %v3386_v45 }
 0x9d6   : > { %v6722_v50 = vpop.f32.mrb[32].mxu1 }
 0x9d7   : > { %v8012_v51 = vadd.f32 %v6722_v50, %v8009_v49  ;;  %v8014_v52 = vpop.f32.mrb[33].mxu1 }
 0x9d8   : > { %v6723_v53 = vpop.f32.mrb[34].mxu1 }
 0x9d9   : > { %v8017_v54 = vadd.f32 %v6723_v53, %v8009_v49  ;;  %v3838_v55 = vpop.f32.mrb[35].mxu1  ;;  %v7057_v53 = vld [vmem:[%s7478_s23 + $0x20] sm:$0xff]  }
 0x9da   : > { %v8020_v56 = vadd.f32 %v8009_v49, %v3838_v55 }
 0x9f6   : > { %v6762_v57 = vpop.f32.mrb[36].mxu1 }
 0x9f7   : > { %v4079_v59 = vpop.f32.mrb[37].mxu1  ;;  %v4088_v61 = vadd.f32 %v6762_v57, %v5966_v58 }
 0x9f8   : > { %v6763_v60 = vpop.f32.mrb[38].mxu1  ;;  %v4080_v0 = vadd.f32 %v5966_v58, %v4079_v59 }
 0x9f9   : > { %v4091_v62 = vadd.f32 %v6763_v60, %v5966_v58  ;;  %v4082_v63 = vpop.f32.mrb[39].mxu1 }
 0x9fa   : > { %v4083_v1 = vadd.f32 %v5966_v58, %v4082_v63 }
 0x9fb   : > { %v8023_v2 = vpack.c.bf16 %v4091_v62, %v4088_v61 }
 0x9fc   : > { %v8025_v3 = vpack.c.bf16 %v4083_v1, %v4080_v0 }
 0xa7d   : > { %v6646_v4 = vpop.f32.mrb[20].mxu0 }
 0xa7e   : > { %v3263_v6 = vpop.f32.mrb[21].mxu0  ;;  %v3272_v11 = vadd.f32 %v6646_v4, %v5842_v5 }
 0xa7f   : > { %v6647_v10 = vpop.f32.mrb[22].mxu0  ;;  %v3264_v23 = vadd.f32 %v5842_v5, %v3263_v6  ;;  %v7058_v6 = vld [vmem:[%s7478_s23 + $0x28] sm:$0xff]  }
 0xa80   : > { %v3275_v13 = vadd.f32 %v6647_v10, %v5842_v5  ;;  %v3266_v22 = vpop.f32.mrb[23].mxu0  ;;  %v7059_v10 = vld [vmem:[%s8391_s10 + $0xc0] sm:$0xff]  }
 0xa81   : > { %v3267_v24 = vadd.f32 %v5842_v5, %v3266_v22 }
 0xa82   : > { %v6846_v25 = vpack.c.bf16 %v3275_v13, %v3272_v11 }
 0xa83   : > { %v6840_v26 = vpack.c.bf16 %v3267_v24, %v3264_v23 }
 0xa85   : > { %6842 = vmatprep.subr.msk.bf16.mxu0 %vm7822_vm1, %v6840_v26 }
 0xa86   : > { %6845 = vmatpush3.bf16.xpose.msk.msra.mxu0 %vm7822_vm1, %v6840_v26  ;;  %v7060_v26 = vld [vmem:[%s8391_s10 + $0xc8] sm:$0xff]  }
 0xa87   : > { %6848 = vmatprep.subr.msk.bf16.mxu0 %vm7822_vm1, %v6846_v25 }
 0xa8e   : > { %6851 = vmatpush3.bf16.xpose.msk.msra.mxu0 %vm7822_vm1, %v6846_v25 }
 0xa8f   : > { %6853 = vmatprep.subr.bf16.mxu0 %v6852_v48 }
 0xa95   : > { %6677 = vmatmul.mubr.msk.f32.vlgmr.msra.gmra.mrb[24].mxu0 %vm2020_vm0, %v3145_v33 }
 0xa96   : > { %6679 = vmatprep.mubr.msk.f32.mxu0 %vm2020_vm0, %v7998_v30  ;;  %6855 = vmatpush3.bf16.msra.mxu0 %v6852_v48 }
 0xa97   : > { %6857 = vmatprep.subr.bf16.mxu0 %v6856_v47 }
 0xa99   : > { %6680 = vmatmul.mubr.msk.f32.gmra.mrb[26].mxu0 %vm2020_vm0, %v8001_v31 }
 0xa9a   : > { %6859 = vmatpush3.bf16.msra.mxu0 %v6856_v47 }
 0xa9b   : > { %6696 = vmatprep.subr.bf16.mxu0 %v7057_v53 }
 0xb68   : > { %v6678_v27 = vpop.f32.mrb[24].mxu0 }
 0xb69   : > { %v3496_v14 = vadd.f32 %v6678_v27, %v7850_v7  ;;  %v3490_v16 = vpop.f32.mrb[25].mxu0  ;;  %v7061_v27 = vld [vmem:[%s8391_s10 + $0xd0] sm:$0xff]  }
 0xb6a   : > { %v3491_v18 = vadd.f32 %v3490_v16, %v7855_v9  ;;  %v7063_v16 = vld [vmem:[%s8391_s10 + $0xe0] sm:$0xff]  }
 0xb6b   : > { %v3512_v28 = vsel %vm2020_vm0, %v3496_v14, -inf }
 0xb6c   : > { %3513 = vmax.xlane.f32.xlu1 %v3512_v28  ;;  %v6681_v29 = vpop.f32.mrb[26].mxu0  ;;  %v3509_v19 = vsel %vm2020_vm0, %v3491_v18, -inf  ;;  %v7065_v28 = vld [vmem:[%s8391_s10 + $0xf0] sm:$0xff]  }
 0xb6d   : > { %v3506_v30 = vadd.f32 %v6681_v29, %v7862_v15  ;;  %v3500_v20 = vpop.f32.mrb[27].mxu0  ;;  %3510 = vmax.xlane.f32.xlu0 %v3509_v19  ;;  %v7066_v29 = vld [vmem:[%s8391_s10 + $0xf8] sm:$0xff]  }
 0xb6e   : > { %v3501_v21 = vadd.f32 %v3500_v20, %v7868_v17 }
 0xb6f   : > { %v3518_v31 = vsel %vm2020_vm0, %v3506_v30, -inf }
 0xb70   : > { %3519 = vmax.xlane.f32.xlu1 %v3518_v31  ;;  %v3515_v7 = vsel %vm2020_vm0, %v3501_v21, -inf }
 0xb71   : > { %3516 = vmax.xlane.f32.xlu0 %v3515_v7 }
 0xbf9   : > { %v3514_v32 = vpop.xlane.xlu1 %3513 }
 0xbfa   : > { %v3522_v9 = vsub.f32 %v3496_v14, %v3514_v32  ;;  %v3511_v33 = vpop.xlane.xlu0 %3510  ;;  %v7062_v14 = vld [vmem:[%s8391_s10 + $0xd8] sm:$0xff]  }
 0xbfb   : > { %v3521_v34 = vsub.f32 %v3491_v18, %v3511_v33  ;;  %v7064_v18 = vld [vmem:[%s8391_s10 + $0xe8] sm:$0xff]   ;;  %s8406_s10 = scalar_lea.vmem %s8334_s16, %s7423_s27  ;;  %s8410_s27 = sld [smem:[#allocation4_spill]] }
 0xbfc   : > { %v3527_v35 = vmul.f32 1.442695, %v3522_v9 }
 0xbfd   : > { %v3525_v36 = vmul.f32 1.442695, %v3521_v34  ;;  %v3520_v37 = vpop.xlane.xlu1 %3519 }
 0xbfe   : > { %7189 = vpow2.f32 %v3527_v35  ;;  %v3524_v38 = vsub.f32 %v3506_v30, %v3520_v37  ;;  %v3517_v15 = vpop.xlane.xlu0 %3516  ;;  %v5940_v30 = vld [vmem:[%s8397_s6 + $0x3] ss:$0 sm:$0xff] }
 0xbff   : > { %7191 = vpow2.f32 %v3525_v36  ;;  %v3523_v39 = vsub.f32 %v3501_v21, %v3517_v15  ;;  %v7264_v15 = vld [vmem:[%s8402_s29 + $0x10] sm:$0xff] }
 0xc00   : > { %v3531_v40 = vmul.f32 1.442695, %v3524_v38 }
 0xc01   : > { %v3529_v17 = vmul.f32 1.442695, %v3523_v39  ;;  %p6065_p5 = scmp.ne.s32.totalorder %s8410_s27, 1 }
 0xc02   : > { %7193 = vpow2.f32 %v3531_v40  ;;  %s8412_s3 = sld [smem:[#allocation23_spill]] (!%p6065_p5)  ;;  %s8413_s26 = sld [smem:[#allocation24_spill]] (!%p6065_p5) }
 0xc03   : > { %7195 = vpow2.f32 %v3529_v17 }
 0xc08   : > { %v7190_v41 = vpop.eup %7189 }
 0xc09   : > { %v7192_v42 = vpop.eup %7191  ;;  %v3536_v43 = vsel %vm2020_vm0, %v7190_v41, 0.0 }
 0xc0a   : > { %3537 = vadd.xlane.f32.xlu1 %v3536_v43  ;;  %v3533_v45 = vsel %vm2020_vm0, %v7192_v42, 0.0 }
 0xc0b   : > { %3534 = vadd.xlane.f32.xlu0 %v3533_v45 }
 0xc0c   : > { %v7194_v46 = vpop.eup %7193 }
 0xc0d   : > { %v7196_v47 = vpop.eup %7195  ;;  %v3542_v48 = vsel %vm2020_vm0, %v7194_v46, 0.0 }
 0xc0e   : > { %3543 = vadd.xlane.f32.xlu1 %v3542_v48  ;;  %v3539_v50 = vsel %vm2020_vm0, %v7196_v47, 0.0 }
 0xc0f   : > { %3540 = vadd.xlane.f32.xlu0 %v3539_v50 }
 0xc97   : > { %v3538_v55 = vpop.xlane.xlu1 %3537 }
 0xc98   : > { %7197 = vrcp.f32 %v3538_v55  ;;  %v3535_v57 = vpop.xlane.xlu0 %3534 }
 0xc99   : > { %7199 = vrcp.f32 %v3535_v57 }
 0xc9b   : > { %v3544_v58 = vpop.xlane.xlu1 %3543 }
 0xc9c   : > { %7201 = vrcp.f32 %v3544_v58  ;;  %v3541_v59 = vpop.xlane.xlu0 %3540 }
 0xc9d   : > { %7203 = vrcp.f32 %v3541_v59 }
 0xca2   : > { %v7198_v60 = vpop.eup %7197 }
 0xca3   : > { %v7200_v61 = vpop.eup %7199  ;;  %v3550_v63 = vmul.f32 %v7198_v60, %v7190_v41 }
 0xca4   : > { %v3549_v62 = vmul.f32 %v7200_v61, %v7192_v42 }
 0xca6   : > { %v7202_v0 = vpop.eup %7201  ;;  %6690 = vmatprep.mubr.msk.f32.mxu0 %vm2020_vm0, %v3549_v62 }
 0xca7   : > { %v7204_v1 = vpop.eup %7203  ;;  %6691 = vmatmul.mubr.msk.f32.vlgmr.msra.gmra.mrb[28].mxu0 %vm2020_vm0, %v3550_v63  ;;  %v3552_v5 = vmul.f32 %v7202_v0, %v7194_v46 }
 0xca8   : > { %v3551_v4 = vmul.f32 %v7204_v1, %v7196_v47  ;;  %6697 = vmatpush3.bf16.msra.mxu0 %v7057_v53 }
 0xca9   : > { %6698 = vmatprep.subr.bf16.mxu0 %v7058_v6 }
 0xcaa   : > { %6693 = vmatprep.mubr.msk.f32.mxu0 %vm2020_vm0, %v3551_v4 }
 0xcab   : > { %6694 = vmatmul.mubr.msk.f32.gmra.mrb[30].mxu0 %vm2020_vm0, %v3552_v5  ;;  %v7067_v5 = vld [vmem:[%s7478_s23 + $0x30] sm:$0xff]  }
 0xcac   : > { %6699 = vmatpush3.bf16.msra.mxu0 %v7058_v6 }
 0xcad   : > { %6724 = vmatprep.subr.bf16.mxu0 %v7059_v10 }
 0xd7a   : > { %v6692_v11 = vpop.f32.mrb[28].mxu0 }
 0xd7b   : > { %v3631_v13 = vpop.f32.mrb[29].mxu0 }
 0xd7c   : > { %v3650_v22 = vpack.c.bf16 %v6692_v11, %v3631_v13 }
 0xd7e   : > { %v6695_v23 = vpop.f32.mrb[30].mxu0  ;;  %6700 = vmatprep.mubr.msk.bf16.mxu0 %vm2020_vm0, %v3650_v22 }
 0xd7f   : > { %v3641_v24 = vpop.f32.mrb[31].mxu0 }
 0xd80   : > { %v3651_v25 = vpack.c.bf16 %v6695_v23, %v3641_v24 }
 0xd82   : > { %6701 = vmatmul.mubr.msk.bf16.vlgmr.msra.gmra.mrb[16].mxu0 %vm2020_vm0, %v3651_v25 }
 0xd83   : > { %6725 = vmatpush3.bf16.msra.mxu0 %v7059_v10  ;;  %6740 = vmatprep.mubr.bf16.mxu0 %v7790_v8  ;;  %v3836_v8 = vadd.f32 %v8009_v49, %v8014_v52 }
 0xd84   : > { %6726 = vmatprep.subr.bf16.mxu0 %v7060_v26 }
 0xd87   : > { %6727 = vmatpush3.bf16.msra.mxu0 %v7060_v26 }
 0xd88   : > { %6728 = vmatprep.subr.bf16.mxu0 %v7061_v27 }
 0xd8b   : > { %6729 = vmatpush3.bf16.msra.mxu0 %v7061_v27 }
 0xd8c   : > { %6730 = vmatprep.subr.bf16.mxu0 %v7062_v14 }
 0xd8f   : > { %6731 = vmatpush3.bf16.msra.mxu0 %v7062_v14 }
 0xd90   : > { %6732 = vmatprep.subr.bf16.mxu0 %v7063_v16 }
 0xd93   : > { %6733 = vmatpush3.bf16.msra.mxu0 %v7063_v16 }
 0xd94   : > { %6734 = vmatprep.subr.bf16.mxu0 %v7064_v18 }
 0xd97   : > { %6735 = vmatpush3.bf16.msra.mxu0 %v7064_v18  ;;  %v7068_v18 = vld [vmem:[%s7478_s23 + $0x38] sm:$0xff]  }
 0xd98   : > { %6736 = vmatprep.subr.bf16.mxu0 %v7065_v28 }
 0xd9b   : > { %6737 = vmatpush3.bf16.msra.mxu0 %v7065_v28 }
 0xd9c   : > { %6738 = vmatprep.subr.bf16.mxu0 %v7066_v29 }
 0xd9f   : > { %6739 = vmatpush3.bf16.msra.mxu0 %v7066_v29 }
 0xda2   : > { %6741 = vmatmul.mubr.bf16.vlgmr.msra.gmra.mrb[32].mxu0 %v7794_v12 }
 0xda3   : > { %6772 = vmatprep.mubr.msk.f32.mxu0 %vm2020_vm0, %v3836_v8 }
 0xe75   : > { %v6742_v19 = vpop.f32.mrb[32].mxu0 }
 0xe76   : > { %v3957_v20 = vpop.f32.mrb[33].mxu0  ;;  %v3966_v31 = vadd.f32 %v6742_v19, %v5940_v30 }
 0xe77   : > { %v6743_v21 = vpop.f32.mrb[34].mxu0  ;;  %v3958_v9 = vadd.f32 %v5940_v30, %v3957_v20 }
 0xe78   : > { %v3969_v7 = vadd.f32 %v6743_v21, %v5940_v30  ;;  %v3960_v32 = vpop.f32.mrb[35].mxu0  ;;  %v5995_v21 = vld [vmem:[%s8403_s25] ss:$0 sm:$0xff] }
 0xe79   : > { %v3961_v33 = vadd.f32 %v5940_v30, %v3960_v32 }
 0xe7a   : > { %v6866_v34 = vpack.c.bf16 %v3969_v7, %v3966_v31  ;;  %v5996_v7 = vld [vmem:[%s8404_s30] ss:$0 sm:$0xff] }
 0xe7b   : > { %v6860_v35 = vpack.c.bf16 %v3961_v33, %v3958_v9 }
 0xe7d   : > { %6862 = vmatprep.subr.msk.bf16.mxu0 %vm7822_vm1, %v6860_v35 }
 0xe7e   : > { %6865 = vmatpush3.bf16.xpose.msk.msra.mxu0 %vm7822_vm1, %v6860_v35 }
 0xe7f   : > { %6868 = vmatprep.subr.msk.bf16.mxu0 %vm7822_vm1, %v6866_v34 }
 0xe86   : > { %6871 = vmatpush3.bf16.xpose.msk.msra.mxu0 %vm7822_vm1, %v6866_v34 }
 0xe87   : > { %6873 = vmatprep.subr.bf16.mxu0 %v8025_v3 }
 0xe8d   : > { %6773 = vmatmul.mubr.msk.f32.vlgmr.msra.gmra.mrb[36].mxu0 %vm2020_vm0, %v8020_v56 }
 0xe8e   : > { %6775 = vmatprep.mubr.msk.f32.mxu0 %vm2020_vm0, %v8012_v51  ;;  %6875 = vmatpush3.bf16.msra.mxu0 %v8025_v3  ;;  %v7262_v51 = vld [vmem:[%s8402_s29] sm:$0xff] }
 0xe8f   : > { %6877 = vmatprep.subr.bf16.mxu0 %v8023_v2 }
 0xe91   : > { %6776 = vmatmul.mubr.msk.f32.gmra.mrb[38].mxu0 %vm2020_vm0, %v8017_v54 }
 0xe92   : > { %6879 = vmatpush3.bf16.msra.mxu0 %v8023_v2  ;;  %v7263_v2 = vld [vmem:[%s8402_s29 + $0x18] sm:$0xff] }
 0xe93   : > { %6792 = vmatprep.subr.bf16.mxu0 %v7067_v5 }
 0xf60   : > { %v6774_v12 = vpop.f32.mrb[36].mxu0 }
 0xf61   : > { %v4190_v49 = vadd.f32 %v7261_v44, %v6774_v12  ;;  %v4184_v52 = vpop.f32.mrb[37].mxu0 }
 0xf62   : > { %v4185_v56 = vadd.f32 %v7262_v51, %v4184_v52 }
 0xf63   : > { %v4206_v3 = vsel %vm2020_vm0, %v4190_v49, -inf }
 0xf64   : > { %4207 = vmax.xlane.f32.xlu1 %v4206_v3  ;;  %v6777_v36 = vpop.f32.mrb[38].mxu0  ;;  %v4203_v54 = vsel %vm2020_vm0, %v4185_v56, -inf }
 0xf65   : > { %v4200_v37 = vadd.f32 %v7263_v2, %v6777_v36  ;;  %v4194_v38 = vpop.f32.mrb[39].mxu0  ;;  %4204 = vmax.xlane.f32.xlu0 %v4203_v54  ;;  %v7266_v54 = vld [vmem:[#allocation2 + $0x8] sm:$0xff] }
 0xf66   : > { %v4195_v39 = vadd.f32 %v7264_v15, %v4194_v38  ;;  %v7268_v15 = vld [vmem:[#allocation2 + $0x18] sm:$0xff] }
 0xf67   : > { %v4212_v40 = vsel %vm2020_vm0, %v4200_v37, -inf }
 0xf68   : > { %4213 = vmax.xlane.f32.xlu1 %v4212_v40  ;;  %v4209_v17 = vsel %vm2020_vm0, %v4195_v39, -inf  ;;  %v7069_v40 = vld [vmem:[%s7495_s0] ss:$16 sps:$4 sm:$0xff]  }
 0xf69   : > { %4210 = vmax.xlane.f32.xlu0 %v4209_v17  ;;  %v7071_v17 = vld [vmem:[%s7495_s0 + $0x4] ss:$16 sps:$4 sm:$0xff]  }
 0xf6a   : > { %4730 = vmatprep.subr.bf16.mxu1 %v7071_v17 }
 0xf6b   : > { %4731 = vmatpush1.bf16.msra.mxu1 %v7069_v40 }
 0xff1   : > { %v4208_v41 = vpop.xlane.xlu1 %4207 }
 0xff2   : > { %v4216_v42 = vsub.f32 %v4190_v49, %v4208_v41  ;;  %v4205_v43 = vpop.xlane.xlu0 %4204  ;;  %v7072_v41 = vld [vmem:[%s7495_s0 + $0x8] ss:$16 sps:$4 sm:$0xff]  }
 0xff3   : > { %v4215_v45 = vsub.f32 %v4185_v56, %v4205_v43  ;;  %v7265_v56 = vld [vmem:[#allocation2] sm:$0xff] }
 0xff4   : > { %v4221_v46 = vmul.f32 1.442695, %v4216_v42  ;;  %v7074_v42 = vld [vmem:[%s7495_s0 + $0xc] ss:$16 sps:$4 sm:$0xff]   ;;  %v7077_v43 = vld [vmem:[%s7495_s0 + $0x24] ss:$16 sps:$4 sm:$0xff]  }
 0xff5   : > { %v4219_v47 = vmul.f32 1.442695, %v4215_v45  ;;  %v4214_v48 = vpop.xlane.xlu1 %4213  ;;  %v7080_v45 = vld [vmem:[%s7495_s0 + $0x2c] ss:$16 sps:$4 sm:$0xff]   ;;  %4732 = vmatprep.subr.bf16.mxu1 %v7077_v43  ;;  %v5997_v43 = vld [vmem:[%s8405_s28] ss:$0 sm:$0xff] }
 0xff6   : > { %7205 = vpow2.f32 %v4221_v46  ;;  %v4218_v50 = vsub.f32 %v4200_v37, %v4214_v48  ;;  %v4211_v53 = vpop.xlane.xlu0 %4210  ;;  %v7267_v37 = vld [vmem:[#allocation2 + $0x10] sm:$0xff] }
 0xff7   : > { %7207 = vpow2.f32 %v4219_v47  ;;  %v4217_v55 = vsub.f32 %v4195_v39, %v4211_v53  ;;  %v7075_v46 = vld [vmem:[%s7495_s0 + $0x20] ss:$16 sps:$4 sm:$0xff]   ;;  %v7078_v47 = vld [vmem:[%s7495_s0 + $0x28] ss:$16 sps:$4 sm:$0xff]  }
 0xff8   : > { %v4225_v57 = vmul.f32 1.442695, %v4218_v50  ;;  %4733 = vmatpush1.bf16.msra.mxu1 %v7075_v46 }
 0xff9   : > { %v4223_v58 = vmul.f32 1.442695, %v4217_v55 }
 0xffa   : > { %7209 = vpow2.f32 %v4225_v57 }
 0xffb   : > { %7211 = vpow2.f32 %v4223_v58 }
0x1000   : > { %v7206_v59 = vpop.eup %7205 }
0x1001   : > { %v7208_v60 = vpop.eup %7207  ;;  %v4230_v61 = vsel %vm2020_vm0, %v7206_v59, 0.0 }
0x1002   : > { %4231 = vadd.xlane.f32.xlu1 %v4230_v61  ;;  %v4227_v62 = vsel %vm2020_vm0, %v7208_v60, 0.0 }
0x1003   : > { %4228 = vadd.xlane.f32.xlu0 %v4227_v62 }
0x1004   : > { %v7210_v63 = vpop.eup %7209 }
0x1005   : > { %v7212_v0 = vpop.eup %7211  ;;  %v4236_v1 = vsel %vm2020_vm0, %v7210_v63, 0.0 }
0x1006   : > { %4237 = vadd.xlane.f32.xlu1 %v4236_v1  ;;  %v4233_v4 = vsel %vm2020_vm0, %v7212_v0, 0.0 }
0x1007   : > { %4234 = vadd.xlane.f32.xlu0 %v4233_v4 }
0x108f   : > { %v4232_v6 = vpop.xlane.xlu1 %4231 }
0x1090   : > { %7213 = vrcp.f32 %v4232_v6  ;;  %v4229_v10 = vpop.xlane.xlu0 %4228 }
0x1091   : > { %7215 = vrcp.f32 %v4229_v10  ;;  %v7083_v10 = vld [vmem:[%s7495_s0 + $0x44] ss:$16 sps:$4 sm:$0xff]  }
0x1092   : > { %4734 = vmatprep.subr.bf16.mxu1 %v7083_v10  ;;  %v7122_v10 = vld [vmem:[%s7504_s4 + $0xc8] sm:$0xff]  }
0x1093   : > { %v4238_v11 = vpop.xlane.xlu1 %4237 }
0x1094   : > { %7217 = vrcp.f32 %v4238_v11  ;;  %v4235_v13 = vpop.xlane.xlu0 %4234  ;;  %v7086_v11 = vld [vmem:[%s7495_s0 + $0x4c] ss:$16 sps:$4 sm:$0xff]  }
0x1095   : > { %7219 = vrcp.f32 %v4235_v13  ;;  %v7081_v13 = vld [vmem:[%s7495_s0 + $0x40] ss:$16 sps:$4 sm:$0xff]  }
0x1096   : > { %4735 = vmatpush1.bf16.msra.mxu1 %v7081_v13 }
0x109a   : > { %v7214_v22 = vpop.eup %7213 }
0x109b   : > { %v7216_v23 = vpop.eup %7215  ;;  %v4244_v25 = vmul.f32 %v7214_v22, %v7206_v59  ;;  %v7084_v22 = vld [vmem:[%s7495_s0 + $0x48] ss:$16 sps:$4 sm:$0xff]  }
0x109c   : > { %v4243_v24 = vmul.f32 %v7216_v23, %v7208_v60  ;;  %v7089_v23 = vld [vmem:[%s7495_s0 + $0x64] ss:$16 sps:$4 sm:$0xff]  }
0x109d   : > { %4736 = vmatprep.subr.bf16.mxu1 %v7089_v23 }
0x109e   : > { %v7218_v26 = vpop.eup %7217  ;;  %6786 = vmatprep.mubr.msk.f32.mxu0 %vm2020_vm0, %v4243_v24  ;;  %v7092_v24 = vld [vmem:[%s7495_s0 + $0x6c] ss:$16 sps:$4 sm:$0xff]  }
0x109f   : > { %v7220_v27 = vpop.eup %7219  ;;  %6787 = vmatmul.mubr.msk.f32.vlgmr.msra.gmra.mrb[40].mxu0 %vm2020_vm0, %v4244_v25  ;;  %v4246_v16 = vmul.f32 %v7218_v26, %v7210_v63  ;;  %v7087_v25 = vld [vmem:[%s7495_s0 + $0x60] ss:$16 sps:$4 sm:$0xff]   ;;  %v7090_v26 = vld [vmem:[%s7495_s0 + $0x68] ss:$16 sps:$4 sm:$0xff]  }
0x10a0   : > { %v4245_v14 = vmul.f32 %v7220_v27, %v7212_v0  ;;  %6793 = vmatpush3.bf16.msra.mxu0 %v7067_v5  ;;  %4737 = vmatpush1.bf16.msra.mxu1 %v7087_v25  ;;  %v7095_v27 = vld [vmem:[%s7495_s0 + $0x84] ss:$16 sps:$4 sm:$0xff]  }
0x10a1   : > { %6794 = vmatprep.subr.bf16.mxu0 %v7068_v18  ;;  %4738 = vmatprep.subr.bf16.mxu1 %v7095_v27  ;;  %v7126_v25 = vld [vmem:[%s7504_s4 + $0xd0] sm:$0xff]  }
0x10a2   : > { %6789 = vmatprep.mubr.msk.f32.mxu0 %vm2020_vm0, %v4245_v14  ;;  %v7098_v14 = vld [vmem:[%s7495_s0 + $0x8c] ss:$16 sps:$4 sm:$0xff]   ;;  %v7128_v27 = vld [vmem:[%s7504_s4 + $0x90] sm:$0xff]  }
0x10a3   : > { %6790 = vmatmul.mubr.msk.f32.gmra.mrb[42].mxu0 %vm2020_vm0, %v4246_v16  ;;  %v7093_v16 = vld [vmem:[%s7495_s0 + $0x80] ss:$16 sps:$4 sm:$0xff]  }
0x10a4   : > { %6795 = vmatpush3.bf16.msra.mxu0 %v7068_v18  ;;  %v7096_v18 = vld [vmem:[%s7495_s0 + $0x88] ss:$16 sps:$4 sm:$0xff]   ;;  %4739 = vmatpush1.bf16.msra.mxu1 %v7093_v16 }
0x10a5   : > { %4783 = vmatprep.subr.bf16.mxu0 %v7074_v42  ;;  %v7130_v16 = vld [vmem:[%s7504_s4 + $0xd8] sm:$0xff]  }
0x1172   : > { %v6788_v28 = vpop.f32.mrb[40].mxu0 }
0x1173   : > { %v4325_v29 = vpop.f32.mrb[41].mxu0 }
0x1174   : > { %v4344_v8 = vpack.c.bf16 %v6788_v28, %v4325_v29  ;;  %v7101_v28 = vld [vmem:[%s7495_s0 + $0xa4] ss:$16 sps:$4 sm:$0xff]   ;;  %v7104_v29 = vld [vmem:[%s7495_s0 + $0xac] ss:$16 sps:$4 sm:$0xff]  }
0x1175   : > { %4740 = vmatprep.subr.bf16.mxu1 %v7101_v28  ;;  %v7132_v28 = vld [vmem:[%s7504_s4 + $0x98] sm:$0xff]  }
0x1176   : > { %v6791_v19 = vpop.f32.mrb[42].mxu0  ;;  %6796 = vmatprep.mubr.msk.bf16.mxu0 %vm2020_vm0, %v4344_v8  ;;  %v7099_v8 = vld [vmem:[%s7495_s0 + $0xa0] ss:$16 sps:$4 sm:$0xff]  }
0x1177   : > { %v4335_v30 = vpop.f32.mrb[43].mxu0  ;;  %4741 = vmatpush1.bf16.msra.mxu1 %v7099_v8  ;;  %v7134_v8 = vld [vmem:[%s7504_s4 + $0xe0] sm:$0xff]  }
0x1178   : > { %v4345_v20 = vpack.c.bf16 %v6791_v19, %v4335_v30  ;;  %v7102_v19 = vld [vmem:[%s7495_s0 + $0xa8] ss:$16 sps:$4 sm:$0xff]   ;;  %v7107_v30 = vld [vmem:[%s7495_s0 + $0xc4] ss:$16 sps:$4 sm:$0xff]  }
0x1179   : > { %4742 = vmatprep.subr.bf16.mxu1 %v7107_v30  ;;  %v7136_v30 = vld [vmem:[%s7504_s4 + $0xa0] sm:$0xff]  }
0x117a   : > { %6797 = vmatmul.mubr.msk.bf16.vlgmr.msra.gmra.mrb[16].mxu0 %vm2020_vm0, %v4345_v20  ;;  %v7110_v20 = vld [vmem:[%s7495_s0 + $0xcc] ss:$16 sps:$4 sm:$0xff]  }
0x117b   : > { %4784 = vmatpush1.bf16.msra.mxu0 %v7072_v41 }
0x117c   : > { %4785 = vmatprep.subr.bf16.mxu0 %v7080_v45 }
0x117f   : > { %4786 = vmatpush1.bf16.msra.mxu0 %v7078_v47 }
0x1180   : > { %4787 = vmatprep.subr.bf16.mxu0 %v7086_v11 }
0x1183   : > { %4788 = vmatpush1.bf16.msra.mxu0 %v7084_v22 }
0x1184   : > { %4789 = vmatprep.subr.bf16.mxu0 %v7092_v24  ;;  %v7125_v24 = vld [vmem:[%s7504_s4 + $0x50] sm:$0xff]  }
0x1187   : > { %4790 = vmatpush1.bf16.msra.mxu0 %v7090_v26  ;;  %v7127_v26 = vld [vmem:[%s7504_s4 + $0x10] sm:$0xff]  }
0x1188   : > { %4791 = vmatprep.subr.bf16.mxu0 %v7098_v14  ;;  %v7129_v14 = vld [vmem:[%s7504_s4 + $0x58] sm:$0xff]  }
0x118b   : > { %4792 = vmatpush1.bf16.msra.mxu0 %v7096_v18  ;;  %v7131_v18 = vld [vmem:[%s7504_s4 + $0x18] sm:$0xff]  }
0x118c   : > { %4793 = vmatprep.subr.bf16.mxu0 %v7104_v29  ;;  %v7133_v29 = vld [vmem:[%s7504_s4 + $0x60] sm:$0xff]  }
0x118f   : > { %4794 = vmatpush1.bf16.msra.mxu0 %v7102_v19  ;;  %v7135_v19 = vld [vmem:[%s7504_s4 + $0x20] sm:$0xff]  }
0x1190   : > { %4795 = vmatprep.subr.bf16.mxu0 %v7110_v20  ;;  %v7137_v20 = vld [vmem:[%s7504_s4 + $0x68] sm:$0xff]  }
0x124d   : > { %v6798_v31 = vpop.f32.mrb[16].mxu0 }
0x124e   : > { %v4403_v32 = vpop.f32.mrb[17].mxu0  ;;  %v4432_v9 = vadd.f32 %v6798_v31, %v5995_v21  ;;  %v7108_v31 = vld [vmem:[%s7495_s0 + $0xc8] ss:$16 sps:$4 sm:$0xff]  }
0x124f   : > { %v4430_v33 = vadd.f32 %v5995_v21, %v4403_v32  ;;  %v6799_v34 = vpop.f32.mrb[18].mxu0  ;;  %v7113_v32 = vld [vmem:[%s7495_s0 + $0xe4] ss:$16 sps:$4 sm:$0xff]   ;;  %4796 = vmatpush1.bf16.msra.mxu0 %v7108_v31  ;;  %v7139_v31 = vld [vmem:[%s7504_s4 + $0x28] sm:$0xff]  }
0x1250   : > { %v4406_v35 = vpop.f32.mrb[19].mxu0  ;;  %v4433_v44 = vadd.f32 %v6799_v34, %v5995_v21  ;;  %v4442_v52 = vmul.f32 %v5996_v7, %v4432_v9  ;;  %v7114_v9 = vld [vmem:[%s7495_s0 + $0xe8] ss:$16 sps:$4 sm:$0xff]   ;;  %v7285_v34 = vmov 0  }
0x1251   : > { %v4440_v12 = vmul.f32 %v5996_v7, %v4430_v33  ;;  %v4431_v49 = vadd.f32 %v5995_v21, %v4406_v35  ;;  %v7105_v21 = vld [vmem:[%s7495_s0 + $0xc0] ss:$16 sps:$4 sm:$0xff]   ;;  %v7116_v33 = vld [vmem:[%s7495_s0 + $0xec] ss:$16 sps:$4 sm:$0xff]   ;;  %4762 = vmatprep.mubr.bf16.mxu1 %v7285_v34  ;;  %4815 = vmatprep.mubr.bf16.mxu0 %v7285_v34 }
0x1252   : > { %v4443_v36 = vmul.f32 %v5996_v7, %v4433_v44  ;;  %v8137_v38 = vadd.f32 %v7267_v37, %v4442_v52  ;;  %4743 = vmatpush1.bf16.msra.mxu1 %v7105_v21  ;;  %4797 = vmatprep.subr.bf16.mxu0 %v7116_v33  ;;  %v7117_v35 = vld [vmem:[%s7504_s4 + $0x40] sm:$0xff]   ;;  %v7138_v21 = vld [vmem:[%s7504_s4 + $0xe8] sm:$0xff]   ;;  %v7143_v33 = vld [vmem:[%s7504_s4 + $0x30] sm:$0xff]  }
0x1253   : > { %v4441_v51 = vmul.f32 %v5996_v7, %v4431_v49  ;;  %v8131_v3 = vadd.f32 %v7265_v56, %v4440_v12  ;;  %v7111_v7 = vld [vmem:[%s7495_s0 + $0xe0] ss:$16 sps:$4 sm:$0xff]   ;;  %4744 = vmatprep.subr.bf16.mxu1 %v7113_v32  ;;  %4798 = vmatpush1.bf16.msra.mxu0 %v7114_v9  ;;  %s8411_s0 = sld [smem:[#allocation22_spill]] (!%p6065_p5) }
0x1254   : > { %v8140_v39 = vadd.f32 %v7268_v15, %v4443_v36  ;;  %v7118_v12 = vld [vmem:[%s7504_s4 + $0xc0] sm:$0xff]   ;;  %v7141_v32 = vld [vmem:[%s7504_s4 + $0x70] sm:$0xff]  }
0x1255   : > { %4450 = vadd.xlane.f32.xlu0 %v8131_v3  ;;  %v8134_v2 = vadd.f32 %v7266_v54, %v4441_v51  ;;  %6388 = vmatprep.subr.bf16.mxu0 %v7118_v12  ;;  %v7142_v9 = vld [vmem:[%s7504_s4 + $0xf0] sm:$0xff]   ;;  %v7146_v12 = vld [vmem:[%s7504_s4 + $0xf8] sm:$0xff]  }
0x1256   : > { %4745 = vmatpush1.bf16.msra.mxu1 %v7111_v7  ;;  %v7140_v7 = vld [vmem:[%s7504_s4 + $0xa8] sm:$0xff]  }
0x1257   : > { %4452 = vadd.xlane.f32.xlu1 %v8134_v2  ;;  %6360 = vmatprep.subr.bf16.mxu1 %v7117_v35  ;;  %v7145_v35 = vld [vmem:[%s7504_s4 + $0x78] sm:$0xff]  }
0x1259   : > { %4454 = vadd.xlane.f32.xlu0 %v8137_v38 }
0x125b   : > { %4456 = vadd.xlane.f32.xlu1 %v8140_v39 }
0x12e2   : > { %v4451_v48 = vpop.xlane.xlu0 %4450 }
0x12e3   : > { %v4458_v50 = vmul.f32 0.0078125, %v4451_v48 }
0x12e4   : > { %v4453_v53 = vpop.xlane.xlu1 %4452 }
0x12e5   : > { %v8152_v55 = vsub.f32 %v8131_v3, %v4458_v50  ;;  %v4459_v57 = vmul.f32 0.0078125, %v4453_v53  ;;  %v5998_v53 = vld [vmem:[%s8406_s10] ss:$0 sm:$0xff] }
0x12e6   : > { %v4455_v58 = vpop.xlane.xlu0 %4454 }
0x12e7   : > { %v8155_v59 = vsub.f32 %v8134_v2, %v4459_v57  ;;  %v4460_v60 = vmul.f32 0.0078125, %v4455_v58  ;;  %v4466_v61 = vmul.f32 %v8152_v55, %v8152_v55 }
0x12e8   : > { %v4457_v62 = vpop.xlane.xlu1 %4456 }
0x12e9   : > { %v8160_v63 = vsub.f32 %v8137_v38, %v4460_v60  ;;  %v4461_v0 = vmul.f32 0.0078125, %v4457_v62  ;;  %4470 = vadd.xlane.f32.xlu0 %v4466_v61  ;;  %v4467_v1 = vmul.f32 %v8155_v59, %v8155_v59 }
0x12eb   : > { %v8165_v4 = vsub.f32 %v8140_v39, %v4461_v0  ;;  %4472 = vadd.xlane.f32.xlu1 %v4467_v1  ;;  %v4468_v5 = vmul.f32 %v8160_v63, %v8160_v63 }
0x12ed   : > { %4474 = vadd.xlane.f32.xlu0 %v4468_v5  ;;  %v4469_v6 = vmul.f32 %v8165_v4, %v8165_v4  ;;  %v7120_v5 = vld [vmem:[%s7504_s4 + $0x80] sm:$0xff]  }
0x12ef   : > { %4476 = vadd.xlane.f32.xlu1 %v4469_v6  ;;  %v7121_v6 = vld [vmem:[%s7504_s4 + $0x48] sm:$0xff]  }
0x1376   : > { %v4471_v44 = vpop.xlane.xlu0 %4470 }
0x1377   : > { %v4478_v49 = vmul.f32 0.0078125, %v4471_v44  ;;  %v7147_v44 = vld [vmem:[%s7504_s4 + $0x38] sm:$0xff]  }
0x1378   : > { %v4473_v52 = vpop.xlane.xlu1 %4472 }
0x1379   : > { %v4482_v51 = vadd.f32 1e-06, %v4478_v49  ;;  %v4479_v56 = vmul.f32 0.0078125, %v4473_v52  ;;  %v7148_v49 = vld [vmem:[%s7504_s4 + $0xb8] sm:$0xff]   ;;  %v4550_v52 = vlaneseq }
0x137a   : > { %v4475_v36 = vpop.xlane.xlu0 %4474 }
0x137b   : > { %7221 = vrsqrt.f32 %v4482_v51  ;;  %v4483_v54 = vadd.f32 1e-06, %v4479_v56  ;;  %v4480_v37 = vmul.f32 0.0078125, %v4475_v36  ;;  %v4551_v51 = vshrl.u32 %v4550_v52, 7 }
0x137c   : > { %v4477_v15 = vpop.xlane.xlu1 %4476 }
0x137d   : > { %7223 = vrsqrt.f32 %v4483_v54  ;;  %v4484_v40 = vadd.f32 1e-06, %v4480_v37  ;;  %v4481_v17 = vmul.f32 0.0078125, %v4477_v15  ;;  %v4552_v56 = vsub.s32 0, %v4551_v51  ;;  %v4548_v54 = vld [vmem:[%s8407_s11] sm:$0xf] }
0x137e   : > { %v4560_v36 = vsub.s32 2, %v4551_v51  ;;  %v4556_v37 = vsub.s32 1, %v4551_v51  ;;  %v4564_v15 = vsub.s32 3, %v4551_v51 }
0x137f   : > { %7225 = vrsqrt.f32 %v4484_v40  ;;  %v4485_v41 = vadd.f32 1e-06, %v4481_v17  ;;  %v4553_v40 = vrot.slane %v4548_v54, %v4552_v56 }
0x1380   : > { %v4561_v17 = vrot.slane %v4548_v54, %v4560_v36 }
0x1381   : > { %7227 = vrsqrt.f32 %v4485_v41  ;;  %v4557_v41 = vrot.slane %v4548_v54, %v4556_v37 }
0x1385   : > { %v7222_v42 = vpop.eup %7221 }
0x1386   : > { %v4490_v45 = vmul.f32 %v7222_v42, %v8152_v55  ;;  %v4565_v42 = vrot.slane %v4548_v54, %v4564_v15 }
0x1387   : > { %v7224_v46 = vpop.eup %7223 }
0x1388   : > { %v4491_v47 = vmul.f32 %v7224_v46, %v8155_v59  ;;  %v4500_v48 = vmul.f32 %v5997_v43, %v4490_v45  ;;  %v7119_v59 = vld [vmem:[%s7504_s4] sm:$0xff]  }
0x1389   : > { %v7226_v50 = vpop.eup %7225 }
0x138a   : > { %v4501_v57 = vmul.f32 %v5997_v43, %v4491_v47  ;;  %v4510_v60 = vadd.f32 %v5998_v53, %v4500_v48  ;;  %v4492_v62 = vmul.f32 %v7226_v50, %v8160_v63  ;;  %v7123_v63 = vld [vmem:[%s7504_s4 + $0x8] sm:$0xff]  }
0x138b   : > { %v7228_v58 = vpop.eup %7227 }
0x138c   : > { %v4511_v61 = vadd.f32 %v5998_v53, %v4501_v57  ;;  %v4493_v55 = vmul.f32 %v7228_v58, %v8165_v4  ;;  %v4502_v11 = vmul.f32 %v5997_v43, %v4492_v62  ;;  %v7124_v4 = vld [vmem:[%s7504_s4 + $0x88] sm:$0xff]  }
0x138e   : > { %v4514_v0 = vpack.c.bf16 %v4511_v61, %v4510_v60  ;;  %v4503_v1 = vmul.f32 %v5997_v43, %v4493_v55  ;;  %v4512_v22 = vadd.f32 %v5998_v53, %v4502_v11 }
0x1390   : > { %4763 = vmatmul.mubr.bf16.vlgmr.msra.gmra.mrb[40].mxu1 %v4514_v0  ;;  %4816 = vmatmul.mubr.bf16.vlgmr.msra.gmra.mrb[44].mxu0 %v4514_v0  ;;  %v4513_v13 = vadd.f32 %v5998_v53, %v4503_v1 }
0x1391   : > { %4772 = vmatprep.mubr.bf16.mxu1 %v7285_v34  ;;  %4825 = vmatprep.mubr.bf16.mxu0 %v7285_v34  ;;  %v7144_v34 = vld [vmem:[%s7504_s4 + $0xb0] sm:$0xff]  }
0x1392   : > { %6361 = vmatpush3.bf16.msra.mxu1 %v7119_v59  ;;  %6389 = vmatpush3.bf16.msra.mxu0 %v7120_v5  ;;  %v4515_v23 = vpack.c.bf16 %v4513_v13, %v4512_v22 }
0x1393   : > { %6362 = vmatprep.subr.bf16.mxu1 %v7121_v6  ;;  %6390 = vmatprep.subr.bf16.mxu0 %v7122_v10 }
0x1396   : > { %6363 = vmatpush3.bf16.msra.mxu1 %v7123_v63  ;;  %6391 = vmatpush3.bf16.msra.mxu0 %v7124_v4 }
0x1397   : > { %6364 = vmatprep.subr.bf16.mxu1 %v7125_v24  ;;  %6392 = vmatprep.subr.bf16.mxu0 %v7126_v25 }
0x1398   : > { %4773 = vmatmul.mubr.bf16.gmra.mrb[44].mxu1 %v4515_v23  ;;  %4826 = vmatmul.mubr.bf16.gmra.mrb[48].mxu0 %v4515_v23 }
0x139a   : > { %6365 = vmatpush3.bf16.msra.mxu1 %v7127_v26  ;;  %6393 = vmatpush3.bf16.msra.mxu0 %v7128_v27 }
0x139b   : > { %6366 = vmatprep.subr.bf16.mxu1 %v7129_v14  ;;  %6394 = vmatprep.subr.bf16.mxu0 %v7130_v16 }
0x139e   : > { %6367 = vmatpush3.bf16.msra.mxu1 %v7131_v18  ;;  %6395 = vmatpush3.bf16.msra.mxu0 %v7132_v28 }
0x139f   : > { %6368 = vmatprep.subr.bf16.mxu1 %v7133_v29  ;;  %6396 = vmatprep.subr.bf16.mxu0 %v7134_v8 }
0x13a2   : > { %6369 = vmatpush3.bf16.msra.mxu1 %v7135_v19  ;;  %6397 = vmatpush3.bf16.msra.mxu0 %v7136_v30 }
0x13a3   : > { %6370 = vmatprep.subr.bf16.mxu1 %v7137_v20  ;;  %6398 = vmatprep.subr.bf16.mxu0 %v7138_v21 }
0x13a6   : > { %6371 = vmatpush3.bf16.msra.mxu1 %v7139_v31  ;;  %6399 = vmatpush3.bf16.msra.mxu0 %v7140_v7 }
0x13a7   : > { %6372 = vmatprep.subr.bf16.mxu1 %v7141_v32  ;;  %6400 = vmatprep.subr.bf16.mxu0 %v7142_v9 }
0x13aa   : > { %6373 = vmatpush3.bf16.msra.mxu1 %v7143_v33  ;;  %6401 = vmatpush3.bf16.msra.mxu0 %v7144_v34 }
0x13ab   : > { %6374 = vmatprep.subr.bf16.mxu1 %v7145_v35  ;;  %6402 = vmatprep.subr.bf16.mxu0 %v7146_v12 }
0x13ae   : > { %6375 = vmatpush3.bf16.msra.mxu1 %v7147_v44  ;;  %6403 = vmatpush3.bf16.msra.mxu0 %v7148_v49 }
0x1463   : > { %v4764_v43 = vpop.f32.mrb[40].mxu1  ;;  %v4817_v45 = vpop.f32.mrb[44].mxu0 }
0x1464   : > { %v4765_v46 = vadd.f32 %v4764_v43, %v4553_v40  ;;  %v4818_v47 = vadd.f32 %v4817_v45, %v4561_v17  ;;  %v4766_v48 = vpop.f32.mrb[41].mxu1  ;;  %v4819_v50 = vpop.f32.mrb[45].mxu0 }
0x1465   : > { %v4767_v53 = vadd.f32 %v4766_v48, %v4557_v41  ;;  %v4820_v57 = vadd.f32 %v4819_v50, %v4565_v42  ;;  %v4768_v58 = vpop.f32.mrb[42].mxu1  ;;  %v4821_v60 = vpop.f32.mrb[46].mxu0 }
0x1466   : > { %v4853_v61 = vmul.f32 0.70710677, %v4765_v46  ;;  %v4855_v62 = vmul.f32 0.70710677, %v4818_v47  ;;  %v4769_v1 = vadd.f32 %v4768_v58, %v4553_v40  ;;  %v8246_v59 = vadd.f32 %v4821_v60, %v4561_v17  ;;  %v4770_v5 = vpop.f32.mrb[43].mxu1  ;;  %v4823_v6 = vpop.f32.mrb[47].mxu0 }
0x1467   : > { %v4854_v55 = vmul.f32 0.70710677, %v4767_v53  ;;  %v4856_v0 = vmul.f32 0.70710677, %v4820_v57  ;;  %v4771_v10 = vadd.f32 %v4770_v5, %v4557_v41  ;;  %v8248_v11 = vadd.f32 %v4823_v6, %v4565_v42 }
0x1468   : > { %7229 = verf.f32 %v4853_v61  ;;  %v4857_v13 = vmul.f32 0.70710677, %v4769_v1  ;;  %v4859_v63 = vmul.f32 0.70710677, %v8246_v59  ;;  %v4836_v49 = vmul.f32 0.5, %v4765_v46 }
0x1469   : > { %7231 = verf.f32 %v4855_v62  ;;  %v4858_v4 = vmul.f32 0.70710677, %v4771_v10  ;;  %v4860_v23 = vmul.f32 0.70710677, %v8248_v11  ;;  %v4838_v52 = vmul.f32 0.5, %v4818_v47 }
0x146a   : > { %7233 = verf.f32 %v4854_v55  ;;  %v4837_v54 = vmul.f32 0.5, %v4767_v53  ;;  %v4842_v50 = vmul.f32 0.5, %v8246_v59  ;;  %v4841_v53 = vmul.f32 0.5, %v4771_v10 }
0x146b   : > { %7235 = verf.f32 %v4856_v0  ;;  %v4774_v22 = vpop.f32.mrb[44].mxu1  ;;  %v4827_v25 = vpop.f32.mrb[48].mxu0 }
0x146c   : > { %7237 = verf.f32 %v4857_v13  ;;  %v8252_v24 = vadd.f32 %v4774_v22, %v4553_v40  ;;  %v4776_v26 = vpop.f32.mrb[45].mxu1  ;;  %v8254_v27 = vadd.f32 %v4827_v25, %v4561_v17  ;;  %v4829_v16 = vpop.f32.mrb[49].mxu0 }
0x146d   : > { %7239 = verf.f32 %v4859_v63  ;;  %v8256_v14 = vadd.f32 %v4776_v26, %v4557_v41  ;;  %v4778_v18 = vpop.f32.mrb[46].mxu1  ;;  %v8259_v29 = vadd.f32 %v4829_v16, %v4565_v42  ;;  %v4831_v8 = vpop.f32.mrb[50].mxu0 }
0x146e   : > { %7241 = verf.f32 %v4858_v4  ;;  %v4861_v28 = vmul.f32 0.70710677, %v8252_v24  ;;  %v4780_v19 = vpop.f32.mrb[47].mxu1  ;;  %v4863_v30 = vmul.f32 0.70710677, %v8254_v27  ;;  %v4833_v20 = vpop.f32.mrb[51].mxu0  ;;  %v4779_v7 = vadd.f32 %v4778_v18, %v4553_v40 }
0x146f   : > { %7243 = verf.f32 %v4860_v23  ;;  %v4862_v21 = vmul.f32 0.70710677, %v8256_v14  ;;  %v4864_v31 = vmul.f32 0.70710677, %v8259_v29  ;;  %v8264_v32 = vadd.f32 %v4831_v8, %v4561_v17 }
0x1470   : > { %7245 = verf.f32 %v4861_v28  ;;  %v8266_v9 = vadd.f32 %v4780_v19, %v4557_v41  ;;  %v4865_v35 = vmul.f32 0.70710677, %v4779_v7  ;;  %v8268_v12 = vadd.f32 %v4833_v20, %v4565_v42 }
0x1471   : > { %7247 = verf.f32 %v4863_v30  ;;  %v4867_v51 = vmul.f32 0.70710677, %v8264_v32  ;;  %v4839_v17 = vmul.f32 0.5, %v4820_v57  ;;  %v4840_v41 = vmul.f32 0.5, %v4769_v1 }
0x1472   : > { %v7230_v33 = vpop.eup %7229  ;;  %7249 = verf.f32 %v4862_v21  ;;  %v4866_v37 = vmul.f32 0.70710677, %v8266_v9  ;;  %v4868_v46 = vmul.f32 0.70710677, %v8268_v12  ;;  %v4843_v1 = vmul.f32 0.5, %v8248_v11 }
0x1473   : > { %v7232_v34 = vpop.eup %7231  ;;  %7251 = verf.f32 %v4864_v31  ;;  %v4885_v36 = vadd.f32 1.0, %v7230_v33  ;;  %v4844_v19 = vmul.f32 0.5, %v8252_v24  ;;  %v4846_v20 = vmul.f32 0.5, %v8254_v27 }
0x1474   : > { %v7234_v44 = vpop.eup %7233  ;;  %7253 = verf.f32 %v4865_v35  ;;  %v4887_v40 = vadd.f32 1.0, %v7232_v34  ;;  %v4848_v31 = vmul.f32 0.5, %v4779_v7  ;;  %v4845_v35 = vmul.f32 0.5, %v8256_v14 }
0x1475   : > { %v7236_v56 = vpop.eup %7235  ;;  %7255 = verf.f32 %v4867_v51  ;;  %v4886_v42 = vadd.f32 1.0, %v7234_v44  ;;  %v4901_v61 = vmul.f32 %v4885_v36, %v4836_v49  ;;  %v4850_v44 = vmul.f32 0.5, %v8264_v32 }
0x1476   : > { %v7238_v15 = vpop.eup %7237  ;;  %7257 = verf.f32 %v4866_v37  ;;  %v4888_v48 = vadd.f32 1.0, %v7236_v56  ;;  %v4903_v57 = vmul.f32 %v4887_v40, %v4838_v52  ;;  %v4849_v52 = vmul.f32 0.5, %v8266_v9 }
0x1477   : > { %v7240_v43 = vpop.eup %7239  ;;  %v4889_v45 = vadd.f32 1.0, %v7238_v15  ;;  %7259 = verf.f32 %v4868_v46  ;;  %v4902_v13 = vmul.f32 %v4886_v42, %v4837_v54  ;;  %v4847_v7 = vmul.f32 0.5, %v8259_v29 }
0x1478   : > { %v7242_v47 = vpop.eup %7241  ;;  %v4891_v58 = vadd.f32 1.0, %v7240_v43  ;;  %v4904_v23 = vmul.f32 %v4888_v48, %v4839_v17  ;;  %v4851_v15 = vmul.f32 0.5, %v8268_v12  ;;  %v6031_v12 = vld [vmem:[%s8408_s5] ss:$0 sm:$0xff] }
0x1479   : > { %v7244_v60 = vpop.eup %7243  ;;  %v4905_v62 = vmul.f32 %v4889_v45, %v4840_v41  ;;  %v4890_v55 = vadd.f32 1.0, %v7242_v47 }
0x147a   : > { %v4907_v0 = vmul.f32 %v4891_v58, %v4842_v50  ;;  %v4892_v5 = vadd.f32 1.0, %v7244_v60  ;;  %v7246_v6 = vpop.eup %7245 }
0x147b   : > { %v4917_v63 = vpack.c.bf16 %v4905_v62, %v4901_v61  ;;  %v4906_v4 = vmul.f32 %v4890_v55, %v4841_v53  ;;  %v7248_v22 = vpop.eup %7247  ;;  %v4893_v18 = vadd.f32 1.0, %v7246_v6 }
0x147c   : > { %v4919_v25 = vpack.c.bf16 %v4907_v0, %v4903_v57  ;;  %v4908_v59 = vmul.f32 %v4892_v5, %v4843_v1  ;;  %v7250_v26 = vpop.eup %7249  ;;  %v4895_v30 = vadd.f32 1.0, %v7248_v22  ;;  %v6064_v0 = vld [vmem:[%s8409_s24] ss:$0 sm:$0xff] }
0x147d   : > { %v4918_v10 = vpack.c.bf16 %v4906_v4, %v4902_v13  ;;  %v7252_v16 = vpop.eup %7251  ;;  %v4894_v21 = vadd.f32 1.0, %v7250_v26  ;;  %v4909_v24 = vmul.f32 %v4893_v18, %v4844_v19 }
0x147e   : > { %v4920_v28 = vpack.c.bf16 %v4908_v59, %v4904_v23  ;;  %v7254_v8 = vpop.eup %7253  ;;  %v4896_v51 = vadd.f32 1.0, %v7252_v16  ;;  %v4911_v27 = vmul.f32 %v4895_v30, %v4846_v20 }
0x147f   : > { %5220 = vmatprep.mubr.bf16.mxu1 %v4918_v10  ;;  %v7256_v11 = vpop.eup %7255  ;;  %v4897_v33 = vadd.f32 1.0, %v7254_v8  ;;  %v4910_v40 = vmul.f32 %v4894_v21, %v4845_v35 }
0x1480   : > { %5269 = vmatprep.mubr.bf16.mxu0 %v4920_v28  ;;  %5221 = vmatmul.mubr.bf16.vlgmr.msra.gmra.mrb[48].mxu1 %v4917_v63  ;;  %v7258_v34 = vpop.eup %7257  ;;  %v4899_v49 = vadd.f32 1.0, %v7256_v11  ;;  %v4912_v43 = vmul.f32 %v4896_v51, %v4847_v7 }
0x1481   : > { %5270 = vmatmul.mubr.bf16.vlgmr.msra.gmra.mrb[52].mxu0 %v4919_v25  ;;  %v4913_v56 = vmul.f32 %v4897_v33, %v4848_v31  ;;  %v4898_v36 = vadd.f32 1.0, %v7258_v34  ;;  %v7260_v54 = vpop.eup %7259 }
0x1482   : > { %v4915_v37 = vmul.f32 %v4899_v49, %v4850_v44  ;;  %v4900_v17 = vadd.f32 1.0, %v7260_v54 }
0x1483   : > { %v4914_v14 = vmul.f32 %v4898_v36, %v4849_v52  ;;  %v4921_v32 = vpack.c.bf16 %v4913_v56, %v4909_v24 }
0x1484   : > { %v4923_v41 = vpack.c.bf16 %v4915_v37, %v4911_v27  ;;  %v4916_v9 = vmul.f32 %v4900_v17, %v4851_v15 }
0x1485   : > { %v4922_v42 = vpack.c.bf16 %v4914_v14, %v4910_v40 }
0x1486   : > { %v4924_v45 = vpack.c.bf16 %v4916_v9, %v4912_v43 }
0x1487   : > { %5228 = vmatprep.mubr.bf16.mxu1 %v4922_v42 }
0x1488   : > { %5229 = vmatmul.mubr.bf16.gmra.mrb[52].mxu1 %v4921_v32  ;;  %5277 = vmatprep.mubr.bf16.mxu0 %v4924_v45 }
0x1489   : > { %5278 = vmatmul.mubr.bf16.gmra.mrb[56].mxu0 %v4923_v41 }
0x1553   : > { %v6376_v46 = vpop.f32.mrb[48].mxu1 }
0x1554   : > { %v6404_v29 = vpop.f32.mrb[52].mxu0  ;;  %v6377_v47 = vpop.f32.mrb[49].mxu1 }
0x1555   : > { %v6378_v48 = vadd.f32 %v6377_v47, %v6376_v46  ;;  %v6405_v50 = vpop.f32.mrb[53].mxu0  ;;  %v6379_v58 = vpop.f32.mrb[50].mxu1 }
0x1556   : > { %v6406_v53 = vadd.f32 %v6405_v50, %v6404_v29  ;;  %v6407_v60 = vpop.f32.mrb[54].mxu0  ;;  %v6380_v61 = vpop.f32.mrb[51].mxu1 }
0x1557   : > { %v5223_v62 = vadd.f32 %v6378_v48, %v6031_v12  ;;  %v6381_v55 = vadd.f32 %v6380_v61, %v6379_v58  ;;  %v6408_v57 = vpop.f32.mrb[55].mxu0  ;;  %v6067_v61 = vld [vmem:[%s8412_s3] ss:$0 sm:$0xff] (!%p6065_p5) }
0x1558   : > { %v6409_v1 = vadd.f32 %v6408_v57, %v6407_v60 }
0x1559   : > { %v5272_v5 = vadd.f32 %v6406_v53, %v5223_v62  ;;  %v5226_v6 = vadd.f32 %v6381_v55, %v6031_v12  ;;  %v6066_v53 = vld [vmem:[%s8411_s0] ss:$0 sm:$0xff] (!%p6065_p5) }
0x155b   : > { %v5293_v13 = vmul.f32 %v6064_v0, %v5272_v5  ;;  %v5275_v63 = vadd.f32 %v6409_v1, %v5226_v6  ;;  %v6382_v4 = vpop.f32.mrb[52].mxu1 }
0x155c   : > { %v6383_v25 = vpop.f32.mrb[53].mxu1  ;;  %v6410_v59 = vpop.f32.mrb[56].mxu0 }
0x155d   : > { %v5297_v22 = vadd.f32 %v5293_v13, %v8131_v3  ;;  %v5294_v23 = vmul.f32 %v6064_v0, %v5275_v63  ;;  %v6384_v26 = vadd.f32 %v6383_v25, %v6382_v4  ;;  %v6385_v10 = vpop.f32.mrb[54].mxu1  ;;  %v6411_v18 = vpop.f32.mrb[57].mxu0 }
0x155e   : > { %v6386_v28 = vpop.f32.mrb[55].mxu1  ;;  %v6412_v19 = vadd.f32 %v6411_v18, %v6410_v59  ;;  %v6413_v30 = vpop.f32.mrb[58].mxu0 }
0x155f   : > { %5301 = vst [vmem:[#allocation2] sm:$0xff] %v5297_v22  ;;  %v5298_v16 = vadd.f32 %v5294_v23, %v8134_v2  ;;  %v5231_v8 = vadd.f32 %v6384_v26, %v6031_v12  ;;  %v6387_v11 = vadd.f32 %v6386_v28, %v6385_v10  ;;  %v6414_v20 = vpop.f32.mrb[59].mxu0  ;;  %5311 = vadd.xlane.f32.xlu0 (!%p6065_p5), %v5297_v22 }
0x1560   : > { %v6415_v33 = vadd.f32 %v6414_v20, %v6413_v30 }
0x1561   : > { %5302 = vst [vmem:[#allocation2 + $0x8] sm:$0xff] %v5298_v16  ;;  %v5280_v21 = vadd.f32 %v6412_v19, %v5231_v8  ;;  %v5234_v31 = vadd.f32 %v6387_v11, %v6031_v12 }
0x1563   : > { %v5295_v3 = vmul.f32 %v6064_v0, %v5280_v21  ;;  %v5283_v34 = vadd.f32 %v6415_v33, %v5234_v31  ;;  %5308 = sbr.rel (%p6065_p5) target bundleno = 5795 (0x16a3), region = 124  ;;  %5313 = vadd.xlane.f32.xlu0 (!%p6065_p5), %v5298_v16 }
0x1565   : > { %v5299_v35 = vadd.f32 %v5295_v3, %v8137_v38  ;;  %v5296_v44 = vmul.f32 %v6064_v0, %v5283_v34 }
0x1567   : > { %5303 = vst [vmem:[#allocation2 + $0x10] sm:$0xff] %v5299_v35  ;;  %v5300_v49 = vadd.f32 %v5296_v44, %v8140_v39  ;;  %5315 = vadd.xlane.f32.xlu1 (!%p6065_p5), %v5299_v35 }
0x1569   : > { %5304 = vst [vmem:[#allocation2 + $0x18] sm:$0xff] %v5300_v49 }
0x156b   : > { %5317 = vadd.xlane.f32.xlu1 %v5300_v49 }
0x15ec   : > { %v5312_v2 = vpop.xlane.xlu0 %5311 }
0x15ed   : > { %v5319_v24 = vmul.f32 0.0078125, %v5312_v2 }
0x15ef   : > { %v5323_v56 = vsub.f32 %v5297_v22, %v5319_v24 }
0x15f0   : > { %v5314_v54 = vpop.xlane.xlu0 %5313 }
0x15f1   : > { %v5320_v27 = vmul.f32 0.0078125, %v5314_v54  ;;  %v5327_v7 = vmul.f32 %v5323_v56, %v5323_v56 }
0x15f3   : > { %v5324_v39 = vsub.f32 %v5298_v16, %v5320_v27  ;;  %5331 = vadd.xlane.f32.xlu0 %v5327_v7 }
0x15f4   : > { %v5316_v52 = vpop.xlane.xlu1 %5315 }
0x15f5   : > { %v5321_v51 = vmul.f32 0.0078125, %v5316_v52  ;;  %v5328_v14 = vmul.f32 %v5324_v39, %v5324_v39 }
0x15f7   : > { %v5325_v36 = vsub.f32 %v5299_v35, %v5321_v51  ;;  %5333 = vadd.xlane.f32.xlu1 %v5328_v14 }
0x15f8   : > { %v5318_v38 = vpop.xlane.xlu1 %5317 }
0x15f9   : > { %v5322_v37 = vmul.f32 0.0078125, %v5318_v38  ;;  %v5329_v40 = vmul.f32 %v5325_v36, %v5325_v36 }
0x15fb   : > { %v5326_v15 = vsub.f32 %v5300_v49, %v5322_v37  ;;  %5335 = vadd.xlane.f32.xlu0 %v5329_v40 }
0x15fd   : > { %v5330_v17 = vmul.f32 %v5326_v15, %v5326_v15 }
0x15ff   : > { %5337 = vadd.xlane.f32.xlu1 %v5330_v17 }
0x1680   : > { %v5332_v32 = vpop.xlane.xlu0 %5331 }
0x1681   : > { %v5339_v41 = vmul.f32 0.0078125, %v5332_v32 }
0x1683   : > { %v5343_v43 = vadd.f32 1e-06, %v5339_v41 }
0x1684   : > { %v5334_v9 = vpop.xlane.xlu1 %5333 }
0x1685   : > { %7269 = vrsqrt.f32 %v5343_v43  ;;  %v5340_v45 = vmul.f32 0.0078125, %v5334_v9 }
0x1687   : > { %v5344_v29 = vadd.f32 1e-06, %v5340_v45 }
0x1688   : > { %v5336_v42 = vpop.xlane.xlu0 %5335 }
0x1689   : > { %v5341_v46 = vmul.f32 0.0078125, %v5336_v42  ;;  %7271 = vrsqrt.f32 %v5344_v29 }
0x168b   : > { %v5345_v12 = vadd.f32 1e-06, %v5341_v46 }
0x168c   : > { %v5338_v47 = vpop.xlane.xlu1 %5337 }
0x168d   : > { %v5342_v48 = vmul.f32 0.0078125, %v5338_v47  ;;  %7273 = vrsqrt.f32 %v5345_v12 }
0x168f   : > { %v5346_v50 = vadd.f32 1e-06, %v5342_v48  ;;  %v7270_v58 = vpop.eup %7269 }
0x1690   : > { %v5351_v60 = vmul.f32 %v7270_v58, %v5323_v56 }
0x1691   : > { %7275 = vrsqrt.f32 %v5346_v50 }
0x1692   : > { %v5361_v62 = vmul.f32 %v6066_v53, %v5351_v60 }
0x1693   : > { %v7272_v55 = vpop.eup %7271 }
0x1694   : > { %v5371_v0 = vadd.f32 %v6067_v61, %v5361_v62  ;;  %v5352_v1 = vmul.f32 %v7272_v55, %v5324_v39 }
0x1696   : > { %5375 = vst [vmem:[%s8413_s26] sm:$0xff] %v5371_v0  ;;  %v5362_v6 = vmul.f32 %v6066_v53, %v5352_v1 }
0x1697   : > { %v7274_v57 = vpop.eup %7273 }
0x1698   : > { %v5353_v5 = vmul.f32 %v7274_v57, %v5325_v36  ;;  %v5372_v4 = vadd.f32 %v6067_v61, %v5362_v6 }
0x169a   : > { %v5363_v63 = vmul.f32 %v6066_v53, %v5353_v5  ;;  %5376 = vst [vmem:[%s8413_s26 + $0x8] sm:$0xff] %v5372_v4 }
0x169b   : > { %v7276_v13 = vpop.eup %7275 }
0x169c   : > { %v5354_v22 = vmul.f32 %v7276_v13, %v5326_v15  ;;  %v5373_v23 = vadd.f32 %v6067_v61, %v5363_v63 }
0x169e   : > { %v5364_v25 = vmul.f32 %v6066_v53, %v5354_v22  ;;  %5377 = vst [vmem:[%s8413_s26 + $0x10] sm:$0xff] %v5373_v23 }
0x16a0   : > { %v5374_v59 = vadd.f32 %v6067_v61, %v5364_v25 }
0x16a2   : > { %5378 = vst [vmem:[%s8413_s26 + $0x18] sm:$0xff] %v5374_v59 }
0x16a3 PF: > { %s8414_s25 = sld [smem:[#allocation3_spill]] }
0x16a9   : > { %s34_s5 = sadd.s32 1, %s8414_s25  }
0x16aa   : > { %p31_p6 = scmp.ge.s32.totalorder %s34_s5, 4  }
0x16ac   :  { %33 = sbr.rel (!%p31_p6) target bundleno = 16 (0x10), region = 222 }

</bundles_post_ra>
